<compile_context>
chip_gen: v7x
topology: tpu7x:2x2x1
jax: 0.10.0
libtpu: 0.0.40
codegen_flags: <defaults>
</compile_context>

<pallas_src>
import functools

import jax
import jax.numpy as jnp
from jax import lax
from jax.experimental import pallas as pl
from jax.experimental.pallas import tpu as pltpu


def _sam_kernel(xh_ref, xm_ref,
                hw_ref, hb_ref, mw_ref, mb_ref,
                z1wh_ref, z1wm_ref, z1b_ref,
                z2wz_ref, z2wx_ref, z2b_ref,
                oh_ref, om_ref, *, C, HW):
    xh = xh_ref[...]                     # (C, HW)  channel-major hidden state
    xm = xm_ref[...]                     # (C, HW)  channel-major memory

    # --- 1x1 convs as W(Cout, Cin) @ x(Cin, HW) matmuls (lane dim = HW) ---
    proj_h = jnp.dot(hw_ref[...], xh, preferred_element_type=jnp.float32) + hb_ref[...]
    proj_m = jnp.dot(mw_ref[...], xm, preferred_element_type=jnp.float32) + mb_ref[...]

    # Row (sublane) slices at multiples of 8 -> whole-vreg selects, no relayout.
    qh = proj_h[0 * C:1 * C, :]          # (C, HW)
    kh = proj_h[1 * C:2 * C, :]
    vh = proj_h[2 * C:3 * C, :]
    km = proj_m[0 * C:1 * C, :]
    vm = proj_m[1 * C:2 * C, :]

    # --- fused spatial-attention scores: S = Qh^T @ [Kh | Km] -> (HW, 2*HW) ---
    # Concat and result slices are 128-lane aligned; contraction over axis 0 of
    # both operands lets Mosaic use the MXU transposed-operand path.
    kcat = jnp.concatenate([kh, km], axis=-1)                        # (C, 2*HW)
    s = lax.dot_general(qh, kcat, (((0,), (0,)), ((), ())),
                        preferred_element_type=jnp.float32)          # (HW, 2*HW)
    sh = s[:, :HW]
    sm = s[:, HW:]

    def _softmax(x):
        m = jnp.max(x, axis=-1, keepdims=True)
        e = jnp.exp(x - m)
        return e * pl.reciprocal(jnp.sum(e, axis=-1, keepdims=True), approx=True)

    ah = _softmax(sh)                    # (HW, HW), softmax over last axis
    am = _softmax(sm)

    # --- Zh = Vh @ Ah (channel-major): K = HW = 256 -> well-filled MXU pass ---
    zh = jnp.dot(vh, ah, preferred_element_type=jnp.float32)         # (C, HW)
    zm = jnp.dot(vm, am, preferred_element_type=jnp.float32)         # (C, HW)

    # --- z_conv1 with split weights (no channel concat) ---
    z = (jnp.dot(z1wh_ref[...], zh, preferred_element_type=jnp.float32)
         + jnp.dot(z1wm_ref[...], zm, preferred_element_type=jnp.float32)
         + z1b_ref[...])                                             # (2C, HW)

    # --- z_conv2 with split weights (no concat([Z, ih])) ---
    gates = (jnp.dot(z2wz_ref[...], z, preferred_element_type=jnp.float32)
             + jnp.dot(z2wx_ref[...], xh, preferred_element_type=jnp.float32)
             + z2b_ref[...])                                         # (3C, HW)

    o_g = gates[0 * C:1 * C, :]
    g_g = gates[1 * C:2 * C, :]
    i_g = gates[2 * C:3 * C, :]

    i_s = jax.nn.sigmoid(i_g)
    om = jnp.tanh(g_g) * i_s + (1.0 - i_s) * xm
    oh = jax.nn.sigmoid(o_g) * om

    oh_ref[...] = oh                     # (C, HW): lane-dense, unmasked stores
    om_ref[...] = om


def sam_forward(ih, im, params):
    """ih, im: NCHW (B, C, H, W) float32. Returns (oh, om) in NCHW."""
    B, C, H, W = ih.shape
    HW = H * W

    # NCHW -> (B, C, HW): pure reshape (channel-major kernel layout, no transposes).
    xh = ih.reshape(B, C, HW)
    xm = im.reshape(B, C, HW)

    # PyTorch Conv2d 1x1 weights are (out, in[,1,1]); channel-major uses them as-is.
    hw = params["h_w"]                          # (3C, C)
    hb = params["h_b"].reshape(3 * C, 1)
    mw = params["m_w"]                          # (2C, C)
    mb = params["m_b"].reshape(2 * C, 1)
    z1wh = params["z1_w"][:, :C]                # (2C, C) — acts on Zh
    z1wm = params["z1_w"][:, C:]                # (2C, C) — acts on Zm
    z1b = params["z1_b"].reshape(2 * C, 1)
    z2wz = params["z2_w"][:, :2 * C]            # (3C, 2C) — acts on Z
    z2wx = params["z2_w"][:, 2 * C:]            # (3C, C)  — acts on ih
    z2b = params["z2_b"].reshape(3 * C, 1)

    per_batch = pl.BlockSpec((None, C, HW), lambda b: (b, 0, 0))   # squeezed batch dim
    shared = lambda a: pl.BlockSpec(a.shape, lambda b: (0,) * a.ndim)

    kernel = functools.partial(_sam_kernel, C=C, HW=HW)

    oh, om = pl.pallas_call(
        kernel,
        out_shape=(jax.ShapeDtypeStruct((B, C, HW), jnp.float32),
                   jax.ShapeDtypeStruct((B, C, HW), jnp.float32)),
        grid_spec=pltpu.PrefetchScalarGridSpec(
            num_scalar_prefetch=0,
            grid=(B,),
            in_specs=[per_batch, per_batch,
                      shared(hw), shared(hb), shared(mw), shared(mb),
                      shared(z1wh), shared(z1wm), shared(z1b),
                      shared(z2wz), shared(z2wx), shared(z2b)],
            out_specs=[per_batch, per_batch],
        ),
        compiler_params=pltpu.CompilerParams(
            dimension_semantics=("parallel",)),
    )(xh, xm, hw, hb, mw, mb, z1wh, z1wm, z1b, z2wz, z2wx, z2b)

    return oh.reshape(B, C, H, W), om.reshape(B, C, H, W)


def sam_reference(ih, im, p):
    """Pure-JAX NCHW reference mirroring the (intended) PyTorch forward."""
    B, C, H, W = ih.shape
    HW = H * W

    def conv1x1(x, w, b):  # x: (B, Cin, H, W), w: (Cout, Cin), b: (Cout,)
        return jnp.einsum("oc,bchw->bohw", w, x,
                          precision=lax.Precision.HIGHEST) + b[None, :, None, None]

    h_qkv = conv1x1(ih, p["h_w"], p["h_b"])
    m_kv = conv1x1(im, p["m_w"], p["m_b"])
    Qh, Kh, Vh = jnp.split(h_qkv, 3, axis=1)
    Km, Vm = jnp.split(m_kv, 2, axis=1)
    Qh = Qh.reshape(B, C, HW).transpose(0, 2, 1)
    Kh = Kh.reshape(B, C, HW)
    Vh = Vh.reshape(B, C, HW)
    Km = Km.reshape(B, C, HW)
    Vm = Vm.reshape(B, C, HW)
    Ah = jax.nn.softmax(jnp.einsum("bic,bcj->bij", Qh, Kh,
                                   precision=lax.Precision.HIGHEST), axis=-1)
    Am = jax.nn.softmax(jnp.einsum("bic,bcj->bij", Qh, Km,
                                   precision=lax.Precision.HIGHEST), axis=-1)
    Zh = jnp.einsum("bck,bkj->bcj", Vh, Ah, precision=lax.Precision.HIGHEST)
    Zm = jnp.einsum("bck,bkj->bcj", Vm, Am, precision=lax.Precision.HIGHEST)
    Zcat = jnp.concatenate([Zh, Zm], axis=1).reshape(B, 2 * C, H, W)
    Z = conv1x1(Zcat, p["z1_w"], p["z1_b"])
    comb = jnp.concatenate([Z, ih], axis=1)
    gates = conv1x1(comb, p["z2_w"], p["z2_b"])
    o, g, i = jnp.split(gates, 3, axis=1)
    i = jax.nn.sigmoid(i)
    om = jnp.tanh(g) * i + (1 - i) * im
    oh = jax.nn.sigmoid(o) * om
    return oh, om


def init_params(key, C):
    """Deterministic parameter init matching the nn.Module __init__ shapes."""
    ks = jax.random.split(key, 8)
    def w(k, out_c, in_c):
        return (jax.random.normal(k, (out_c, in_c), jnp.float32) / jnp.sqrt(in_c))
    def b(k, out_c):
        return 0.1 * jax.random.normal(k, (out_c,), jnp.float32)
    return {
        "h_w": w(ks[0], 3 * C, C), "h_b": b(ks[1], 3 * C),        # h_conv: C -> 3C
        "m_w": w(ks[2], 2 * C, C), "m_b": b(ks[3], 2 * C),        # m_conv: C -> 2C
        "z1_w": w(ks[4], 2 * C, 2 * C), "z1_b": b(ks[5], 2 * C),  # z_conv1: 2C -> 2C
        "z2_w": w(ks[6], 3 * C, 3 * C), "z2_b": b(ks[7], 3 * C),  # z_conv2: 3C -> 3C
    }


if __name__ == "__main__":
    B, C, H, W = 2, 32, 16, 16
    key = jax.random.PRNGKey(0)
    k_ih, k_im, k_p = jax.random.split(key, 3)
    ih = jax.random.normal(k_ih, (B, C, H, W), jnp.float32)
    im = jax.random.normal(k_im, (B, C, H, W), jnp.float32)
    params = init_params(k_p, C)

    oh, om = jax.jit(sam_forward)(ih, im, params)
    jax.block_until_ready((oh, om))

    oh_ref, om_ref = sam_reference(ih, im, params)
    assert oh.shape == (B, C, H, W) and om.shape == (B, C, H, W)
    assert jnp.allclose(oh, oh_ref, atol=1e-2, rtol=1e-2), "oh mismatch vs reference"
    assert jnp.allclose(om, om_ref, atol=1e-2, rtol=1e-2), "om mismatch vs reference"

    print("KERNEL_OK")
</pallas_src>

<mosaic_0001>
module attributes {stable_mosaic.version = 11 : i64} {
  func.func @_sam_kernel(%arg0: i32, %arg1: memref<1x32x256xf32, #tpu.memory_space<vmem>>, %arg2: memref<1x32x256xf32, #tpu.memory_space<vmem>>, %arg3: memref<96x32xf32, #tpu.memory_space<vmem>>, %arg4: memref<96x1xf32, #tpu.memory_space<vmem>>, %arg5: memref<64x32xf32, #tpu.memory_space<vmem>>, %arg6: memref<64x1xf32, #tpu.memory_space<vmem>>, %arg7: memref<64x32xf32, #tpu.memory_space<vmem>>, %arg8: memref<64x32xf32, #tpu.memory_space<vmem>>, %arg9: memref<64x1xf32, #tpu.memory_space<vmem>>, %arg10: memref<96x64xf32, #tpu.memory_space<vmem>>, %arg11: memref<96x32xf32, #tpu.memory_space<vmem>>, %arg12: memref<96x1xf32, #tpu.memory_space<vmem>>, %arg13: memref<1x32x256xf32, #tpu.memory_space<vmem>>, %arg14: memref<1x32x256xf32, #tpu.memory_space<vmem>>) attributes {dimension_semantics = [#tpu.dimension_semantics<parallel>], iteration_bounds = array<i64: 2>, scalar_prefetch = 0 : i64, scratch_operands = 0 : i64, tpu.core_type = #tpu.core_type<tc>, window_params = [{transform_indices = @transform_0, window_bounds = array<i64: 1, 32, 256>}, {transform_indices = @transform_1, window_bounds = array<i64: 1, 32, 256>}, {pipeline_mode = #tpu.pipeline_mode<synchronous>, transform_indices = @transform_2, window_bounds = array<i64: 96, 32>}, {pipeline_mode = #tpu.pipeline_mode<synchronous>, transform_indices = @transform_3, window_bounds = array<i64: 96, 1>}, {pipeline_mode = #tpu.pipeline_mode<synchronous>, transform_indices = @transform_4, window_bounds = array<i64: 64, 32>}, {pipeline_mode = #tpu.pipeline_mode<synchronous>, transform_indices = @transform_5, window_bounds = array<i64: 64, 1>}, {pipeline_mode = #tpu.pipeline_mode<synchronous>, transform_indices = @transform_6, window_bounds = array<i64: 64, 32>}, {pipeline_mode = #tpu.pipeline_mode<synchronous>, transform_indices = @transform_7, window_bounds = array<i64: 64, 32>}, {pipeline_mode = #tpu.pipeline_mode<synchronous>, transform_indices = @transform_8, window_bounds = array<i64: 64, 1>}, {pipeline_mode = #tpu.pipeline_mode<synchronous>, transform_indices = @transform_9, window_bounds = array<i64: 96, 64>}, {pipeline_mode = #tpu.pipeline_mode<synchronous>, transform_indices = @transform_10, window_bounds = array<i64: 96, 32>}, {pipeline_mode = #tpu.pipeline_mode<synchronous>, transform_indices = @transform_11, window_bounds = array<i64: 96, 1>}, {transform_indices = @transform_12, window_bounds = array<i64: 1, 32, 256>}, {transform_indices = @transform_13, window_bounds = array<i64: 1, 32, 256>}]} {
    %c0 = arith.constant 0 : index
    %c0_0 = arith.constant 0 : index
    %c0_1 = arith.constant 0 : index
    %0 = vector.load %arg1[%c0, %c0_0, %c0_1] : memref<1x32x256xf32, #tpu.memory_space<vmem>>, vector<1x32x256xf32>
    %1 = vector.shape_cast %0 : vector<1x32x256xf32> to vector<32x256xf32>
    %c0_2 = arith.constant 0 : index
    %c0_3 = arith.constant 0 : index
    %c0_4 = arith.constant 0 : index
    %2 = vector.load %arg2[%c0_2, %c0_3, %c0_4] : memref<1x32x256xf32, #tpu.memory_space<vmem>>, vector<1x32x256xf32>
    %3 = vector.shape_cast %2 : vector<1x32x256xf32> to vector<32x256xf32>
    %c0_5 = arith.constant 0 : index
    %c0_6 = arith.constant 0 : index
    %4 = vector.load %arg3[%c0_5, %c0_6] : memref<96x32xf32, #tpu.memory_space<vmem>>, vector<96x32xf32>
    %cst = arith.constant dense<0.000000e+00> : vector<96x256xf32>
    %5 = tpu.matmul %4, %1, %cst {dimension_numbers = #tpu.dot_dimension_numbers<[1], [0], [0], [1], [0, 0, 1, 1], [], []>} : vector<96x32xf32>, vector<32x256xf32>, vector<96x256xf32> -> vector<96x256xf32>
    %c0_7 = arith.constant 0 : index
    %c0_8 = arith.constant 0 : index
    %6 = vector.load %arg4[%c0_7, %c0_8] : memref<96x1xf32, #tpu.memory_space<vmem>>, vector<96x1xf32>
    %7 = vector.broadcast %6 : vector<96x1xf32> to vector<96x256xf32>
    %8 = arith.addf %5, %7 : vector<96x256xf32>
    %c0_9 = arith.constant 0 : index
    %c0_10 = arith.constant 0 : index
    %9 = vector.load %arg5[%c0_9, %c0_10] : memref<64x32xf32, #tpu.memory_space<vmem>>, vector<64x32xf32>
    %cst_11 = arith.constant dense<0.000000e+00> : vector<64x256xf32>
    %10 = tpu.matmul %9, %3, %cst_11 {dimension_numbers = #tpu.dot_dimension_numbers<[1], [0], [0], [1], [0, 0, 1, 1], [], []>} : vector<64x32xf32>, vector<32x256xf32>, vector<64x256xf32> -> vector<64x256xf32>
    %c0_12 = arith.constant 0 : index
    %c0_13 = arith.constant 0 : index
    %11 = vector.load %arg6[%c0_12, %c0_13] : memref<64x1xf32, #tpu.memory_space<vmem>>, vector<64x1xf32>
    %12 = vector.broadcast %11 : vector<64x1xf32> to vector<64x256xf32>
    %13 = arith.addf %10, %12 : vector<64x256xf32>
    %14 = vector.extract_strided_slice %8 {offsets = [0, 0], sizes = [32, 256], strides = [1, 1]} : vector<96x256xf32> to vector<32x256xf32>
    %15 = vector.extract_strided_slice %8 {offsets = [32, 0], sizes = [32, 256], strides = [1, 1]} : vector<96x256xf32> to vector<32x256xf32>
    %16 = vector.extract_strided_slice %8 {offsets = [64, 0], sizes = [32, 256], strides = [1, 1]} : vector<96x256xf32> to vector<32x256xf32>
    %17 = vector.extract_strided_slice %13 {offsets = [0, 0], sizes = [32, 256], strides = [1, 1]} : vector<64x256xf32> to vector<32x256xf32>
    %18 = vector.extract_strided_slice %13 {offsets = [32, 0], sizes = [32, 256], strides = [1, 1]} : vector<64x256xf32> to vector<32x256xf32>
    %19 = tpu.concatenate %15, %17 in 1 : vector<32x256xf32>, vector<32x256xf32> -> vector<32x512xf32>
    %cst_14 = arith.constant dense<0.000000e+00> : vector<256x512xf32>
    %20 = tpu.matmul %14, %19, %cst_14 {dimension_numbers = #tpu.dot_dimension_numbers<[0], [0], [1], [1], [0, 1, 1, 1], [], []>} : vector<32x256xf32>, vector<32x512xf32>, vector<256x512xf32> -> vector<256x512xf32>
    %21 = vector.extract_strided_slice %20 {offsets = [0, 0], sizes = [256, 256], strides = [1, 1]} : vector<256x512xf32> to vector<256x256xf32>
    %22 = vector.extract_strided_slice %20 {offsets = [0, 256], sizes = [256, 256], strides = [1, 1]} : vector<256x512xf32> to vector<256x256xf32>
    %cst_15 = arith.constant dense<0xFF800000> : vector<256xf32>
    %23 = vector.multi_reduction <maximumf>, %21, %cst_15 [1] : vector<256x256xf32> to vector<256xf32>
    %24 = vector.shape_cast %23 : vector<256xf32> to vector<256x1xf32>
    %25 = vector.broadcast %24 : vector<256x1xf32> to vector<256x256xf32>
    %26 = arith.subf %21, %25 : vector<256x256xf32>
    %27 = math.exp %26 : vector<256x256xf32>
    %cst_16 = arith.constant dense<0.000000e+00> : vector<256xf32>
    %28 = vector.multi_reduction <add>, %27, %cst_16 [1] : vector<256x256xf32> to vector<256xf32>
    %29 = vector.shape_cast %28 : vector<256xf32> to vector<256x1xf32>
    %30 = tpu.reciprocal %29 {approx = true} : vector<256x1xf32> -> vector<256x1xf32>
    %31 = vector.broadcast %30 : vector<256x1xf32> to vector<256x256xf32>
    %32 = arith.mulf %27, %31 : vector<256x256xf32>
    %cst_17 = arith.constant dense<0xFF800000> : vector<256xf32>
    %33 = vector.multi_reduction <maximumf>, %22, %cst_17 [1] : vector<256x256xf32> to vector<256xf32>
    %34 = vector.shape_cast %33 : vector<256xf32> to vector<256x1xf32>
    %35 = vector.broadcast %34 : vector<256x1xf32> to vector<256x256xf32>
    %36 = arith.subf %22, %35 : vector<256x256xf32>
    %37 = math.exp %36 : vector<256x256xf32>
    %cst_18 = arith.constant dense<0.000000e+00> : vector<256xf32>
    %38 = vector.multi_reduction <add>, %37, %cst_18 [1] : vector<256x256xf32> to vector<256xf32>
    %39 = vector.shape_cast %38 : vector<256xf32> to vector<256x1xf32>
    %40 = tpu.reciprocal %39 {approx = true} : vector<256x1xf32> -> vector<256x1xf32>
    %41 = vector.broadcast %40 : vector<256x1xf32> to vector<256x256xf32>
    %42 = arith.mulf %37, %41 : vector<256x256xf32>
    %cst_19 = arith.constant dense<0.000000e+00> : vector<32x256xf32>
    %43 = tpu.matmul %16, %32, %cst_19 {dimension_numbers = #tpu.dot_dimension_numbers<[1], [0], [0], [1], [0, 0, 1, 1], [], []>} : vector<32x256xf32>, vector<256x256xf32>, vector<32x256xf32> -> vector<32x256xf32>
    %cst_20 = arith.constant dense<0.000000e+00> : vector<32x256xf32>
    %44 = tpu.matmul %18, %42, %cst_20 {dimension_numbers = #tpu.dot_dimension_numbers<[1], [0], [0], [1], [0, 0, 1, 1], [], []>} : vector<32x256xf32>, vector<256x256xf32>, vector<32x256xf32> -> vector<32x256xf32>
    %c0_21 = arith.constant 0 : index
    %c0_22 = arith.constant 0 : index
    %45 = vector.load %arg7[%c0_21, %c0_22] : memref<64x32xf32, #tpu.memory_space<vmem>>, vector<64x32xf32>
    %cst_23 = arith.constant dense<0.000000e+00> : vector<64x256xf32>
    %46 = tpu.matmul %45, %43, %cst_23 {dimension_numbers = #tpu.dot_dimension_numbers<[1], [0], [0], [1], [0, 0, 1, 1], [], []>} : vector<64x32xf32>, vector<32x256xf32>, vector<64x256xf32> -> vector<64x256xf32>
    %c0_24 = arith.constant 0 : index
    %c0_25 = arith.constant 0 : index
    %47 = vector.load %arg8[%c0_24, %c0_25] : memref<64x32xf32, #tpu.memory_space<vmem>>, vector<64x32xf32>
    %cst_26 = arith.constant dense<0.000000e+00> : vector<64x256xf32>
    %48 = tpu.matmul %47, %44, %cst_26 {dimension_numbers = #tpu.dot_dimension_numbers<[1], [0], [0], [1], [0, 0, 1, 1], [], []>} : vector<64x32xf32>, vector<32x256xf32>, vector<64x256xf32> -> vector<64x256xf32>
    %49 = arith.addf %46, %48 : vector<64x256xf32>
    %c0_27 = arith.constant 0 : index
    %c0_28 = arith.constant 0 : index
    %50 = vector.load %arg9[%c0_27, %c0_28] : memref<64x1xf32, #tpu.memory_space<vmem>>, vector<64x1xf32>
    %51 = vector.broadcast %50 : vector<64x1xf32> to vector<64x256xf32>
    %52 = arith.addf %49, %51 : vector<64x256xf32>
    %c0_29 = arith.constant 0 : index
    %c0_30 = arith.constant 0 : index
    %53 = vector.load %arg10[%c0_29, %c0_30] : memref<96x64xf32, #tpu.memory_space<vmem>>, vector<96x64xf32>
    %cst_31 = arith.constant dense<0.000000e+00> : vector<96x256xf32>
    %54 = tpu.matmul %53, %52, %cst_31 {dimension_numbers = #tpu.dot_dimension_numbers<[1], [0], [0], [1], [0, 0, 1, 1], [], []>} : vector<96x64xf32>, vector<64x256xf32>, vector<96x256xf32> -> vector<96x256xf32>
    %c0_32 = arith.constant 0 : index
    %c0_33 = arith.constant 0 : index
    %55 = vector.load %arg11[%c0_32, %c0_33] : memref<96x32xf32, #tpu.memory_space<vmem>>, vector<96x32xf32>
    %cst_34 = arith.constant dense<0.000000e+00> : vector<96x256xf32>
    %56 = tpu.matmul %55, %1, %cst_34 {dimension_numbers = #tpu.dot_dimension_numbers<[1], [0], [0], [1], [0, 0, 1, 1], [], []>} : vector<96x32xf32>, vector<32x256xf32>, vector<96x256xf32> -> vector<96x256xf32>
    %57 = arith.addf %54, %56 : vector<96x256xf32>
    %c0_35 = arith.constant 0 : index
    %c0_36 = arith.constant 0 : index
    %58 = vector.load %arg12[%c0_35, %c0_36] : memref<96x1xf32, #tpu.memory_space<vmem>>, vector<96x1xf32>
    %59 = vector.broadcast %58 : vector<96x1xf32> to vector<96x256xf32>
    %60 = arith.addf %57, %59 : vector<96x256xf32>
    %61 = vector.extract_strided_slice %60 {offsets = [0, 0], sizes = [32, 256], strides = [1, 1]} : vector<96x256xf32> to vector<32x256xf32>
    %62 = vector.extract_strided_slice %60 {offsets = [32, 0], sizes = [32, 256], strides = [1, 1]} : vector<96x256xf32> to vector<32x256xf32>
    %63 = vector.extract_strided_slice %60 {offsets = [64, 0], sizes = [32, 256], strides = [1, 1]} : vector<96x256xf32> to vector<32x256xf32>
    %64 = arith.negf %63 : vector<32x256xf32>
    %65 = math.exp %64 : vector<32x256xf32>
    %cst_37 = arith.constant 1.000000e+00 : f32
    %66 = vector.broadcast %cst_37 : f32 to vector<32x256xf32>
    %67 = arith.addf %66, %65 : vector<32x256xf32>
    %68 = arith.divf %66, %67 : vector<32x256xf32>
    %69 = math.tanh %62 : vector<32x256xf32>
    %70 = arith.mulf %69, %68 : vector<32x256xf32>
    %cst_38 = arith.constant 1.000000e+00 : f32
    %71 = vector.broadcast %cst_38 : f32 to vector<32x256xf32>
    %72 = arith.subf %71, %68 : vector<32x256xf32>
    %73 = arith.mulf %72, %3 : vector<32x256xf32>
    %74 = arith.addf %70, %73 : vector<32x256xf32>
    %75 = arith.negf %61 : vector<32x256xf32>
    %76 = math.exp %75 : vector<32x256xf32>
    %cst_39 = arith.constant 1.000000e+00 : f32
    %77 = vector.broadcast %cst_39 : f32 to vector<32x256xf32>
    %78 = arith.addf %77, %76 : vector<32x256xf32>
    %79 = arith.divf %77, %78 : vector<32x256xf32>
    %80 = arith.mulf %79, %74 : vector<32x256xf32>
    %c0_40 = arith.constant 0 : index
    %c0_41 = arith.constant 0 : index
    %c0_42 = arith.constant 0 : index
    %81 = vector.load %arg13[%c0_40, %c0_41, %c0_42] : memref<1x32x256xf32, #tpu.memory_space<vmem>>, vector<1x32x256xf32>
    %82 = vector.shape_cast %81 : vector<1x32x256xf32> to vector<32x256xf32>
    %83 = vector.shape_cast %80 : vector<32x256xf32> to vector<1x32x256xf32>
    tpu.vector_store %arg13[%c0_40, %c0_41, %c0_42], %83 {strides = array<i32>} : memref<1x32x256xf32, #tpu.memory_space<vmem>>, vector<1x32x256xf32>,
    %c0_43 = arith.constant 0 : index
    %c0_44 = arith.constant 0 : index
    %c0_45 = arith.constant 0 : index
    %84 = vector.load %arg14[%c0_43, %c0_44, %c0_45] : memref<1x32x256xf32, #tpu.memory_space<vmem>>, vector<1x32x256xf32>
    %85 = vector.shape_cast %84 : vector<1x32x256xf32> to vector<32x256xf32>
    %86 = vector.shape_cast %74 : vector<32x256xf32> to vector<1x32x256xf32>
    tpu.vector_store %arg14[%c0_43, %c0_44, %c0_45], %86 {strides = array<i32>} : memref<1x32x256xf32, #tpu.memory_space<vmem>>, vector<1x32x256xf32>,
    return
  }
  func.func @transform_0(%arg0: i32) -> (i32, i32, i32) {
    %c0_i32 = arith.constant 0 : i32
    %c0_i32_0 = arith.constant 0 : i32
    %c0_i32_1 = arith.constant 0 : i32
    return %arg0, %c0_i32, %c0_i32_0 : i32, i32, i32
  }
  func.func @transform_1(%arg0: i32) -> (i32, i32, i32) {
    %c0_i32 = arith.constant 0 : i32
    %c0_i32_0 = arith.constant 0 : i32
    %c0_i32_1 = arith.constant 0 : i32
    return %arg0, %c0_i32, %c0_i32_0 : i32, i32, i32
  }
  func.func @transform_2(%arg0: i32) -> (i32, i32) {
    %c0_i32 = arith.constant 0 : i32
    %c0_i32_0 = arith.constant 0 : i32
    %c0_i32_1 = arith.constant 0 : i32
    return %c0_i32, %c0_i32_0 : i32, i32
  }
  func.func @transform_3(%arg0: i32) -> (i32, i32) {
    %c0_i32 = arith.constant 0 : i32
    %c0_i32_0 = arith.constant 0 : i32
    %c0_i32_1 = arith.constant 0 : i32
    return %c0_i32, %c0_i32_0 : i32, i32
  }
  func.func @transform_4(%arg0: i32) -> (i32, i32) {
    %c0_i32 = arith.constant 0 : i32
    %c0_i32_0 = arith.constant 0 : i32
    %c0_i32_1 = arith.constant 0 : i32
    return %c0_i32, %c0_i32_0 : i32, i32
  }
  func.func @transform_5(%arg0: i32) -> (i32, i32) {
    %c0_i32 = arith.constant 0 : i32
    %c0_i32_0 = arith.constant 0 : i32
    %c0_i32_1 = arith.constant 0 : i32
    return %c0_i32, %c0_i32_0 : i32, i32
  }
  func.func @transform_6(%arg0: i32) -> (i32, i32) {
    %c0_i32 = arith.constant 0 : i32
    %c0_i32_0 = arith.constant 0 : i32
    %c0_i32_1 = arith.constant 0 : i32
    return %c0_i32, %c0_i32_0 : i32, i32
  }
  func.func @transform_7(%arg0: i32) -> (i32, i32) {
    %c0_i32 = arith.constant 0 : i32
    %c0_i32_0 = arith.constant 0 : i32
    %c0_i32_1 = arith.constant 0 : i32
    return %c0_i32, %c0_i32_0 : i32, i32
  }
  func.func @transform_8(%arg0: i32) -> (i32, i32) {
    %c0_i32 = arith.constant 0 : i32
    %c0_i32_0 = arith.constant 0 : i32
    %c0_i32_1 = arith.constant 0 : i32
    return %c0_i32, %c0_i32_0 : i32, i32
  }
  func.func @transform_9(%arg0: i32) -> (i32, i32) {
    %c0_i32 = arith.constant 0 : i32
    %c0_i32_0 = arith.constant 0 : i32
    %c0_i32_1 = arith.constant 0 : i32
    return %c0_i32, %c0_i32_0 : i32, i32
  }
  func.func @transform_10(%arg0: i32) -> (i32, i32) {
    %c0_i32 = arith.constant 0 : i32
    %c0_i32_0 = arith.constant 0 : i32
    %c0_i32_1 = arith.constant 0 : i32
    return %c0_i32, %c0_i32_0 : i32, i32
  }
  func.func @transform_11(%arg0: i32) -> (i32, i32) {
    %c0_i32 = arith.constant 0 : i32
    %c0_i32_0 = arith.constant 0 : i32
    %c0_i32_1 = arith.constant 0 : i32
    return %c0_i32, %c0_i32_0 : i32, i32
  }
  func.func @transform_12(%arg0: i32) -> (i32, i32, i32) {
    %c0_i32 = arith.constant 0 : i32
    %c0_i32_0 = arith.constant 0 : i32
    %c0_i32_1 = arith.constant 0 : i32
    return %arg0, %c0_i32, %c0_i32_0 : i32, i32, i32
  }
  func.func @transform_13(%arg0: i32) -> (i32, i32, i32) {
    %c0_i32 = arith.constant 0 : i32
    %c0_i32_0 = arith.constant 0 : i32
    %c0_i32_1 = arith.constant 0 : i32
    return %arg0, %c0_i32, %c0_i32_0 : i32, i32, i32
  }
}

</mosaic_0001>

<bundles_post_ra>
// kernel: sam_forward.1
= control target key start
LH: loop header
LB: loop body
LE: loop exit
PB: predicated region body
PF: predicated region fallthrough
CT: control target
= control target key end

     0   :  { %s4801_s25 = smov 0   ;;  %s6587_s0 = inlined_call_operand.vmem [shape: f32[2,32,256], index: 0, kind: input, shape index: {}]   ;;  %s6588_s1 = inlined_call_operand.vmem [shape: f32[2,32,256], index: 1, kind: input, shape index: {}]   ;;  %s6589_s2 = inlined_call_operand.vmem [shape: f32[96,32], index: 2, kind: input, shape index: {}]   ;;  %s6590_s3 = inlined_call_operand.vmem [shape: f32[96,1], index: 3, kind: input, shape index: {}]   ;;  %s6591_s4 = inlined_call_operand.vmem [shape: f32[64,32], index: 4, kind: input, shape index: {}]   ;;  %s6592_s5 = inlined_call_operand.vmem [shape: f32[64,1], index: 5, kind: input, shape index: {}]   ;;  %s6593_s6 = inlined_call_operand.vmem [shape: f32[64,32], index: 6, kind: input, shape index: {}]   ;;  %s6594_s7 = inlined_call_operand.vmem [shape: f32[64,32], index: 7, kind: input, shape index: {}]   ;;  %s6595_s8 = inlined_call_operand.vmem [shape: f32[64,1], index: 8, kind: input, shape index: {}]   ;;  %s6596_s9 = inlined_call_operand.vmem [shape: f32[96,64], index: 9, kind: input, shape index: {}]   ;;  %s6597_s10 = inlined_call_operand.vmem [shape: f32[96,32], index: 10, kind: input, shape index: {}]   ;;  %s6598_s11 = inlined_call_operand.vmem [shape: f32[96,1], index: 11, kind: input, shape index: {}]   ;;  %s6599_s12 = inlined_call_operand.vmem [shape: f32[2,32,256], index: 12, kind: output, shape index: {0}]   ;;  %s6600_s13 = inlined_call_operand.vmem [shape: f32[2,32,256], index: 13, kind: output, shape index: {1}]  }
   0x1 LB: > { %s3834_s26 = sadd.s32 4294967295, %s4727_s25   ;;  %p3838_p0 = scmp.ge.s32.totalorder %s4727_s25, 1  ;;  %s4727_s25 = sphi %s4801_s25, %s24_s25  }
   0x2   : > { %p400_p1 = scmp.lt.s32.totalorder %s4727_s25, 3 }
   0x4   : > { %p401_p2 = pnand %p3838_p0, %p400_p1 }
   0x6   : > { %404 = sbr.rel (%p401_p2) target bundleno = 1871 (0x74f), region = 68 }
   0xd   : > { %p454_p3 = scmp.lt.s32.totalorder %s3834_s26, 1  ;;  %v6601_v0 = vmov 0.0   ;;  %v4730_v1 = vmov 0   ;;  %v502_v2 = vld [vmem:[%s6590_s3] sm:$0xff]  ;;  %v504_v3 = vld [vmem:[%s6590_s3 + $0x10] sm:$0xff]  ;;  %v503_v19 = vld [vmem:[%s6590_s3 + $0x8] sm:$0xff] }
   0xe   : > { %675 = vmatprep.mubr.f32.mxu0 %v6601_v0  ;;  %711 = vmatprep.mubr.f32.mxu1 %v6601_v0  ;;  %v505_v20 = vld [vmem:[%s6590_s3 + $0x18] sm:$0xff]  ;;  %v756_v25 = vld [vmem:[%s6592_s5] sm:$0xff]  ;;  %v757_v26 = vld [vmem:[%s6592_s5 + $0x8] sm:$0xff]  ;;  %vm574_vm0 = vcmask 261120   ;;  %vm3304_vm1 = vcmask 523264  }
   0xf   : > { %s7133_s26 = smov (!%p454_p3, %s3834_s26), 1  ;;  %4247 = vset.pattern.permute.xlu0 %v4730_v1  ;;  %4248 = vset.pattern.permute.xlu1 %v4730_v1  ;;  %v490_v27 = vld [vmem:[%s6589_s2] sm:$0xff]  ;;  %v496_v28 = vld [vmem:[%s6589_s2 + $0x30] sm:$0xff]  ;;  %v491_v34 = vld [vmem:[%s6589_s2 + $0x8] sm:$0xff] }
  0x10   : > { %s4811_s27 = sshll.u32 %s7133_s26, 6  ;;  %516 = vperm.xlu0 %4247, %v502_v2   ;;  %526 = vperm.xlu1 %4248, %v504_v3   ;;  %v758_v33 = vld [vmem:[%s6592_s5 + $0x10] sm:$0xff]  ;;  %v497_v35 = vld [vmem:[%s6589_s2 + $0x38] sm:$0xff]  ;;  %v506_v38 = vld [vmem:[%s6590_s3 + $0x20] sm:$0xff] }
  0x11   : > { %s458_s30 = scalar_lea.vmem %s6587_s0, %s4811_s27  ;;  %s4827_s20 = scalar_lea.vmem %s6588_s1, %s4811_s27  ;;  %v759_v37 = vld [vmem:[%s6592_s5 + $0x18] sm:$0xff]  ;;  %v492_v39 = vld [vmem:[%s6589_s2 + $0x10] sm:$0xff]  ;;  %v498_v40 = vld [vmem:[%s6589_s2 + $0x40] sm:$0xff] }
  0x12   : > { %v475_v4 = vld [vmem:[%s458_s30 + $0x8] sm:$0xff]  ;;  %v477_v5 = vld [vmem:[%s458_s30 + $0x18] sm:$0xff]  ;;  %v474_v6 = vld [vmem:[%s458_s30] sm:$0xff]  ;;  %s6547_s23 = scalar_lea.vmem %s6600_s13, %s4811_s27  ;;  %s6555_s28 = scalar_lea.vmem %s6599_s12, %s4811_s27 }
  0x13   : > { %v4829_v7 = vpack.c.bf16 %v477_v5, %v475_v4  ;;  %v476_v8 = vld [vmem:[%s458_s30 + $0x10] sm:$0xff]  ;;  %v479_v9 = vld [vmem:[%s458_s30 + $0x28] sm:$0xff]  ;;  %v481_v10 = vld [vmem:[%s458_s30 + $0x38] sm:$0xff] }
  0x14   : > { %v4831_v11 = vpack.c.bf16 %v476_v8, %v474_v6  ;;  %v4833_v12 = vpack.c.bf16 %v481_v10, %v479_v9  ;;  %v478_v13 = vld [vmem:[%s458_s30 + $0x20] sm:$0xff]  ;;  %v480_v14 = vld [vmem:[%s458_s30 + $0x30] sm:$0xff]  ;;  %v483_v15 = vld [vmem:[%s4827_s20 + $0x8] sm:$0xff]  ;;  %521 = vperm.xlu0 %4247, %v503_v19   ;;  %531 = vperm.xlu1 %4248, %v505_v20  }
  0x15   : > { %6769 = vst [vmem:[#allocation2_spill] sm:$0xff] %v4829_v7  ;;  %3994 = vmatprep.subr.bf16.mxu0 %v4829_v7  ;;  %4193 = vmatprep.subr.bf16.mxu1 %v4829_v7  ;;  %v485_v16 = vld [vmem:[%s4827_s20 + $0x18] sm:$0xff]  ;;  %v4841_v17 = vpack.c.bf16 %v480_v14, %v478_v13  ;;  %v482_v21 = vld [vmem:[%s4827_s20] sm:$0xff]  ;;  %v484_v22 = vld [vmem:[%s4827_s20 + $0x10] sm:$0xff] }
  0x16   : > { %6770 = vst [vmem:[#allocation3_spill] sm:$0xff] %v4831_v11  ;;  %6771 = vst [vmem:[#allocation4_spill] sm:$0xff] %v4833_v12  ;;  %3996 = vmatpush1.bf16.msra.mxu0 %v4831_v11  ;;  %4195 = vmatpush1.bf16.msra.mxu1 %v4831_v11  ;;  %v4001_v18 = vpack.c.bf16 %v485_v16, %v483_v15  ;;  %v487_v23 = vld [vmem:[%s4827_s20 + $0x28] sm:$0xff]  ;;  %v489_v24 = vld [vmem:[%s4827_s20 + $0x38] sm:$0xff]  ;;  %v4003_v29 = vpack.c.bf16 %v484_v22, %v482_v21 }
  0x17   : > { %6772 = vst [vmem:[#allocation5_spill] sm:$0xff] %v4841_v17  ;;  %3998 = vmatprep.subr.bf16.mxu0 %v4833_v12  ;;  %4194 = vmatprep.subr.bf16.mxu1 %v4833_v12  ;;  %v4005_v30 = vpack.c.bf16 %v489_v24, %v487_v23  ;;  %v486_v31 = vld [vmem:[%s4827_s20 + $0x20] sm:$0xff]  ;;  %v488_v32 = vld [vmem:[%s4827_s20 + $0x30] sm:$0xff]  ;;  %v507_v41 = vld [vmem:[%s6590_s3 + $0x28] sm:$0xff] }
  0x18   : > { %766 = vperm.xlu0 %4247, %v756_v25   ;;  %771 = vperm.xlu1 %4248, %v757_v26   ;;  %v4007_v36 = vpack.c.bf16 %v488_v32, %v486_v31  ;;  %v508_v42 = vld [vmem:[%s6590_s3 + $0x30] sm:$0xff]  ;;  %v493_v43 = vld [vmem:[%s6589_s2 + $0x18] sm:$0xff]  ;;  %v499_v44 = vld [vmem:[%s6589_s2 + $0x48] sm:$0xff] }
  0x19   : > { %v509_v45 = vld [vmem:[%s6590_s3 + $0x38] sm:$0xff]  ;;  %v494_v46 = vld [vmem:[%s6589_s2 + $0x20] sm:$0xff]  ;;  %v500_v47 = vld [vmem:[%s6589_s2 + $0x50] sm:$0xff] }
  0x1a   : > { %4000 = vmatpush1.bf16.msra.mxu0 %v4841_v17  ;;  %4196 = vmatpush1.bf16.msra.mxu1 %v4841_v17  ;;  %v495_v48 = vld [vmem:[%s6589_s2 + $0x28] sm:$0xff]  ;;  %v501_v49 = vld [vmem:[%s6589_s2 + $0x58] sm:$0xff]  ;;  %v748_v50 = vld [vmem:[%s6591_s4] sm:$0xff] }
  0x1b   : > { %4002 = vmatprep.subr.bf16.mxu1 %v4001_v18  ;;  %v749_v51 = vld [vmem:[%s6591_s4 + $0x8] sm:$0xff]  ;;  %v750_v52 = vld [vmem:[%s6591_s4 + $0x10] sm:$0xff]  ;;  %v751_v53 = vld [vmem:[%s6591_s4 + $0x18] sm:$0xff] }
  0x1c   : > { %776 = vperm.xlu0 %4247, %v758_v33   ;;  %781 = vperm.xlu1 %4248, %v759_v37   ;;  %v752_v54 = vld [vmem:[%s6591_s4 + $0x20] sm:$0xff]  ;;  %v753_v55 = vld [vmem:[%s6591_s4 + $0x28] sm:$0xff]  ;;  %v754_v56 = vld [vmem:[%s6591_s4 + $0x30] sm:$0xff] }
  0x1d   : > { %3847 = vmatmul.mubr.msk.f32.vlgmr.msra.gmra.mrb[0].mxu0 %vm574_vm0, %v490_v27  ;;  %3853 = vmatmul.mubr.msk.f32.vlgmr.msra.gmra.mrb[0].mxu1 %vm574_vm0, %v496_v28  ;;  %v755_v59 = vld [vmem:[%s6591_s4 + $0x38] sm:$0xff] }
  0x1e   : > { %681 = vmatprep.mubr.f32.mxu0 %v6601_v0  ;;  %717 = vmatprep.mubr.f32.mxu1 %v6601_v0 }
  0x1f   : > { %4004 = vmatpush1.bf16.msra.mxu1 %v4003_v29 }
  0x20   : > { %4006 = vmatprep.subr.bf16.mxu1 %v4005_v30  ;;  %536 = vperm.xlu0 %4247, %v506_v38  }
  0x21   : > { %3848 = vmatmul.mubr.msk.f32.gmra.mrb[2].mxu0 %vm574_vm0, %v491_v34  ;;  %3854 = vmatmul.mubr.msk.f32.gmra.mrb[2].mxu1 %vm574_vm0, %v497_v35 }
  0x22   : > { %687 = vmatprep.mubr.f32.mxu0 %v6601_v0  ;;  %723 = vmatprep.mubr.f32.mxu1 %v6601_v0 }
  0x23   : > { %4008 = vmatpush1.bf16.msra.mxu1 %v4007_v36  ;;  %541 = vperm.xlu1 %4248, %v507_v41  }
  0x24   : > { %546 = vperm.xlu0 %4247, %v508_v42  }
  0x25   : > { %3849 = vmatmul.mubr.msk.f32.gmra.mrb[4].mxu0 %vm574_vm0, %v492_v39  ;;  %3855 = vmatmul.mubr.msk.f32.gmra.mrb[4].mxu1 %vm574_vm0, %v498_v40 }
  0x26   : > { %693 = vmatprep.mubr.f32.mxu0 %v6601_v0  ;;  %729 = vmatprep.mubr.f32.mxu1 %v6601_v0 }
  0x27   : > { %551 = vperm.xlu1 %4248, %v509_v45  }
  0x29   : > { %3850 = vmatmul.mubr.msk.f32.gmra.mrb[6].mxu0 %vm574_vm0, %v493_v43  ;;  %3856 = vmatmul.mubr.msk.f32.gmra.mrb[6].mxu1 %vm574_vm0, %v499_v44 }
  0x2a   : > { %699 = vmatprep.mubr.f32.mxu0 %v6601_v0  ;;  %735 = vmatprep.mubr.f32.mxu1 %v6601_v0 }
  0x2d   : > { %3851 = vmatmul.mubr.msk.f32.gmra.mrb[8].mxu0 %vm574_vm0, %v494_v46  ;;  %3857 = vmatmul.mubr.msk.f32.gmra.mrb[8].mxu1 %vm574_vm0, %v500_v47 }
  0x2e   : > { %705 = vmatprep.mubr.f32.mxu0 %v6601_v0  ;;  %741 = vmatprep.mubr.f32.mxu1 %v6601_v0 }
  0x31   : > { %3852 = vmatmul.mubr.msk.f32.gmra.mrb[10].mxu0 %vm574_vm0, %v495_v48  ;;  %3858 = vmatmul.mubr.msk.f32.gmra.mrb[10].mxu1 %vm574_vm0, %v501_v49 }
  0x32   : > { %892 = vmatprep.mubr.f32.mxu1 %v6601_v0  ;;  %1422 = vmatprep.mubr.f32.mxu0 %v6601_v0 }
  0x35   : > { %3859 = vmatmul.mubr.msk.f32.vlgmr.msra.gmra.mrb[12].mxu1 %vm574_vm0, %v748_v50 }
  0x36   : > { %898 = vmatprep.mubr.f32.mxu1 %v6601_v0 }
  0x39   : > { %3860 = vmatmul.mubr.msk.f32.gmra.mrb[14].mxu1 %vm574_vm0, %v749_v51 }
  0x3a   : > { %904 = vmatprep.mubr.f32.mxu1 %v6601_v0 }
  0x3d   : > { %3861 = vmatmul.mubr.msk.f32.gmra.mrb[16].mxu1 %vm574_vm0, %v750_v52 }
  0x3e   : > { %910 = vmatprep.mubr.f32.mxu1 %v6601_v0 }
  0x41   : > { %3862 = vmatmul.mubr.msk.f32.gmra.mrb[18].mxu1 %vm574_vm0, %v751_v53 }
  0x42   : > { %916 = vmatprep.mubr.f32.mxu1 %v6601_v0 }
  0x45   : > { %3863 = vmatmul.mubr.msk.f32.gmra.mrb[20].mxu1 %vm574_vm0, %v752_v54 }
  0x46   : > { %922 = vmatprep.mubr.f32.mxu1 %v6601_v0 }
  0x49   : > { %3864 = vmatmul.mubr.msk.f32.gmra.mrb[22].mxu1 %vm574_vm0, %v753_v55 }
  0x4a   : > { %928 = vmatprep.mubr.f32.mxu1 %v6601_v0 }
  0x4d   : > { %3865 = vmatmul.mubr.msk.f32.gmra.mrb[24].mxu1 %vm574_vm0, %v754_v56 }
  0x4e   : > { %934 = vmatprep.mubr.f32.mxu1 %v6601_v0 }
  0x51   : > { %3866 = vmatmul.mubr.msk.f32.gmra.mrb[26].mxu1 %vm574_vm0, %v755_v59 }
  0x52   : > { %1165 = vmatprep.mubr.f32.mxu1 %v6601_v0 }
  0x8f   : > { %v517_v57 = vpop.permute.xlu0 %516  ;;  %v527_v58 = vpop.permute.xlu1 %526 }
  0x93   : > { %v522_v60 = vpop.permute.xlu0 %521  ;;  %v532_v61 = vpop.permute.xlu1 %531 }
  0x97   : > { %v4983_v62 = vpop.permute.xlu0 %766  ;;  %v4985_v63 = vpop.permute.xlu1 %771 }
  0x9b   : > { %v4987_v1 = vpop.permute.xlu0 %776  ;;  %v4989_v2 = vpop.permute.xlu1 %781 }
  0x9f   : > { %v537_v3 = vpop.permute.xlu0 %536 }
  0xa2   : > { %v542_v4 = vpop.permute.xlu1 %541 }
  0xa3   : > { %v547_v13 = vpop.permute.xlu0 %546 }
  0xa6   : > { %v552_v15 = vpop.permute.xlu1 %551 }
  0xf0   : > { %v677_v5 = vpop.f32.mrb[0].mxu0  ;;  %v713_v6 = vpop.f32.mrb[0].mxu1 }
  0xf1   : > { %v678_v8 = vadd.f32 %v677_v5, %v517_v57  ;;  %v679_v9 = vpop.f32.mrb[1].mxu0  ;;  %v715_v10 = vpop.f32.mrb[1].mxu1  ;;  %v714_v19 = vadd.f32 %v713_v6, %v547_v13 }
  0xf2   : > { %v680_v14 = vadd.f32 %v679_v9, %v517_v57  ;;  %v716_v24 = vadd.f32 %v715_v10, %v547_v13 }
  0xf3   : > { %941 = vxpose.xlu0.b32.start [1/4] (short) %v678_v8, 128 }
  0xf4   : > { %v683_v16 = vpop.f32.mrb[2].mxu0  ;;  %v719_v18 = vpop.f32.mrb[2].mxu1  ;;  %973 = vxpose.xlu1.b32.start [1/4] (short) %v680_v14, 128 }
  0xf5   : > { %v684_v20 = vadd.f32 %v683_v16, %v522_v60  ;;  %v720_v21 = vadd.f32 %v719_v18, %v552_v15  ;;  %v685_v22 = vpop.f32.mrb[3].mxu0  ;;  %v721_v23 = vpop.f32.mrb[3].mxu1 }
  0xf6   : > { %v686_v25 = vadd.f32 %v685_v22, %v522_v60  ;;  %v722_v26 = vadd.f32 %v721_v23, %v552_v15 }
  0xf7   : > { %v4015_v27 = vpack.c.bf16 %v720_v21, %v714_v19  ;;  %942 = vxpose.xlu0.b32.cont [2/4] (short) %v684_v20, 128 }
  0xf8   : > { %v4013_v28 = vpack.c.bf16 %v722_v26, %v716_v24  ;;  %v689_v29 = vpop.f32.mrb[4].mxu0  ;;  %974 = vxpose.xlu1.b32.cont [2/4] (short) %v686_v25, 128  ;;  %v4991_v30 = vpop.f32.mrb[4].mxu1 }
  0xf9   : > { %6773 = vst [vmem:[#allocation6_spill] sm:$0xff] %v4991_v30  ;;  %v690_v31 = vadd.f32 %v689_v29, %v527_v58  ;;  %v691_v32 = vpop.f32.mrb[5].mxu0  ;;  %v4993_v33 = vpop.f32.mrb[5].mxu1 }
  0xfa   : > { %6774 = vst [vmem:[#allocation7_spill] sm:$0xff] %v4993_v33  ;;  %v692_v34 = vadd.f32 %v691_v32, %v527_v58 }
  0xfb   : > { %943 = vxpose.xlu0.b32.cont [3/4] (short) %v690_v31, 128 }
  0xfc   : > { %v695_v35 = vpop.f32.mrb[6].mxu0  ;;  %975 = vxpose.xlu1.b32.cont [3/4] (short) %v692_v34, 128  ;;  %v4995_v36 = vpop.f32.mrb[6].mxu1 }
  0xfd   : > { %6775 = vst [vmem:[#allocation8_spill] sm:$0xff] %v4995_v36  ;;  %v696_v37 = vadd.f32 %v695_v35, %v532_v61  ;;  %v697_v38 = vpop.f32.mrb[7].mxu0  ;;  %v4997_v39 = vpop.f32.mrb[7].mxu1 }
  0xfe   : > { %6776 = vst [vmem:[#allocation9_spill] sm:$0xff] %v4997_v39  ;;  %v698_v40 = vadd.f32 %v697_v38, %v532_v61 }
  0xff   : > { %944 = vxpose.xlu0.b32.end [4/4] (short) %v696_v37, 128 }
 0x100   : > { %v701_v41 = vpop.f32.mrb[8].mxu0  ;;  %976 = vxpose.xlu1.b32.end [4/4] (short) %v698_v40, 128  ;;  %v4999_v42 = vpop.f32.mrb[8].mxu1 }
 0x101   : > { %6777 = vst [vmem:[#allocation10_spill] sm:$0xff] %v4999_v42  ;;  %v703_v43 = vpop.f32.mrb[9].mxu0  ;;  %v5001_v44 = vpop.f32.mrb[9].mxu1  ;;  %v702_v47 = vadd.f32 %v701_v41, %v537_v3 }
 0x102   : > { %6778 = vst [vmem:[#allocation11_spill] sm:$0xff] %v5001_v44  ;;  %v704_v51 = vadd.f32 %v703_v43, %v537_v3 }
 0x104   : > { %v707_v45 = vpop.f32.mrb[10].mxu0  ;;  %v5003_v46 = vpop.f32.mrb[10].mxu1 }
 0x105   : > { %6779 = vst [vmem:[#allocation12_spill] sm:$0xff] %v5003_v46  ;;  %v708_v48 = vadd.f32 %v707_v45, %v542_v4  ;;  %v709_v49 = vpop.f32.mrb[11].mxu0  ;;  %v5005_v50 = vpop.f32.mrb[11].mxu1 }
 0x106   : > { %6780 = vst [vmem:[#allocation13_spill] sm:$0xff] %v5005_v50  ;;  %v710_v52 = vadd.f32 %v709_v49, %v542_v4 }
 0x107   : > { %v4011_v53 = vpack.c.bf16 %v708_v48, %v702_v47 }
 0x108   : > { %v4009_v54 = vpack.c.bf16 %v710_v52, %v704_v51  ;;  %v894_v55 = vpop.f32.mrb[12].mxu1 }
 0x109   : > { %v896_v56 = vpop.f32.mrb[13].mxu1  ;;  %v895_v58 = vadd.f32 %v894_v55, %v4983_v62 }
 0x10a   : > { %4010 = vmatprep.subr.bf16.mxu1 %v4009_v54  ;;  %v897_v61 = vadd.f32 %v896_v56, %v4983_v62 }
 0x10b   : > { %4012 = vmatpush1.bf16.msra.mxu1 %v4011_v53 }
 0x10c   : > { %v900_v57 = vpop.f32.mrb[14].mxu1  ;;  %4014 = vmatprep.subr.bf16.mxu1 %v4013_v28 }
 0x10d   : > { %v901_v59 = vadd.f32 %v900_v57, %v4985_v63  ;;  %v902_v60 = vpop.f32.mrb[15].mxu1 }
 0x10e   : > { %v903_v5 = vadd.f32 %v902_v60, %v4985_v63  ;;  %v760_v63 = vld [vmem:[%s6592_s5 + $0x20] sm:$0xff] }
 0x10f   : > { %v4019_v6 = vpack.c.bf16 %v901_v59, %v895_v58  ;;  %4016 = vmatpush1.bf16.msra.mxu1 %v4015_v27 }
 0x110   : > { %v4017_v3 = vpack.c.bf16 %v903_v5, %v897_v61  ;;  %v906_v4 = vpop.f32.mrb[16].mxu1 }
 0x111   : > { %v908_v8 = vpop.f32.mrb[17].mxu1  ;;  %v907_v10 = vadd.f32 %v906_v4, %v4987_v1 }
 0x112   : > { %4018 = vmatprep.subr.bf16.mxu0 %v4017_v3  ;;  %v909_v15 = vadd.f32 %v908_v8, %v4987_v1 }
 0x113   : > { %4020 = vmatpush1.bf16.msra.mxu0 %v4019_v6 }
 0x114   : > { %v912_v9 = vpop.f32.mrb[18].mxu1 }
 0x115   : > { %v913_v13 = vadd.f32 %v912_v9, %v4989_v2  ;;  %v914_v14 = vpop.f32.mrb[19].mxu1 }
 0x116   : > { %v915_v16 = vadd.f32 %v914_v14, %v4989_v2 }
 0x117   : > { %v4023_v62 = vpack.c.bf16 %v913_v13, %v907_v10 }
 0x118   : > { %v4021_v18 = vpack.c.bf16 %v915_v16, %v909_v15  ;;  %v5018_v19 = vpop.f32.mrb[20].mxu1 }
 0x119   : > { %6781 = vst [vmem:[#allocation14_spill] sm:$0xff] %v5018_v19  ;;  %v5020_v20 = vpop.f32.mrb[21].mxu1 }
 0x11a   : > { %4022 = vmatprep.subr.bf16.mxu0 %v4021_v18 }
 0x11b   : > { %4024 = vmatpush1.bf16.msra.mxu0 %v4023_v62 }
 0x11c   : > { %v5070_v38 = vpop.f32.mrb[22].mxu1 }
 0x11d   : > { %6782 = vst [vmem:[#allocation15_spill] sm:$0xff] %v5070_v38  ;;  %v5072_v41 = vpop.f32.mrb[23].mxu1 }
 0x11e   : > { %6783 = vst [vmem:[#allocation16_spill] sm:$0xff] %v5072_v41 }
 0x120   : > { %v5078_v45 = vpop.f32.mrb[24].mxu1 }
 0x121   : > { %6784 = vst [vmem:[#allocation17_spill] sm:$0xff] %v5078_v45  ;;  %v5080_v48 = vpop.f32.mrb[25].mxu1 }
 0x122   : > { %6785 = vst [vmem:[#allocation18_spill] sm:$0xff] %v5080_v48 }
 0x124   : > { %v5086_v51 = vpop.f32.mrb[26].mxu1 }
 0x125   : > { %6786 = vst [vmem:[#allocation19_spill] sm:$0xff] %v5086_v51  ;;  %v5088_v53 = vpop.f32.mrb[27].mxu1 }
 0x126   : > { %6787 = vst [vmem:[#allocation20_spill] sm:$0xff] %v5088_v53 }
 0x14e   : > { %786 = vperm.xlu1 %4248, %v760_v63  }
 0x173   : > { %v957_v21 = vpop.trf.xlu0 }
 0x174   : > { %3867 = vmatmul.mubr.msk.f32.vlgmr.msra.gmra.mrb[28].mxu1 %vm574_vm0, %v957_v21  ;;  %3899 = vmatmul.mubr.msk.f32.vlgmr.msra.gmra.mrb[12].mxu0 %vm574_vm0, %v957_v21  ;;  %v989_v26 = vpop.trf.xlu1 }
 0x175   : > { %1171 = vmatprep.mubr.f32.mxu1 %v6601_v0  ;;  %1428 = vmatprep.mubr.f32.mxu0 %v6601_v0 }
 0x177   : > { %v958_v1 = vpop.trf.xlu0 }
 0x178   : > { %3868 = vmatmul.mubr.msk.f32.gmra.mrb[30].mxu1 %vm574_vm0, %v958_v1  ;;  %3900 = vmatmul.mubr.msk.f32.gmra.mrb[14].mxu0 %vm574_vm0, %v958_v1  ;;  %v990_v28 = vpop.trf.xlu1 }
 0x179   : > { %1177 = vmatprep.mubr.f32.mxu1 %v6601_v0  ;;  %1434 = vmatprep.mubr.f32.mxu0 %v6601_v0 }
 0x17b   : > { %v959_v2 = vpop.trf.xlu0 }
 0x17c   : > { %3869 = vmatmul.mubr.msk.f32.gmra.mrb[32].mxu1 %vm574_vm0, %v959_v2  ;;  %3901 = vmatmul.mubr.msk.f32.gmra.mrb[16].mxu0 %vm574_vm0, %v959_v2  ;;  %v991_v32 = vpop.trf.xlu1 }
 0x17d   : > { %1183 = vmatprep.mubr.f32.mxu1 %v6601_v0  ;;  %1440 = vmatprep.mubr.f32.mxu0 %v6601_v0 }
 0x17f   : > { %v960_v22 = vpop.trf.xlu0 }
 0x180   : > { %3870 = vmatmul.mubr.msk.f32.gmra.mrb[34].mxu1 %vm574_vm0, %v960_v22  ;;  %3902 = vmatmul.mubr.msk.f32.gmra.mrb[18].mxu0 %vm574_vm0, %v960_v22  ;;  %v992_v35 = vpop.trf.xlu1 }
 0x181   : > { %1189 = vmatprep.mubr.f32.mxu1 %v6601_v0  ;;  %1446 = vmatprep.mubr.f32.mxu0 %v6601_v0 }
 0x183   : > { %v961_v23 = vpop.trf.xlu0 }
 0x184   : > { %3871 = vmatmul.mubr.msk.f32.gmra.mrb[36].mxu1 %vm574_vm0, %v961_v23  ;;  %3903 = vmatmul.mubr.msk.f32.gmra.mrb[20].mxu0 %vm574_vm0, %v961_v23  ;;  %v993_v43 = vpop.trf.xlu1 }
 0x185   : > { %1195 = vmatprep.mubr.f32.mxu1 %v6601_v0  ;;  %1452 = vmatprep.mubr.f32.mxu0 %v6601_v0 }
 0x187   : > { %v962_v24 = vpop.trf.xlu0 }
 0x188   : > { %3872 = vmatmul.mubr.msk.f32.gmra.mrb[38].mxu1 %vm574_vm0, %v962_v24  ;;  %3904 = vmatmul.mubr.msk.f32.gmra.mrb[22].mxu0 %vm574_vm0, %v962_v24  ;;  %v994_v49 = vpop.trf.xlu1 }
 0x189   : > { %1201 = vmatprep.mubr.f32.mxu1 %v6601_v0  ;;  %1458 = vmatprep.mubr.f32.mxu0 %v6601_v0 }
 0x18b   : > { %v963_v25 = vpop.trf.xlu0 }
 0x18c   : > { %3873 = vmatmul.mubr.msk.f32.gmra.mrb[40].mxu1 %vm574_vm0, %v963_v25  ;;  %3905 = vmatmul.mubr.msk.f32.gmra.mrb[24].mxu0 %vm574_vm0, %v963_v25  ;;  %v995_v55 = vpop.trf.xlu1 }
 0x18d   : > { %1207 = vmatprep.mubr.f32.mxu1 %v6601_v0  ;;  %1464 = vmatprep.mubr.f32.mxu0 %v6601_v0 }
 0x18f   : > { %v964_v27 = vpop.trf.xlu0 }
 0x190   : > { %3874 = vmatmul.mubr.msk.f32.gmra.mrb[42].mxu1 %vm574_vm0, %v964_v27  ;;  %3906 = vmatmul.mubr.msk.f32.gmra.mrb[26].mxu0 %vm574_vm0, %v964_v27  ;;  %v996_v56 = vpop.trf.xlu1 }
 0x191   : > { %1213 = vmatprep.mubr.f32.mxu1 %v6601_v0  ;;  %1470 = vmatprep.mubr.f32.mxu0 %v6601_v0 }
 0x193   : > { %v965_v29 = vpop.trf.xlu0 }
 0x194   : > { %3875 = vmatmul.mubr.msk.f32.gmra.mrb[44].mxu1 %vm574_vm0, %v965_v29  ;;  %3907 = vmatmul.mubr.msk.f32.gmra.mrb[28].mxu0 %vm574_vm0, %v965_v29  ;;  %v997_v57 = vpop.trf.xlu1 }
 0x195   : > { %1219 = vmatprep.mubr.f32.mxu1 %v6601_v0  ;;  %1476 = vmatprep.mubr.f32.mxu0 %v6601_v0 }
 0x197   : > { %v966_v31 = vpop.trf.xlu0 }
 0x198   : > { %3876 = vmatmul.mubr.msk.f32.gmra.mrb[46].mxu1 %vm574_vm0, %v966_v31  ;;  %3908 = vmatmul.mubr.msk.f32.gmra.mrb[30].mxu0 %vm574_vm0, %v966_v31  ;;  %v998_v58 = vpop.trf.xlu1 }
 0x199   : > { %1225 = vmatprep.mubr.f32.mxu1 %v6601_v0  ;;  %1482 = vmatprep.mubr.f32.mxu0 %v6601_v0 }
 0x19b   : > { %v967_v34 = vpop.trf.xlu0 }
 0x19c   : > { %3877 = vmatmul.mubr.msk.f32.gmra.mrb[48].mxu1 %vm574_vm0, %v967_v34  ;;  %3909 = vmatmul.mubr.msk.f32.gmra.mrb[32].mxu0 %vm574_vm0, %v967_v34  ;;  %v999_v59 = vpop.trf.xlu1 }
 0x19d   : > { %1231 = vmatprep.mubr.f32.mxu1 %v6601_v0  ;;  %1488 = vmatprep.mubr.f32.mxu0 %v6601_v0 }
 0x19f   : > { %v968_v37 = vpop.trf.xlu0 }
 0x1a0   : > { %3878 = vmatmul.mubr.msk.f32.gmra.mrb[50].mxu1 %vm574_vm0, %v968_v37  ;;  %3910 = vmatmul.mubr.msk.f32.gmra.mrb[34].mxu0 %vm574_vm0, %v968_v37  ;;  %v1000_v60 = vpop.trf.xlu1 }
 0x1a1   : > { %1237 = vmatprep.mubr.f32.mxu1 %v6601_v0  ;;  %1494 = vmatprep.mubr.f32.mxu0 %v6601_v0 }
 0x1a3   : > { %v969_v40 = vpop.trf.xlu0 }
 0x1a4   : > { %3879 = vmatmul.mubr.msk.f32.gmra.mrb[52].mxu1 %vm574_vm0, %v969_v40  ;;  %3911 = vmatmul.mubr.msk.f32.gmra.mrb[36].mxu0 %vm574_vm0, %v969_v40  ;;  %v1001_v61 = vpop.trf.xlu1 }
 0x1a5   : > { %1243 = vmatprep.mubr.f32.mxu1 %v6601_v0  ;;  %1500 = vmatprep.mubr.f32.mxu0 %v6601_v0 }
 0x1a7   : > { %v970_v47 = vpop.trf.xlu0 }
 0x1a8   : > { %3880 = vmatmul.mubr.msk.f32.gmra.mrb[54].mxu1 %vm574_vm0, %v970_v47  ;;  %3912 = vmatmul.mubr.msk.f32.gmra.mrb[38].mxu0 %vm574_vm0, %v970_v47  ;;  %v1002_v5 = vpop.trf.xlu1 }
 0x1a9   : > { %1249 = vmatprep.mubr.f32.mxu1 %v6601_v0  ;;  %1506 = vmatprep.mubr.f32.mxu0 %v6601_v0 }
 0x1ab   : > { %v971_v52 = vpop.trf.xlu0 }
 0x1ac   : > { %3881 = vmatmul.mubr.msk.f32.gmra.mrb[56].mxu1 %vm574_vm0, %v971_v52  ;;  %3913 = vmatmul.mubr.msk.f32.gmra.mrb[40].mxu0 %vm574_vm0, %v971_v52  ;;  %v1003_v6 = vpop.trf.xlu1 }
 0x1ad   : > { %1255 = vmatprep.mubr.f32.mxu1 %v6601_v0  ;;  %1512 = vmatprep.mubr.f32.mxu0 %v6601_v0 }
 0x1af   : > { %v972_v54 = vpop.trf.xlu0 }
 0x1b0   : > { %3882 = vmatmul.mubr.msk.f32.gmra.mrb[58].mxu1 %vm574_vm0, %v972_v54  ;;  %3914 = vmatmul.mubr.msk.f32.gmra.mrb[42].mxu0 %vm574_vm0, %v972_v54  ;;  %v1004_v3 = vpop.trf.xlu1 }
 0x1b1   : > { %1261 = vmatprep.mubr.f32.mxu1 %v6601_v0  ;;  %1518 = vmatprep.mubr.f32.mxu0 %v6601_v0 }
 0x1b4   : > { %3883 = vmatmul.mubr.msk.f32.gmra.mrb[60].mxu1 %vm574_vm0, %v989_v26  ;;  %3915 = vmatmul.mubr.msk.f32.gmra.mrb[44].mxu0 %vm574_vm0, %v989_v26 }
 0x1b5   : > { %1267 = vmatprep.mubr.f32.mxu1 %v6601_v0  ;;  %1524 = vmatprep.mubr.f32.mxu0 %v6601_v0 }
 0x1b8   : > { %3884 = vmatmul.mubr.msk.f32.gmra.mrb[62].mxu1 %vm574_vm0, %v990_v28  ;;  %3916 = vmatmul.mubr.msk.f32.gmra.mrb[46].mxu0 %vm574_vm0, %v990_v28 }
 0x1b9   : > { %1273 = vmatprep.mubr.f32.mxu1 %v6601_v0  ;;  %1530 = vmatprep.mubr.f32.mxu0 %v6601_v0 }
 0x1bc   : > { %3885 = vmatmul.mubr.msk.f32.gmra.mrb[64].mxu1 %vm574_vm0, %v991_v32  ;;  %3917 = vmatmul.mubr.msk.f32.gmra.mrb[48].mxu0 %vm574_vm0, %v991_v32 }
 0x1bd   : > { %1279 = vmatprep.mubr.f32.mxu1 %v6601_v0  ;;  %1536 = vmatprep.mubr.f32.mxu0 %v6601_v0 }
 0x1c0   : > { %3886 = vmatmul.mubr.msk.f32.gmra.mrb[66].mxu1 %vm574_vm0, %v992_v35  ;;  %3918 = vmatmul.mubr.msk.f32.gmra.mrb[50].mxu0 %vm574_vm0, %v992_v35 }
 0x1c1   : > { %1285 = vmatprep.mubr.f32.mxu1 %v6601_v0  ;;  %1542 = vmatprep.mubr.f32.mxu0 %v6601_v0 }
 0x1c4   : > { %3887 = vmatmul.mubr.msk.f32.gmra.mrb[68].mxu1 %vm574_vm0, %v993_v43  ;;  %3919 = vmatmul.mubr.msk.f32.gmra.mrb[52].mxu0 %vm574_vm0, %v993_v43 }
 0x1c5   : > { %1291 = vmatprep.mubr.f32.mxu1 %v6601_v0  ;;  %1548 = vmatprep.mubr.f32.mxu0 %v6601_v0 }
 0x1c8   : > { %3888 = vmatmul.mubr.msk.f32.gmra.mrb[70].mxu1 %vm574_vm0, %v994_v49  ;;  %3920 = vmatmul.mubr.msk.f32.gmra.mrb[54].mxu0 %vm574_vm0, %v994_v49 }
 0x1c9   : > { %1297 = vmatprep.mubr.f32.mxu1 %v6601_v0  ;;  %1554 = vmatprep.mubr.f32.mxu0 %v6601_v0 }
 0x1cc   : > { %3889 = vmatmul.mubr.msk.f32.gmra.mrb[72].mxu1 %vm574_vm0, %v995_v55  ;;  %3921 = vmatmul.mubr.msk.f32.gmra.mrb[56].mxu0 %vm574_vm0, %v995_v55 }
 0x1cd   : > { %1303 = vmatprep.mubr.f32.mxu1 %v6601_v0  ;;  %1560 = vmatprep.mubr.f32.mxu0 %v6601_v0  ;;  %v5154_v4 = vpop.permute.xlu1 %786 }
 0x1ce   : > { %6788 = vst [vmem:[#allocation21_spill] sm:$0xff] %v5154_v4  ;;  %v921_v8 = vadd.f32 %v5020_v20, %v5154_v4 }
 0x1d0   : > { %3890 = vmatmul.mubr.msk.f32.gmra.mrb[74].mxu1 %vm574_vm0, %v996_v56  ;;  %3922 = vmatmul.mubr.msk.f32.gmra.mrb[58].mxu0 %vm574_vm0, %v996_v56 }
 0x1d1   : > { %1309 = vmatprep.mubr.f32.mxu1 %v6601_v0  ;;  %1566 = vmatprep.mubr.f32.mxu0 %v6601_v0 }
 0x1d4   : > { %3891 = vmatmul.mubr.msk.f32.gmra.mrb[76].mxu1 %vm574_vm0, %v997_v57  ;;  %3923 = vmatmul.mubr.msk.f32.gmra.mrb[60].mxu0 %vm574_vm0, %v997_v57 }
 0x1d5   : > { %1315 = vmatprep.mubr.f32.mxu1 %v6601_v0  ;;  %1572 = vmatprep.mubr.f32.mxu0 %v6601_v0 }
 0x1d8   : > { %3892 = vmatmul.mubr.msk.f32.gmra.mrb[78].mxu1 %vm574_vm0, %v998_v58  ;;  %3924 = vmatmul.mubr.msk.f32.gmra.mrb[62].mxu0 %vm574_vm0, %v998_v58 }
 0x1d9   : > { %1321 = vmatprep.mubr.f32.mxu1 %v6601_v0  ;;  %1578 = vmatprep.mubr.f32.mxu0 %v6601_v0 }
 0x1dc   : > { %3893 = vmatmul.mubr.msk.f32.gmra.mrb[80].mxu1 %vm574_vm0, %v999_v59  ;;  %3925 = vmatmul.mubr.msk.f32.gmra.mrb[64].mxu0 %vm574_vm0, %v999_v59 }
 0x1dd   : > { %1327 = vmatprep.mubr.f32.mxu1 %v6601_v0  ;;  %1584 = vmatprep.mubr.f32.mxu0 %v6601_v0 }
 0x1e0   : > { %3894 = vmatmul.mubr.msk.f32.gmra.mrb[82].mxu1 %vm574_vm0, %v1000_v60  ;;  %3926 = vmatmul.mubr.msk.f32.gmra.mrb[66].mxu0 %vm574_vm0, %v1000_v60 }
 0x1e1   : > { %1333 = vmatprep.mubr.f32.mxu1 %v6601_v0  ;;  %1590 = vmatprep.mubr.f32.mxu0 %v6601_v0 }
 0x1e4   : > { %3895 = vmatmul.mubr.msk.f32.gmra.mrb[84].mxu1 %vm574_vm0, %v1001_v61  ;;  %3927 = vmatmul.mubr.msk.f32.gmra.mrb[68].mxu0 %vm574_vm0, %v1001_v61 }
 0x1e5   : > { %1339 = vmatprep.mubr.f32.mxu1 %v6601_v0  ;;  %1596 = vmatprep.mubr.f32.mxu0 %v6601_v0 }
 0x1e8   : > { %3896 = vmatmul.mubr.msk.f32.gmra.mrb[86].mxu1 %vm574_vm0, %v1002_v5  ;;  %3928 = vmatmul.mubr.msk.f32.gmra.mrb[70].mxu0 %vm574_vm0, %v1002_v5 }
 0x1e9   : > { %1345 = vmatprep.mubr.f32.mxu1 %v6601_v0  ;;  %1602 = vmatprep.mubr.f32.mxu0 %v6601_v0 }
 0x1ec   : > { %3897 = vmatmul.mubr.msk.f32.gmra.mrb[88].mxu1 %vm574_vm0, %v1003_v6  ;;  %3929 = vmatmul.mubr.msk.f32.gmra.mrb[72].mxu0 %vm574_vm0, %v1003_v6 }
 0x1ed   : > { %1351 = vmatprep.mubr.f32.mxu1 %v6601_v0  ;;  %1608 = vmatprep.mubr.f32.mxu0 %v6601_v0 }
 0x1f0   : > { %3898 = vmatmul.mubr.msk.f32.gmra.mrb[90].mxu1 %vm574_vm0, %v1004_v3  ;;  %3930 = vmatmul.mubr.msk.f32.gmra.mrb[74].mxu0 %vm574_vm0, %v1004_v3 }
 0x1f1   : > { %2728 = vmatprep.mubr.f32.mxu0 %v921_v8 }
 0x247   : > { %v5164_v9 = vpop.f32.mrb[28].mxu1  ;;  %v5166_v10 = vpop.f32.mrb[12].mxu0 }
 0x248   : > { %v5168_v13 = vpop.f32.mrb[29].mxu1  ;;  %v5170_v14 = vpop.f32.mrb[13].mxu0 }
 0x249   : > { %v2095_v15 = vmax.f32 %v5166_v10, %v5170_v14  ;;  %v1615_v16 = vmax.f32 %v5164_v9, %v5168_v13 }
 0x24b   : > { %2096 = vmax.xlane.f32.xlu0 %v2095_v15  ;;  %1616 = vmax.xlane.f32.xlu1 %v1615_v16  ;;  %v5176_v62 = vpop.f32.mrb[30].mxu1  ;;  %v5178_v18 = vpop.f32.mrb[14].mxu0 }
 0x24c   : > { %v5180_v63 = vpop.f32.mrb[31].mxu1  ;;  %v5182_v20 = vpop.f32.mrb[15].mxu0 }
 0x24d   : > { %v2098_v21 = vmax.f32 %v5178_v18, %v5182_v20  ;;  %v1618_v1 = vmax.f32 %v5176_v62, %v5180_v63 }
 0x24f   : > { %2099 = vmax.xlane.f32.xlu1 %v2098_v21  ;;  %1619 = vmax.xlane.f32.xlu0 %v1618_v1  ;;  %v5188_v2 = vpop.f32.mrb[32].mxu1  ;;  %v5190_v22 = vpop.f32.mrb[16].mxu0 }
 0x250   : > { %v5192_v23 = vpop.f32.mrb[33].mxu1  ;;  %v5194_v24 = vpop.f32.mrb[17].mxu0 }
 0x251   : > { %v2101_v25 = vmax.f32 %v5190_v22, %v5194_v24  ;;  %v1621_v26 = vmax.f32 %v5188_v2, %v5192_v23 }
 0x253   : > { %2102 = vmax.xlane.f32.xlu0 %v2101_v25  ;;  %1622 = vmax.xlane.f32.xlu1 %v1621_v26  ;;  %v5200_v27 = vpop.f32.mrb[34].mxu1  ;;  %v5202_v28 = vpop.f32.mrb[18].mxu0 }
 0x254   : > { %v5204_v29 = vpop.f32.mrb[35].mxu1  ;;  %v5206_v31 = vpop.f32.mrb[19].mxu0 }
 0x255   : > { %v2104_v32 = vmax.f32 %v5202_v28, %v5206_v31  ;;  %v1624_v34 = vmax.f32 %v5200_v27, %v5204_v29 }
 0x257   : > { %2105 = vmax.xlane.f32.xlu0 %v2104_v32  ;;  %v5212_v35 = vpop.f32.mrb[36].mxu1  ;;  %v5214_v37 = vpop.f32.mrb[20].mxu0 }
 0x258   : > { %v5216_v40 = vpop.f32.mrb[37].mxu1  ;;  %v5218_v43 = vpop.f32.mrb[21].mxu0 }
 0x259   : > { %v2107_v47 = vmax.f32 %v5214_v37, %v5218_v43  ;;  %v1627_v49 = vmax.f32 %v5212_v35, %v5216_v40 }
 0x25b   : > { %1625 = vmax.xlane.f32.xlu0 %v1624_v34  ;;  %2108 = vmax.xlane.f32.xlu1 %v2107_v47  ;;  %v5224_v52 = vpop.f32.mrb[38].mxu1  ;;  %v5226_v54 = vpop.f32.mrb[22].mxu0 }
 0x25c   : > { %v5228_v55 = vpop.f32.mrb[39].mxu1  ;;  %v5230_v56 = vpop.f32.mrb[23].mxu0 }
 0x25d   : > { %v2110_v57 = vmax.f32 %v5226_v54, %v5230_v56  ;;  %v1630_v58 = vmax.f32 %v5224_v52, %v5228_v55 }
 0x25f   : > { %1628 = vmax.xlane.f32.xlu1 %v1627_v49  ;;  %2111 = vmax.xlane.f32.xlu0 %v2110_v57  ;;  %v5236_v59 = vpop.f32.mrb[40].mxu1  ;;  %v5238_v60 = vpop.f32.mrb[24].mxu0 }
 0x260   : > { %v5240_v61 = vpop.f32.mrb[41].mxu1  ;;  %v5242_v5 = vpop.f32.mrb[25].mxu0 }
 0x261   : > { %v2113_v6 = vmax.f32 %v5238_v60, %v5242_v5  ;;  %v1633_v3 = vmax.f32 %v5236_v59, %v5240_v61 }
 0x263   : > { %1631 = vmax.xlane.f32.xlu0 %v1630_v58  ;;  %2114 = vmax.xlane.f32.xlu1 %v2113_v6  ;;  %v5248_v8 = vpop.f32.mrb[42].mxu1  ;;  %v5250_v15 = vpop.f32.mrb[26].mxu0 }
 0x264   : > { %v5252_v16 = vpop.f32.mrb[43].mxu1  ;;  %v5254_v21 = vpop.f32.mrb[27].mxu0 }
 0x265   : > { %v2116_v1 = vmax.f32 %v5250_v15, %v5254_v21  ;;  %v1636_v25 = vmax.f32 %v5248_v8, %v5252_v16 }
 0x267   : > { %1634 = vmax.xlane.f32.xlu1 %v1633_v3  ;;  %2117 = vmax.xlane.f32.xlu0 %v2116_v1  ;;  %v5260_v26 = vpop.f32.mrb[44].mxu1  ;;  %v5262_v32 = vpop.f32.mrb[28].mxu0 }
 0x268   : > { %v5264_v34 = vpop.f32.mrb[45].mxu1  ;;  %v5266_v47 = vpop.f32.mrb[29].mxu0 }
 0x269   : > { %v2119_v49 = vmax.f32 %v5262_v32, %v5266_v47  ;;  %v1639_v57 = vmax.f32 %v5260_v26, %v5264_v34 }
 0x26b   : > { %1637 = vmax.xlane.f32.xlu0 %v1636_v25  ;;  %2120 = vmax.xlane.f32.xlu1 %v2119_v49  ;;  %v5272_v58 = vpop.f32.mrb[46].mxu1  ;;  %v5274_v6 = vpop.f32.mrb[30].mxu0 }
 0x26c   : > { %v5276_v3 = vpop.f32.mrb[47].mxu1  ;;  %v5278_v1 = vpop.f32.mrb[31].mxu0 }
 0x26d   : > { %v2122_v0 = vmax.f32 %v5274_v6, %v5278_v1  ;;  %v1642_v46 = vmax.f32 %v5272_v58, %v5276_v3 }
 0x26f   : > { %1640 = vmax.xlane.f32.xlu1 %v1639_v57  ;;  %2123 = vmax.xlane.f32.xlu0 %v2122_v0  ;;  %v5284_v50 = vpop.f32.mrb[48].mxu1  ;;  %v5286_v25 = vpop.f32.mrb[32].mxu0 }
 0x270   : > { %v5288_v49 = vpop.f32.mrb[49].mxu1  ;;  %v5290_v42 = vpop.f32.mrb[33].mxu0 }
 0x271   : > { %v2125_v44 = vmax.f32 %v5286_v25, %v5290_v42  ;;  %v1645_v36 = vmax.f32 %v5284_v50, %v5288_v49 }
 0x273   : > { %1643 = vmax.xlane.f32.xlu0 %v1642_v46  ;;  %2126 = vmax.xlane.f32.xlu1 %v2125_v44  ;;  %v5296_v39 = vpop.f32.mrb[50].mxu1  ;;  %v5298_v57 = vpop.f32.mrb[34].mxu0 }
 0x274   : > { %6789 = vst [vmem:[#allocation22_spill] sm:$0xff] %v5296_v39  ;;  %v5300_v0 = vpop.f32.mrb[51].mxu1  ;;  %v5302_v30 = vpop.f32.mrb[35].mxu0 }
 0x275   : > { %6790 = vst [vmem:[#allocation23_spill] sm:$0xff] %v5300_v0  ;;  %v2128_v33 = vmax.f32 %v5298_v57, %v5302_v30  ;;  %v1648_v51 = vmax.f32 %v5296_v39, %v5300_v0 }
 0x277   : > { %1646 = vmax.xlane.f32.xlu1 %v1645_v36  ;;  %2129 = vmax.xlane.f32.xlu0 %v2128_v33  ;;  %v5308_v53 = vpop.f32.mrb[52].mxu1  ;;  %v5310_v46 = vpop.f32.mrb[36].mxu0 }
 0x278   : > { %6791 = vst [vmem:[#allocation24_spill] sm:$0xff] %v5308_v53  ;;  %v5312_v44 = vpop.f32.mrb[53].mxu1  ;;  %v5314_v45 = vpop.f32.mrb[37].mxu0 }
 0x279   : > { %6792 = vst [vmem:[#allocation25_spill] sm:$0xff] %v5312_v44  ;;  %6793 = vst [vmem:[#allocation26_spill] sm:$0xff] %v5314_v45  ;;  %v2131_v17 = vmax.f32 %v5310_v46, %v5314_v45  ;;  %v1651_v48 = vmax.f32 %v5308_v53, %v5312_v44 }
 0x27b   : > { %1649 = vmax.xlane.f32.xlu0 %v1648_v51  ;;  %2132 = vmax.xlane.f32.xlu1 %v2131_v17  ;;  %v5320_v12 = vpop.f32.mrb[54].mxu1  ;;  %v5322_v36 = vpop.f32.mrb[38].mxu0 }
 0x27c   : > { %6794 = vst [vmem:[#allocation27_spill] sm:$0xff] %v5320_v12  ;;  %6795 = vst [vmem:[#allocation28_spill] sm:$0xff] %v5322_v36  ;;  %v5324_v33 = vpop.f32.mrb[55].mxu1  ;;  %v5326_v38 = vpop.f32.mrb[39].mxu0 }
 0x27d   : > { %6796 = vst [vmem:[#allocation29_spill] sm:$0xff] %v5324_v33  ;;  %6797 = vst [vmem:[#allocation30_spill] sm:$0xff] %v5326_v38  ;;  %v2134_v11 = vmax.f32 %v5322_v36, %v5326_v38  ;;  %v1654_v41 = vmax.f32 %v5320_v12, %v5324_v33 }
 0x27f   : > { %1652 = vmax.xlane.f32.xlu1 %v1651_v48  ;;  %2135 = vmax.xlane.f32.xlu0 %v2134_v11  ;;  %v5332_v7 = vpop.f32.mrb[56].mxu1  ;;  %v5334_v51 = vpop.f32.mrb[40].mxu0 }
 0x280   : > { %6798 = vst [vmem:[#allocation31_spill] sm:$0xff] %v5332_v7  ;;  %6799 = vst [vmem:[#allocation32_spill] sm:$0xff] %v5334_v51  ;;  %v5336_v17 = vpop.f32.mrb[57].mxu1  ;;  %v5338_v19 = vpop.f32.mrb[41].mxu0 }
 0x281   : > { %6800 = vst [vmem:[#allocation33_spill] sm:$0xff] %v5336_v17  ;;  %6801 = vst [vmem:[#allocation34_spill] sm:$0xff] %v5338_v19  ;;  %v2137_v4 = vmax.f32 %v5334_v51, %v5338_v19  ;;  %v1657_v44 = vmax.f32 %v5332_v7, %v5336_v17 }
 0x283   : > { %1655 = vmax.xlane.f32.xlu0 %v1654_v41  ;;  %2138 = vmax.xlane.f32.xlu1 %v2137_v4  ;;  %v5344_v38 = vpop.f32.mrb[58].mxu1  ;;  %v5346_v48 = vpop.f32.mrb[42].mxu0 }
 0x284   : > { %6802 = vst [vmem:[#allocation35_spill] sm:$0xff] %v5344_v38  ;;  %6803 = vst [vmem:[#allocation36_spill] sm:$0xff] %v5346_v48  ;;  %v5348_v11 = vpop.f32.mrb[59].mxu1  ;;  %v5350_v33 = vpop.f32.mrb[43].mxu0 }
 0x285   : > { %6804 = vst [vmem:[#allocation37_spill] sm:$0xff] %v5348_v11  ;;  %6805 = vst [vmem:[#allocation38_spill] sm:$0xff] %v5350_v33  ;;  %v2140_v12 = vmax.f32 %v5346_v48, %v5350_v33  ;;  %v1660_v36 = vmax.f32 %v5344_v38, %v5348_v11 }
 0x287   : > { %1658 = vmax.xlane.f32.xlu1 %v1657_v44  ;;  %2141 = vmax.xlane.f32.xlu0 %v2140_v12  ;;  %v5356_v19 = vpop.f32.mrb[60].mxu1  ;;  %v5358_v41 = vpop.f32.mrb[44].mxu0 }
 0x288   : > { %6806 = vst [vmem:[#allocation39_spill] sm:$0xff] %v5356_v19  ;;  %6807 = vst [vmem:[#allocation40_spill] sm:$0xff] %v5358_v41  ;;  %v5360_v4 = vpop.f32.mrb[61].mxu1  ;;  %v5362_v17 = vpop.f32.mrb[45].mxu0 }
 0x289   : > { %6808 = vst [vmem:[#allocation41_spill] sm:$0xff] %v5360_v4  ;;  %6809 = vst [vmem:[#allocation42_spill] sm:$0xff] %v5362_v17  ;;  %v2143_v7 = vmax.f32 %v5358_v41, %v5362_v17  ;;  %v1663_v51 = vmax.f32 %v5356_v19, %v5360_v4 }
 0x28b   : > { %2144 = vmax.xlane.f32.xlu1 %v2143_v7  ;;  %v5368_v33 = vpop.f32.mrb[46].mxu0  ;;  %1661 = vmax.xlane.f32.xlu0 %v1660_v36  ;;  %v5370_v44 = vpop.f32.mrb[62].mxu1 }
 0x28c   : > { %6810 = vst [vmem:[#allocation43_spill] sm:$0xff] %v5368_v33  ;;  %6811 = vst [vmem:[#allocation44_spill] sm:$0xff] %v5370_v44  ;;  %v5372_v12 = vpop.f32.mrb[63].mxu1  ;;  %v5374_v11 = vpop.f32.mrb[47].mxu0 }
 0x28d   : > { %6812 = vst [vmem:[#allocation45_spill] sm:$0xff] %v5372_v12  ;;  %6813 = vst [vmem:[#allocation46_spill] sm:$0xff] %v5374_v11  ;;  %v2146_v38 = vmax.f32 %v5368_v33, %v5374_v11  ;;  %v1666_v48 = vmax.f32 %v5370_v44, %v5372_v12 }
 0x28f   : > { %v5380_v17 = vpop.f32.mrb[48].mxu0  ;;  %2147 = vmax.xlane.f32.xlu0 %v2146_v38  ;;  %1664 = vmax.xlane.f32.xlu1 %v1663_v51  ;;  %v5382_v7 = vpop.f32.mrb[64].mxu1 }
 0x290   : > { %6814 = vst [vmem:[#allocation47_spill] sm:$0xff] %v5380_v17  ;;  %6815 = vst [vmem:[#allocation48_spill] sm:$0xff] %v5382_v7  ;;  %v5384_v4 = vpop.f32.mrb[65].mxu1  ;;  %v5386_v36 = vpop.f32.mrb[49].mxu0 }
 0x291   : > { %6816 = vst [vmem:[#allocation49_spill] sm:$0xff] %v5384_v4  ;;  %6817 = vst [vmem:[#allocation50_spill] sm:$0xff] %v5386_v36  ;;  %v2149_v19 = vmax.f32 %v5380_v17, %v5386_v36  ;;  %v1669_v41 = vmax.f32 %v5382_v7, %v5384_v4 }
 0x293   : > { %v5392_v11 = vpop.f32.mrb[50].mxu0  ;;  %2150 = vmax.xlane.f32.xlu1 %v2149_v19  ;;  %1667 = vmax.xlane.f32.xlu0 %v1666_v48  ;;  %v5394_v12 = vpop.f32.mrb[66].mxu1 }
 0x294   : > { %6818 = vst [vmem:[#allocation51_spill] sm:$0xff] %v5392_v11  ;;  %6819 = vst [vmem:[#allocation52_spill] sm:$0xff] %v5394_v12  ;;  %v5396_v38 = vpop.f32.mrb[67].mxu1  ;;  %v5398_v51 = vpop.f32.mrb[51].mxu0 }
 0x295   : > { %6820 = vst [vmem:[#allocation53_spill] sm:$0xff] %v5396_v38  ;;  %6821 = vst [vmem:[#allocation54_spill] sm:$0xff] %v5398_v51  ;;  %v2152_v44 = vmax.f32 %v5392_v11, %v5398_v51  ;;  %v1672_v33 = vmax.f32 %v5394_v12, %v5396_v38 }
 0x297   : > { %v5404_v36 = vpop.f32.mrb[52].mxu0  ;;  %2153 = vmax.xlane.f32.xlu0 %v2152_v44  ;;  %1670 = vmax.xlane.f32.xlu1 %v1669_v41  ;;  %v5406_v4 = vpop.f32.mrb[68].mxu1 }
 0x298   : > { %6822 = vst [vmem:[#allocation55_spill] sm:$0xff] %v5404_v36  ;;  %6823 = vst [vmem:[#allocation56_spill] sm:$0xff] %v5406_v4  ;;  %v5408_v19 = vpop.f32.mrb[69].mxu1  ;;  %v5410_v48 = vpop.f32.mrb[53].mxu0 }
 0x299   : > { %6824 = vst [vmem:[#allocation57_spill] sm:$0xff] %v5408_v19  ;;  %6825 = vst [vmem:[#allocation58_spill] sm:$0xff] %v5410_v48  ;;  %v2155_v7 = vmax.f32 %v5404_v36, %v5410_v48  ;;  %v1675_v17 = vmax.f32 %v5406_v4, %v5408_v19 }
 0x29b   : > { %v5416_v51 = vpop.f32.mrb[54].mxu0  ;;  %2156 = vmax.xlane.f32.xlu1 %v2155_v7  ;;  %1673 = vmax.xlane.f32.xlu0 %v1672_v33  ;;  %v5418_v38 = vpop.f32.mrb[70].mxu1 }
 0x29c   : > { %6826 = vst [vmem:[#allocation59_spill] sm:$0xff] %v5416_v51  ;;  %6827 = vst [vmem:[#allocation60_spill] sm:$0xff] %v5418_v38  ;;  %v5420_v44 = vpop.f32.mrb[71].mxu1  ;;  %v5422_v41 = vpop.f32.mrb[55].mxu0 }
 0x29d   : > { %6828 = vst [vmem:[#allocation61_spill] sm:$0xff] %v5420_v44  ;;  %6829 = vst [vmem:[#allocation62_spill] sm:$0xff] %v5422_v41  ;;  %v2158_v12 = vmax.f32 %v5416_v51, %v5422_v41  ;;  %v1678_v11 = vmax.f32 %v5418_v38, %v5420_v44 }
 0x29f   : > { %v5428_v48 = vpop.f32.mrb[56].mxu0  ;;  %2159 = vmax.xlane.f32.xlu0 %v2158_v12  ;;  %1676 = vmax.xlane.f32.xlu1 %v1675_v17  ;;  %v5430_v19 = vpop.f32.mrb[72].mxu1 }
 0x2a0   : > { %6830 = vst [vmem:[#allocation63_spill] sm:$0xff] %v5428_v48  ;;  %6831 = vst [vmem:[#allocation64_spill] sm:$0xff] %v5430_v19  ;;  %v5432_v7 = vpop.f32.mrb[73].mxu1  ;;  %v5434_v33 = vpop.f32.mrb[57].mxu0 }
 0x2a1   : > { %6832 = vst [vmem:[#allocation65_spill] sm:$0xff] %v5432_v7  ;;  %6833 = vst [vmem:[#allocation66_spill] sm:$0xff] %v5434_v33  ;;  %v2161_v4 = vmax.f32 %v5428_v48, %v5434_v33  ;;  %v1681_v36 = vmax.f32 %v5430_v19, %v5432_v7 }
 0x2a3   : > { %v5440_v41 = vpop.f32.mrb[58].mxu0  ;;  %2162 = vmax.xlane.f32.xlu1 %v2161_v4  ;;  %1679 = vmax.xlane.f32.xlu0 %v1678_v11  ;;  %v5442_v44 = vpop.f32.mrb[74].mxu1 }
 0x2a4   : > { %6834 = vst [vmem:[#allocation67_spill] sm:$0xff] %v5440_v41  ;;  %6835 = vst [vmem:[#allocation68_spill] sm:$0xff] %v5442_v44  ;;  %v5444_v12 = vpop.f32.mrb[75].mxu1  ;;  %v5446_v17 = vpop.f32.mrb[59].mxu0 }
 0x2a5   : > { %6836 = vst [vmem:[#allocation69_spill] sm:$0xff] %v5444_v12  ;;  %6837 = vst [vmem:[#allocation70_spill] sm:$0xff] %v5446_v17  ;;  %v2164_v38 = vmax.f32 %v5440_v41, %v5446_v17  ;;  %v1684_v51 = vmax.f32 %v5442_v44, %v5444_v12 }
 0x2a7   : > { %v5452_v33 = vpop.f32.mrb[60].mxu0  ;;  %2165 = vmax.xlane.f32.xlu0 %v2164_v38  ;;  %1682 = vmax.xlane.f32.xlu1 %v1681_v36  ;;  %v5454_v7 = vpop.f32.mrb[76].mxu1 }
 0x2a8   : > { %6838 = vst [vmem:[#allocation71_spill] sm:$0xff] %v5452_v33  ;;  %6839 = vst [vmem:[#allocation72_spill] sm:$0xff] %v5454_v7  ;;  %v5456_v4 = vpop.f32.mrb[77].mxu1  ;;  %v5458_v11 = vpop.f32.mrb[61].mxu0 }
 0x2a9   : > { %6840 = vst [vmem:[#allocation73_spill] sm:$0xff] %v5456_v4  ;;  %6841 = vst [vmem:[#allocation74_spill] sm:$0xff] %v5458_v11  ;;  %v2167_v19 = vmax.f32 %v5452_v33, %v5458_v11  ;;  %v1687_v48 = vmax.f32 %v5454_v7, %v5456_v4 }
 0x2ab   : > { %v5464_v17 = vpop.f32.mrb[62].mxu0  ;;  %2168 = vmax.xlane.f32.xlu1 %v2167_v19  ;;  %1685 = vmax.xlane.f32.xlu0 %v1684_v51  ;;  %v5466_v12 = vpop.f32.mrb[78].mxu1 }
 0x2ac   : > { %6842 = vst [vmem:[#allocation75_spill] sm:$0xff] %v5464_v17  ;;  %6843 = vst [vmem:[#allocation76_spill] sm:$0xff] %v5466_v12  ;;  %v5468_v38 = vpop.f32.mrb[79].mxu1  ;;  %v5470_v36 = vpop.f32.mrb[63].mxu0 }
 0x2ad   : > { %6844 = vst [vmem:[#allocation77_spill] sm:$0xff] %v5468_v38  ;;  %6845 = vst [vmem:[#allocation78_spill] sm:$0xff] %v5470_v36  ;;  %v2170_v44 = vmax.f32 %v5464_v17, %v5470_v36  ;;  %v1690_v41 = vmax.f32 %v5466_v12, %v5468_v38 }
 0x2af   : > { %v5476_v11 = vpop.f32.mrb[64].mxu0  ;;  %2171 = vmax.xlane.f32.xlu0 %v2170_v44  ;;  %1688 = vmax.xlane.f32.xlu1 %v1687_v48  ;;  %v5478_v4 = vpop.f32.mrb[80].mxu1 }
 0x2b0   : > { %6846 = vst [vmem:[#allocation79_spill] sm:$0xff] %v5476_v11  ;;  %6847 = vst [vmem:[#allocation80_spill] sm:$0xff] %v5478_v4  ;;  %v5480_v19 = vpop.f32.mrb[81].mxu1  ;;  %v5482_v51 = vpop.f32.mrb[65].mxu0 }
 0x2b1   : > { %6848 = vst [vmem:[#allocation81_spill] sm:$0xff] %v5480_v19  ;;  %6849 = vst [vmem:[#allocation82_spill] sm:$0xff] %v5482_v51  ;;  %v1693_v7 = vmax.f32 %v5478_v4, %v5480_v19  ;;  %v2173_v33 = vmax.f32 %v5476_v11, %v5482_v51 }
 0x2b3   : > { %v5488_v36 = vpop.f32.mrb[66].mxu0  ;;  %2174 = vmax.xlane.f32.xlu1 %v2173_v33  ;;  %1691 = vmax.xlane.f32.xlu0 %v1690_v41  ;;  %v5490_v38 = vpop.f32.mrb[82].mxu1 }
 0x2b4   : > { %6850 = vst [vmem:[#allocation83_spill] sm:$0xff] %v5488_v36  ;;  %6851 = vst [vmem:[#allocation84_spill] sm:$0xff] %v5490_v38  ;;  %v5492_v44 = vpop.f32.mrb[83].mxu1  ;;  %v5494_v48 = vpop.f32.mrb[67].mxu0 }
 0x2b5   : > { %6852 = vst [vmem:[#allocation85_spill] sm:$0xff] %v5492_v44  ;;  %6853 = vst [vmem:[#allocation86_spill] sm:$0xff] %v5494_v48  ;;  %v1696_v12 = vmax.f32 %v5490_v38, %v5492_v44  ;;  %v2176_v17 = vmax.f32 %v5488_v36, %v5494_v48 }
 0x2b7   : > { %v5500_v19 = vpop.f32.mrb[68].mxu0  ;;  %2177 = vmax.xlane.f32.xlu0 %v2176_v17  ;;  %1694 = vmax.xlane.f32.xlu1 %v1693_v7  ;;  %v5502_v4 = vpop.f32.mrb[84].mxu1 }
 0x2b8   : > { %6854 = vst [vmem:[#allocation87_spill] sm:$0xff] %v5500_v19  ;;  %6855 = vst [vmem:[#allocation88_spill] sm:$0xff] %v5502_v4  ;;  %v5504_v33 = vpop.f32.mrb[85].mxu1  ;;  %v5506_v41 = vpop.f32.mrb[69].mxu0 }
 0x2b9   : > { %6856 = vst [vmem:[#allocation89_spill] sm:$0xff] %v5504_v33  ;;  %6857 = vst [vmem:[#allocation90_spill] sm:$0xff] %v5506_v41  ;;  %v1699_v51 = vmax.f32 %v5502_v4, %v5504_v33  ;;  %v2179_v11 = vmax.f32 %v5500_v19, %v5506_v41 }
 0x2bb   : > { %v5512_v44 = vpop.f32.mrb[70].mxu0  ;;  %2180 = vmax.xlane.f32.xlu1 %v2179_v11  ;;  %1697 = vmax.xlane.f32.xlu0 %v1696_v12  ;;  %v5514_v38 = vpop.f32.mrb[86].mxu1 }
 0x2bc   : > { %6858 = vst [vmem:[#allocation91_spill] sm:$0xff] %v5512_v44  ;;  %6859 = vst [vmem:[#allocation92_spill] sm:$0xff] %v5514_v38  ;;  %v5516_v17 = vpop.f32.mrb[87].mxu1  ;;  %v5518_v7 = vpop.f32.mrb[71].mxu0 }
 0x2bd   : > { %6860 = vst [vmem:[#allocation93_spill] sm:$0xff] %v5516_v17  ;;  %6861 = vst [vmem:[#allocation94_spill] sm:$0xff] %v5518_v7  ;;  %v1702_v48 = vmax.f32 %v5514_v38, %v5516_v17  ;;  %v2182_v36 = vmax.f32 %v5512_v44, %v5518_v7 }
 0x2bf   : > { %v5524_v33 = vpop.f32.mrb[72].mxu0  ;;  %2183 = vmax.xlane.f32.xlu0 %v2182_v36  ;;  %1700 = vmax.xlane.f32.xlu1 %v1699_v51  ;;  %v5526_v4 = vpop.f32.mrb[88].mxu1 }
 0x2c0   : > { %6862 = vst [vmem:[#allocation95_spill] sm:$0xff] %v5524_v33  ;;  %6863 = vst [vmem:[#allocation96_spill] sm:$0xff] %v5526_v4  ;;  %v5528_v11 = vpop.f32.mrb[89].mxu1  ;;  %v5530_v12 = vpop.f32.mrb[73].mxu0 }
 0x2c1   : > { %6864 = vst [vmem:[#allocation97_spill] sm:$0xff] %v5528_v11  ;;  %6865 = vst [vmem:[#allocation98_spill] sm:$0xff] %v5530_v12  ;;  %v1705_v41 = vmax.f32 %v5526_v4, %v5528_v11  ;;  %v2185_v19 = vmax.f32 %v5524_v33, %v5530_v12 }
 0x2c3   : > { %v5536_v17 = vpop.f32.mrb[74].mxu0  ;;  %2186 = vmax.xlane.f32.xlu1 %v2185_v19  ;;  %1703 = vmax.xlane.f32.xlu0 %v1702_v48  ;;  %v5538_v38 = vpop.f32.mrb[90].mxu1 }
 0x2c4   : > { %6866 = vst [vmem:[#allocation99_spill] sm:$0xff] %v5538_v38  ;;  %v5540_v36 = vpop.f32.mrb[91].mxu1  ;;  %v5542_v51 = vpop.f32.mrb[75].mxu0 }
 0x2c5   : > { %6867 = vst [vmem:[#allocation100_spill] sm:$0xff] %v5540_v36  ;;  %v1708_v7 = vmax.f32 %v5538_v38, %v5540_v36  ;;  %v2188_v44 = vmax.f32 %v5536_v17, %v5542_v51 }
 0x2c7   : > { %2189 = vmax.xlane.f32.xlu0 %v2188_v44  ;;  %1706 = vmax.xlane.f32.xlu1 %v1705_v41 }
 0x2cb   : > { %1709 = vmax.xlane.f32.xlu0 %v1708_v7 }
 0x2d8   : > { %v1617_v11 = vpop.xlane.xlu1 %1616  ;;  %v2097_v4 = vpop.xlane.xlu0 %2096 }
 0x2d9   : > { %v1711_v19 = vsub.f32 %v5164_v9, %v1617_v11  ;;  %v1712_v48 = vsub.f32 %v5168_v13, %v1617_v11  ;;  %v2191_v12 = vsub.f32 %v5166_v10, %v2097_v4  ;;  %v2192_v33 = vsub.f32 %v5170_v14, %v2097_v4 }
 0x2db   : > { %v1775_v53 = vmul.f32 1.442695, %v1711_v19  ;;  %v1777_v0 = vmul.f32 1.442695, %v1712_v48  ;;  %v2255_v39 = vmul.f32 1.442695, %v2191_v12 }
 0x2dc   : > { %v2257_v36 = vmul.f32 1.442695, %v2192_v33  ;;  %v2100_v38 = vpop.xlane.xlu1 %2099  ;;  %v1620_v45 = vpop.xlane.xlu0 %1619 }
 0x2dd   : > { %4249 = vpow2.f32 %v1775_v53  ;;  %v2193_v44 = vsub.f32 %v5178_v18, %v2100_v38  ;;  %v2194_v41 = vsub.f32 %v5182_v20, %v2100_v38  ;;  %v1713_v7 = vsub.f32 %v5176_v62, %v1620_v45 }
 0x2de   : > { %4251 = vpow2.f32 %v1777_v0  ;;  %v1714_v9 = vsub.f32 %v5180_v63, %v1620_v45 }
 0x2df   : > { %4253 = vpow2.f32 %v2255_v39  ;;  %v2259_v10 = vmul.f32 1.442695, %v2193_v44  ;;  %v2261_v13 = vmul.f32 1.442695, %v2194_v41  ;;  %v1779_v14 = vmul.f32 1.442695, %v1713_v7 }
 0x2e0   : > { %4255 = vpow2.f32 %v2257_v36  ;;  %v1781_v4 = vmul.f32 1.442695, %v1714_v9  ;;  %v1623_v11 = vpop.xlane.xlu1 %1622  ;;  %v2103_v33 = vpop.xlane.xlu0 %2102 }
 0x2e1   : > { %4257 = vpow2.f32 %v2259_v10  ;;  %v1715_v53 = vsub.f32 %v5188_v2, %v1623_v11  ;;  %v1716_v18 = vsub.f32 %v5192_v23, %v1623_v11  ;;  %v2195_v20 = vsub.f32 %v5190_v22, %v2103_v33 }
 0x2e2   : > { %4259 = vpow2.f32 %v2261_v13  ;;  %v2196_v62 = vsub.f32 %v5194_v24, %v2103_v33 }
 0x2e3   : > { %4261 = vpow2.f32 %v1779_v14  ;;  %v1783_v45 = vmul.f32 1.442695, %v1715_v53  ;;  %v1785_v39 = vmul.f32 1.442695, %v1716_v18  ;;  %v2263_v63 = vmul.f32 1.442695, %v2195_v20 }
 0x2e4   : > { %4263 = vpow2.f32 %v1781_v4  ;;  %v2265_v0 = vmul.f32 1.442695, %v2196_v62  ;;  %v2106_v38 = vpop.xlane.xlu0 %2105 }
 0x2e5   : > { %4265 = vpow2.f32 %v1783_v45  ;;  %v2197_v12 = vsub.f32 %v5202_v28, %v2106_v38  ;;  %v2198_v36 = vsub.f32 %v5206_v31, %v2106_v38 }
 0x2e6   : > { %4267 = vpow2.f32 %v1785_v39 }
 0x2e7   : > { %v5562_v2 = vpop.eup %4249  ;;  %4269 = vpow2.f32 %v2263_v63  ;;  %v2267_v22 = vmul.f32 1.442695, %v2197_v12  ;;  %v2269_v23 = vmul.f32 1.442695, %v2198_v36 }
 0x2e8   : > { %v5564_v19 = vpop.eup %4251  ;;  %4271 = vpow2.f32 %v2265_v0  ;;  %v2109_v24 = vpop.xlane.xlu1 %2108 }
 0x2e9   : > { %v1626_v48 = vpop.xlane.xlu0 %1625  ;;  %v5566_v44 = vpop.eup %4253  ;;  %4273 = vpow2.f32 %v2267_v22  ;;  %v2199_v41 = vsub.f32 %v5214_v37, %v2109_v24  ;;  %v2200_v28 = vsub.f32 %v5218_v43, %v2109_v24  ;;  %v1903_v63 = vadd.f32 %v5564_v19, %v5562_v2 }
 0x2ea   : > { %v1717_v31 = vsub.f32 %v5200_v27, %v1626_v48  ;;  %v5571_v7 = vpop.eup %4255  ;;  %4275 = vpow2.f32 %v2269_v23  ;;  %v1718_v9 = vsub.f32 %v5204_v29, %v1626_v48 }
 0x2eb   : > { %v5574_v10 = vpop.eup %4257  ;;  %v2271_v13 = vmul.f32 1.442695, %v2199_v41  ;;  %v2273_v14 = vmul.f32 1.442695, %v2200_v28  ;;  %v2383_v11 = vadd.f32 %v5571_v7, %v5566_v44 }
 0x2ec   : > { %v1787_v4 = vmul.f32 1.442695, %v1717_v31  ;;  %v5578_v33 = vpop.eup %4259  ;;  %v1789_v37 = vmul.f32 1.442695, %v1718_v9  ;;  %v1629_v53 = vpop.xlane.xlu1 %1628 }
 0x2ed   : > { %v2112_v43 = vpop.xlane.xlu0 %2111  ;;  %v5580_v18 = vpop.eup %4261  ;;  %4277 = vpow2.f32 %v2271_v13  ;;  %2384 = vadd.xlane.f32.xlu1 %v2383_v11  ;;  %v1719_v27 = vsub.f32 %v5212_v35, %v1629_v53  ;;  %v1720_v29 = vsub.f32 %v5216_v40, %v1629_v53  ;;  %v2386_v39 = vadd.f32 %v5578_v33, %v5574_v10 }
 0x2ee   : > { %v2201_v20 = vsub.f32 %v5226_v54, %v2112_v43  ;;  %v5585_v62 = vpop.eup %4263  ;;  %4279 = vpow2.f32 %v2273_v14  ;;  %v2202_v45 = vsub.f32 %v5230_v56, %v2112_v43 }
 0x2ef   : > { %v5592_v0 = vpop.eup %4265  ;;  %4281 = vpow2.f32 %v1787_v4  ;;  %v1791_v38 = vmul.f32 1.442695, %v1719_v27  ;;  %v1793_v35 = vmul.f32 1.442695, %v1720_v29  ;;  %2387 = vadd.xlane.f32.xlu0 %v2386_v39  ;;  %v1906_v31 = vadd.f32 %v5585_v62, %v5580_v18 }
 0x2f0   : > { %v2275_v12 = vmul.f32 1.442695, %v2201_v20  ;;  %v5594_v40 = vpop.eup %4267  ;;  %4283 = vpow2.f32 %v1789_v37  ;;  %v2277_v54 = vmul.f32 1.442695, %v2202_v45  ;;  %v2115_v36 = vpop.xlane.xlu1 %2114 }
 0x2f1   : > { %v1632_v22 = vpop.xlane.xlu0 %1631  ;;  %v5596_v56 = vpop.eup %4269  ;;  %4285 = vpow2.f32 %v1791_v38  ;;  %1904 = vadd.xlane.f32.xlu1 %v1903_v63  ;;  %v2203_v23 = vsub.f32 %v5238_v60, %v2115_v36  ;;  %v2204_v24 = vsub.f32 %v5242_v5, %v2115_v36 }
 0x2f2   : > { %v1721_v48 = vsub.f32 %v5224_v52, %v1632_v22  ;;  %v5601_v41 = vpop.eup %4271  ;;  %4287 = vpow2.f32 %v1793_v35  ;;  %v1722_v28 = vsub.f32 %v5228_v55, %v1632_v22 }
 0x2f3   : > { %v5606_v9 = vpop.eup %4273  ;;  %4289 = vpow2.f32 %v2275_v12  ;;  %v2279_v13 = vmul.f32 1.442695, %v2203_v23  ;;  %v2281_v14 = vmul.f32 1.442695, %v2204_v24  ;;  %1907 = vadd.xlane.f32.xlu0 %v1906_v31  ;;  %v2389_v52 = vadd.f32 %v5601_v41, %v5596_v56 }
 0x2f4   : > { %v1795_v4 = vmul.f32 1.442695, %v1721_v48  ;;  %v5608_v11 = vpop.eup %4275  ;;  %4291 = vpow2.f32 %v2277_v54  ;;  %v1797_v60 = vmul.f32 1.442695, %v1722_v28  ;;  %v1635_v5 = vpop.xlane.xlu1 %1634 }
 0x2f5   : > { %v2118_v37 = vpop.xlane.xlu0 %2117  ;;  %4293 = vpow2.f32 %v2279_v13  ;;  %v1723_v55 = vsub.f32 %v5236_v59, %v1635_v5  ;;  %v1724_v53 = vsub.f32 %v5240_v61, %v1635_v5  ;;  %2390 = vadd.xlane.f32.xlu1 %v2389_v52  ;;  %v2392_v29 = vadd.f32 %v5608_v11, %v5606_v9 }
 0x2f6   : > { %v2205_v43 = vsub.f32 %v5250_v15, %v2118_v37  ;;  %4295 = vpow2.f32 %v2281_v14  ;;  %v2206_v27 = vsub.f32 %v5254_v21, %v2118_v37  ;;  %v1909_v61 = vadd.f32 %v5594_v40, %v5592_v0 }
 0x2f7   : > { %v5618_v20 = vpop.eup %4277  ;;  %4297 = vpow2.f32 %v1795_v4  ;;  %v1799_v45 = vmul.f32 1.442695, %v1723_v55  ;;  %v1801_v39 = vmul.f32 1.442695, %v1724_v53  ;;  %2393 = vadd.xlane.f32.xlu0 %v2392_v29 }
 0x2f8   : > { %v2283_v63 = vmul.f32 1.442695, %v2205_v43  ;;  %v5620_v38 = vpop.eup %4279  ;;  %4299 = vpow2.f32 %v1797_v60  ;;  %v2285_v59 = vmul.f32 1.442695, %v2206_v27  ;;  %v2121_v15 = vpop.xlane.xlu1 %2120 }
 0x2f9   : > { %v1638_v35 = vpop.xlane.xlu0 %1637  ;;  %v5624_v21 = vpop.eup %4281  ;;  %4301 = vpow2.f32 %v1799_v45  ;;  %v2207_v12 = vsub.f32 %v5262_v32, %v2121_v15  ;;  %v2208_v54 = vsub.f32 %v5266_v47, %v2121_v15  ;;  %1910 = vadd.xlane.f32.xlu1 %v1909_v61  ;;  %v2395_v24 = vadd.f32 %v5620_v38, %v5618_v20 }
 0x2fa   : > { %v1725_v36 = vsub.f32 %v5248_v8, %v1638_v35  ;;  %v5629_v22 = vpop.eup %4283  ;;  %4303 = vpow2.f32 %v1801_v39  ;;  %v1726_v23 = vsub.f32 %v5252_v16, %v1638_v35 }
 0x2fb   : > { %v5634_v48 = vpop.eup %4285  ;;  %4305 = vpow2.f32 %v2283_v63  ;;  %v2287_v28 = vmul.f32 1.442695, %v2207_v12  ;;  %v2289_v31 = vmul.f32 1.442695, %v2208_v54  ;;  %v1912_v8 = vadd.f32 %v5629_v22, %v5624_v21 }
 0x2fc   : > { %v1803_v13 = vmul.f32 1.442695, %v1725_v36  ;;  %v5636_v32 = vpop.eup %4287  ;;  %4307 = vpow2.f32 %v2285_v59  ;;  %v1805_v47 = vmul.f32 1.442695, %v1726_v23  ;;  %v1641_v14 = vpop.xlane.xlu1 %1640 }
 0x2fd   : > { %v2124_v4 = vpop.xlane.xlu0 %2123  ;;  %v5640_v60 = vpop.eup %4289  ;;  %4309 = vpow2.f32 %v2287_v28  ;;  %v1727_v16 = vsub.f32 %v5260_v26, %v1641_v14  ;;  %v1728_v52 = vsub.f32 %v5264_v34, %v1641_v14  ;;  %2396 = vadd.xlane.f32.xlu1 %v2395_v24  ;;  %1913 = vadd.xlane.f32.xlu0 %v1912_v8  ;;  %v1915_v53 = vadd.f32 %v5636_v32, %v5634_v48 }
 0x2fe   : > { %v2209_v5 = vsub.f32 %v5274_v6, %v2124_v4  ;;  %v5645_v37 = vpop.eup %4291  ;;  %4311 = vpow2.f32 %v2289_v31  ;;  %v2210_v55 = vsub.f32 %v5278_v1, %v2124_v4 }
 0x2ff   : > { %v5650_v43 = vpop.eup %4293  ;;  %4313 = vpow2.f32 %v1803_v13  ;;  %v1807_v27 = vmul.f32 1.442695, %v1727_v16  ;;  %v1809_v29 = vmul.f32 1.442695, %v1728_v52  ;;  %v2398_v6 = vadd.f32 %v5645_v37, %v5640_v60 }
 0x300   : > { %v2291_v26 = vmul.f32 1.442695, %v2209_v5  ;;  %v5652_v45 = vpop.eup %4295  ;;  %4315 = vpow2.f32 %v1805_v47  ;;  %v2293_v34 = vmul.f32 1.442695, %v2210_v55  ;;  %v2127_v39 = vpop.xlane.xlu1 %2126 }
 0x301   : > { %v1644_v63 = vpop.xlane.xlu0 %1643  ;;  %v5656_v59 = vpop.eup %4297  ;;  %4317 = vpow2.f32 %v1807_v27  ;;  %v2211_v1 = vsub.f32 %v5286_v25, %v2127_v39  ;;  %v2212_v61 = vsub.f32 %v5290_v42, %v2127_v39  ;;  %1916 = vadd.xlane.f32.xlu1 %v1915_v53  ;;  %2399 = vadd.xlane.f32.xlu0 %v2398_v6  ;;  %v2401_v54 = vadd.f32 %v5652_v45, %v5650_v43  ;;  %v6868_v6 = vld [vmem:[#allocation26_spill] sm:$0xff] }
 0x302   : > { %v1729_v15 = vsub.f32 %v5272_v58, %v1644_v63  ;;  %v5661_v35 = vpop.eup %4299  ;;  %4319 = vpow2.f32 %v1809_v29  ;;  %v1730_v12 = vsub.f32 %v5276_v3, %v1644_v63  ;;  %v6869_v63 = vld [vmem:[#allocation22_spill] sm:$0xff] }
 0x303   : > { %v5666_v36 = vpop.eup %4301  ;;  %4321 = vpow2.f32 %v2291_v26  ;;  %v2295_v23 = vmul.f32 1.442695, %v2211_v1  ;;  %v2297_v24 = vmul.f32 1.442695, %v2212_v61  ;;  %v1918_v58 = vadd.f32 %v5661_v35, %v5656_v59 }
 0x304   : > { %v1811_v25 = vmul.f32 1.442695, %v1729_v15  ;;  %v5668_v28 = vpop.eup %4303  ;;  %4323 = vpow2.f32 %v2293_v34  ;;  %v1813_v42 = vmul.f32 1.442695, %v1730_v12  ;;  %v1647_v31 = vpop.xlane.xlu1 %1646  ;;  %v6870_v15 = vld [vmem:[#allocation23_spill] sm:$0xff] }
 0x305   : > { %v2130_v13 = vpop.xlane.xlu0 %2129  ;;  %v5672_v47 = vpop.eup %4305  ;;  %4325 = vpow2.f32 %v2295_v23  ;;  %v1731_v3 = vsub.f32 %v5284_v50, %v1647_v31  ;;  %v1732_v8 = vsub.f32 %v5288_v49, %v1647_v31  ;;  %2402 = vadd.xlane.f32.xlu1 %v2401_v54  ;;  %1919 = vadd.xlane.f32.xlu0 %v1918_v58  ;;  %v1921_v52 = vadd.f32 %v5668_v28, %v5666_v36 }
 0x306   : > { %v2213_v14 = vsub.f32 %v5298_v57, %v2130_v13  ;;  %v5677_v4 = vpop.eup %4307  ;;  %4327 = vpow2.f32 %v2297_v24  ;;  %v2214_v16 = vsub.f32 %v5302_v30, %v2130_v13 }
 0x307   : > { %v5682_v5 = vpop.eup %4309  ;;  %4329 = vpow2.f32 %v1811_v25  ;;  %v1815_v55 = vmul.f32 1.442695, %v1731_v3  ;;  %v1817_v53 = vmul.f32 1.442695, %v1732_v8  ;;  %v2404_v57 = vadd.f32 %v5677_v4, %v5672_v47 }
 0x308   : > { %v2299_v50 = vmul.f32 1.442695, %v2213_v14  ;;  %v5684_v27 = vpop.eup %4311  ;;  %4331 = vpow2.f32 %v1813_v42  ;;  %v2301_v49 = vmul.f32 1.442695, %v2214_v16  ;;  %v2133_v29 = vpop.xlane.xlu1 %2132  ;;  %v6872_v14 = vld [vmem:[#allocation24_spill] sm:$0xff] }
 0x309   : > { %v1650_v26 = vpop.xlane.xlu0 %1649  ;;  %v5688_v34 = vpop.eup %4313  ;;  %4333 = vpow2.f32 %v1815_v55  ;;  %v2215_v30 = vsub.f32 %v5310_v46, %v2133_v29  ;;  %v2216_v39 = vsub.f32 %v6868_v6, %v2133_v29  ;;  %1922 = vadd.xlane.f32.xlu1 %v1921_v52  ;;  %2405 = vadd.xlane.f32.xlu0 %v2404_v57  ;;  %v2407_v54 = vadd.f32 %v5684_v27, %v5682_v5  ;;  %v6873_v52 = vld [vmem:[#allocation25_spill] sm:$0xff] }
 0x30a   : > { %v1733_v1 = vsub.f32 %v6869_v63, %v1650_v26  ;;  %v5693_v61 = vpop.eup %4315  ;;  %4335 = vpow2.f32 %v1817_v53  ;;  %v1734_v12 = vsub.f32 %v6870_v15, %v1650_v26  ;;  %v6874_v53 = vld [vmem:[#allocation28_spill] sm:$0xff] }
 0x30b   : > { %v5698_v23 = vpop.eup %4317  ;;  %4337 = vpow2.f32 %v2299_v50  ;;  %v2303_v24 = vmul.f32 1.442695, %v2215_v30  ;;  %v2305_v25 = vmul.f32 1.442695, %v2216_v39  ;;  %v1924_v31 = vadd.f32 %v5693_v61, %v5688_v34 }
 0x30c   : > { %6871 = vst [vmem:[#allocation26_spill] sm:$0xff] %v5698_v23  ;;  %v1819_v46 = vmul.f32 1.442695, %v1733_v1  ;;  %v5700_v42 = vpop.eup %4319  ;;  %4339 = vpow2.f32 %v2301_v49  ;;  %v1821_v58 = vmul.f32 1.442695, %v1734_v12  ;;  %v1653_v13 = vpop.xlane.xlu1 %1652  ;;  %v6875_v49 = vld [vmem:[#allocation30_spill] sm:$0xff] }
 0x30d   : > { %v2136_v3 = vpop.xlane.xlu0 %2135  ;;  %v5704_v8 = vpop.eup %4321  ;;  %4341 = vpow2.f32 %v2303_v24  ;;  %v1735_v16 = vsub.f32 %v6872_v14, %v1653_v13  ;;  %v1736_v55 = vsub.f32 %v6873_v52, %v1653_v13  ;;  %2408 = vadd.xlane.f32.xlu1 %v2407_v54  ;;  %1925 = vadd.xlane.f32.xlu0 %v1924_v31  ;;  %v1927_v26 = vadd.f32 %v5700_v42, %v5698_v23  ;;  %v6879_v31 = vld [vmem:[#allocation32_spill] sm:$0xff] }
 0x30e   : > { %v2217_v50 = vsub.f32 %v6874_v53, %v2136_v3  ;;  %v5709_v57 = vpop.eup %4323  ;;  %4343 = vpow2.f32 %v2305_v25  ;;  %v2218_v29 = vsub.f32 %v6875_v49, %v2136_v3  ;;  %v6880_v3 = vld [vmem:[#allocation34_spill] sm:$0xff] }
 0x30f   : > { %v5714_v30 = vpop.eup %4325  ;;  %4345 = vpow2.f32 %v1819_v46  ;;  %v1823_v6 = vmul.f32 1.442695, %v1735_v16  ;;  %v1825_v39 = vmul.f32 1.442695, %v1736_v55  ;;  %v2410_v12 = vadd.f32 %v5709_v57, %v5704_v8  ;;  %v6881_v46 = vld [vmem:[#allocation27_spill] sm:$0xff] }
 0x310   : > { %6876 = vst [vmem:[#allocation22_spill] sm:$0xff] %v5714_v30  ;;  %v2307_v63 = vmul.f32 1.442695, %v2217_v50  ;;  %v5716_v1 = vpop.eup %4327  ;;  %4347 = vpow2.f32 %v1821_v58  ;;  %v2309_v15 = vmul.f32 1.442695, %v2218_v29  ;;  %v2139_v54 = vpop.xlane.xlu1 %2138  ;;  %v6883_v58 = vld [vmem:[#allocation29_spill] sm:$0xff] }
 0x311   : > { %6877 = vst [vmem:[#allocation23_spill] sm:$0xff] %v5716_v1  ;;  %v1656_v24 = vpop.xlane.xlu0 %1655  ;;  %v5720_v25 = vpop.eup %4329  ;;  %4349 = vpow2.f32 %v1823_v6  ;;  %v2219_v13 = vsub.f32 %v6879_v31, %v2139_v54  ;;  %v2220_v14 = vsub.f32 %v6880_v3, %v2139_v54  ;;  %1928 = vadd.xlane.f32.xlu1 %v1927_v26  ;;  %2411 = vadd.xlane.f32.xlu0 %v2410_v12 }
 0x312   : > { %6878 = vst [vmem:[#allocation24_spill] sm:$0xff] %v5720_v25  ;;  %v1737_v16 = vsub.f32 %v6881_v46, %v1656_v24  ;;  %v5725_v52 = vpop.eup %4331  ;;  %4351 = vpow2.f32 %v1825_v39  ;;  %v1738_v55 = vsub.f32 %v6883_v58, %v1656_v24  ;;  %v2413_v53 = vadd.f32 %v5716_v1, %v5714_v30  ;;  %v6887_v24 = vld [vmem:[#allocation31_spill] sm:$0xff]  ;;  %v6888_v58 = vld [vmem:[#allocation33_spill] sm:$0xff] }
 0x313   : > { %6882 = vst [vmem:[#allocation25_spill] sm:$0xff] %v5725_v52  ;;  %v5730_v50 = vpop.eup %4333  ;;  %4353 = vpow2.f32 %v2307_v63  ;;  %v2311_v49 = vmul.f32 1.442695, %v2219_v13  ;;  %v2313_v29 = vmul.f32 1.442695, %v2220_v14  ;;  %v1930_v39 = vadd.f32 %v5725_v52, %v5720_v25  ;;  %v6889_v63 = vld [vmem:[#allocation36_spill] sm:$0xff] }
 0x314   : > { %6884 = vst [vmem:[#allocation28_spill] sm:$0xff] %v5730_v50  ;;  %v1827_v6 = vmul.f32 1.442695, %v1737_v16  ;;  %v5732_v31 = vpop.eup %4335  ;;  %4355 = vpow2.f32 %v2309_v15  ;;  %v1829_v54 = vmul.f32 1.442695, %v1738_v55  ;;  %v1659_v26 = vpop.xlane.xlu1 %1658  ;;  %v6891_v15 = vld [vmem:[#allocation38_spill] sm:$0xff] }
 0x315   : > { %6885 = vst [vmem:[#allocation30_spill] sm:$0xff] %v5732_v31  ;;  %v2142_v12 = vpop.xlane.xlu0 %2141  ;;  %v5736_v3 = vpop.eup %4337  ;;  %4357 = vpow2.f32 %v2311_v49  ;;  %v1739_v46 = vsub.f32 %v6887_v24, %v1659_v26  ;;  %v1740_v30 = vsub.f32 %v6888_v58, %v1659_v26  ;;  %2414 = vadd.xlane.f32.xlu1 %v2413_v53  ;;  %1931 = vadd.xlane.f32.xlu0 %v1930_v39 }
 0x316   : > { %6886 = vst [vmem:[#allocation32_spill] sm:$0xff] %v5736_v3  ;;  %v2221_v13 = vsub.f32 %v6889_v63, %v2142_v12  ;;  %v5741_v14 = vpop.eup %4339  ;;  %4359 = vpow2.f32 %v2313_v29  ;;  %v2222_v16 = vsub.f32 %v6891_v15, %v2142_v12  ;;  %v1933_v55 = vadd.f32 %v5732_v31, %v5730_v50  ;;  %v6895_v12 = vld [vmem:[#allocation40_spill] sm:$0xff]  ;;  %v6896_v15 = vld [vmem:[#allocation42_spill] sm:$0xff] }
 0x317   : > { %6890 = vst [vmem:[#allocation34_spill] sm:$0xff] %v5741_v14  ;;  %v5746_v1 = vpop.eup %4341  ;;  %4361 = vpow2.f32 %v1827_v6  ;;  %v1831_v49 = vmul.f32 1.442695, %v1739_v46  ;;  %v1833_v25 = vmul.f32 1.442695, %v1740_v30  ;;  %v2416_v29 = vadd.f32 %v5741_v14, %v5736_v3  ;;  %v6897_v6 = vld [vmem:[#allocation35_spill] sm:$0xff] }
 0x318   : > { %6892 = vst [vmem:[#allocation27_spill] sm:$0xff] %v5746_v1  ;;  %v2315_v24 = vmul.f32 1.442695, %v2221_v13  ;;  %v5748_v23 = vpop.eup %4343  ;;  %4363 = vpow2.f32 %v1829_v54  ;;  %v2317_v26 = vmul.f32 1.442695, %v2222_v16  ;;  %v2145_v53 = vpop.xlane.xlu1 %2144  ;;  %v6899_v54 = vld [vmem:[#allocation37_spill] sm:$0xff] }
 0x319   : > { %6893 = vst [vmem:[#allocation29_spill] sm:$0xff] %v5748_v23  ;;  %v1662_v39 = vpop.xlane.xlu0 %1661  ;;  %v5752_v58 = vpop.eup %4345  ;;  %4365 = vpow2.f32 %v1831_v49  ;;  %v2223_v63 = vsub.f32 %v6895_v12, %v2145_v53  ;;  %v2224_v50 = vsub.f32 %v6896_v15, %v2145_v53  ;;  %1934 = vadd.xlane.f32.xlu1 %v1933_v55  ;;  %2417 = vadd.xlane.f32.xlu0 %v2416_v29 }
 0x31a   : > { %6894 = vst [vmem:[#allocation31_spill] sm:$0xff] %v5752_v58  ;;  %v1741_v46 = vsub.f32 %v6897_v6, %v1662_v39  ;;  %v5757_v30 = vpop.eup %4347  ;;  %4367 = vpow2.f32 %v1833_v25  ;;  %v1742_v13 = vsub.f32 %v6899_v54, %v1662_v39  ;;  %v2419_v16 = vadd.f32 %v5748_v23, %v5746_v1  ;;  %v6903_v39 = vld [vmem:[#allocation39_spill] sm:$0xff]  ;;  %v6904_v54 = vld [vmem:[#allocation41_spill] sm:$0xff] }
 0x31b   : > { %6898 = vst [vmem:[#allocation33_spill] sm:$0xff] %v5757_v30  ;;  %v5762_v31 = vpop.eup %4349  ;;  %4369 = vpow2.f32 %v2315_v24  ;;  %v2319_v49 = vmul.f32 1.442695, %v2223_v63  ;;  %v2321_v3 = vmul.f32 1.442695, %v2224_v50  ;;  %v1936_v25 = vadd.f32 %v5757_v30, %v5752_v58  ;;  %v6905_v24 = vld [vmem:[#allocation43_spill] sm:$0xff] }
 0x31c   : > { %6900 = vst [vmem:[#allocation36_spill] sm:$0xff] %v5762_v31  ;;  %v1835_v12 = vmul.f32 1.442695, %v1741_v46  ;;  %v5764_v14 = vpop.eup %4351  ;;  %4371 = vpow2.f32 %v2317_v26  ;;  %v1837_v53 = vmul.f32 1.442695, %v1742_v13  ;;  %v1665_v55 = vpop.xlane.xlu1 %1664  ;;  %v6907_v26 = vld [vmem:[#allocation46_spill] sm:$0xff] }
 0x31d   : > { %6901 = vst [vmem:[#allocation38_spill] sm:$0xff] %v5764_v14  ;;  %v2148_v29 = vpop.xlane.xlu0 %2147  ;;  %v5768_v15 = vpop.eup %4353  ;;  %4373 = vpow2.f32 %v2319_v49  ;;  %v1743_v6 = vsub.f32 %v6903_v39, %v1665_v55  ;;  %v1744_v1 = vsub.f32 %v6904_v54, %v1665_v55  ;;  %2420 = vadd.xlane.f32.xlu1 %v2419_v16  ;;  %1937 = vadd.xlane.f32.xlu0 %v1936_v25 }
 0x31e   : > { %6902 = vst [vmem:[#allocation40_spill] sm:$0xff] %v5768_v15  ;;  %v2225_v63 = vsub.f32 %v6905_v24, %v2148_v29  ;;  %v5773_v50 = vpop.eup %4355  ;;  %4375 = vpow2.f32 %v2321_v3  ;;  %v2226_v46 = vsub.f32 %v6907_v26, %v2148_v29  ;;  %v1939_v13 = vadd.f32 %v5764_v14, %v5762_v31  ;;  %v6911_v29 = vld [vmem:[#allocation47_spill] sm:$0xff]  ;;  %v6912_v26 = vld [vmem:[#allocation50_spill] sm:$0xff] }
 0x31f   : > { %6906 = vst [vmem:[#allocation42_spill] sm:$0xff] %v5773_v50  ;;  %v5778_v23 = vpop.eup %4357  ;;  %4377 = vpow2.f32 %v1835_v12  ;;  %v1839_v49 = vmul.f32 1.442695, %v1743_v6  ;;  %v1841_v58 = vmul.f32 1.442695, %v1744_v1  ;;  %v2422_v3 = vadd.f32 %v5773_v50, %v5768_v15  ;;  %v6913_v12 = vld [vmem:[#allocation44_spill] sm:$0xff] }
 0x320   : > { %6908 = vst [vmem:[#allocation35_spill] sm:$0xff] %v5778_v23  ;;  %v2323_v39 = vmul.f32 1.442695, %v2225_v63  ;;  %v5780_v30 = vpop.eup %4359  ;;  %4379 = vpow2.f32 %v1837_v53  ;;  %v2325_v55 = vmul.f32 1.442695, %v2226_v46  ;;  %v2151_v16 = vpop.xlane.xlu1 %2150  ;;  %v6915_v53 = vld [vmem:[#allocation45_spill] sm:$0xff] }
 0x321   : > { %6909 = vst [vmem:[#allocation37_spill] sm:$0xff] %v5780_v30  ;;  %v1668_v25 = vpop.xlane.xlu0 %1667  ;;  %v5784_v54 = vpop.eup %4361  ;;  %4381 = vpow2.f32 %v1839_v49  ;;  %v2227_v24 = vsub.f32 %v6911_v29, %v2151_v16  ;;  %v2228_v31 = vsub.f32 %v6912_v26, %v2151_v16  ;;  %1940 = vadd.xlane.f32.xlu1 %v1939_v13  ;;  %2423 = vadd.xlane.f32.xlu0 %v2422_v3 }
 0x322   : > { %6910 = vst [vmem:[#allocation39_spill] sm:$0xff] %v5784_v54  ;;  %v1745_v6 = vsub.f32 %v6913_v12, %v1668_v25  ;;  %v5789_v1 = vpop.eup %4363  ;;  %4383 = vpow2.f32 %v1841_v58  ;;  %v1746_v63 = vsub.f32 %v6915_v53, %v1668_v25  ;;  %v2425_v46 = vadd.f32 %v5780_v30, %v5778_v23  ;;  %v6919_v25 = vld [vmem:[#allocation48_spill] sm:$0xff]  ;;  %v6920_v53 = vld [vmem:[#allocation49_spill] sm:$0xff] }
 0x323   : > { %6914 = vst [vmem:[#allocation41_spill] sm:$0xff] %v5789_v1  ;;  %v5794_v14 = vpop.eup %4365  ;;  %4385 = vpow2.f32 %v2323_v39  ;;  %v2327_v49 = vmul.f32 1.442695, %v2227_v24  ;;  %v2329_v15 = vmul.f32 1.442695, %v2228_v31  ;;  %v1942_v58 = vadd.f32 %v5789_v1, %v5784_v54  ;;  %v6921_v39 = vld [vmem:[#allocation51_spill] sm:$0xff] }
 0x324   : > { %6916 = vst [vmem:[#allocation43_spill] sm:$0xff] %v5794_v14  ;;  %v1843_v29 = vmul.f32 1.442695, %v1745_v6  ;;  %v5796_v50 = vpop.eup %4367  ;;  %4387 = vpow2.f32 %v2325_v55  ;;  %v1845_v16 = vmul.f32 1.442695, %v1746_v63  ;;  %v1671_v13 = vpop.xlane.xlu1 %1670  ;;  %v6923_v55 = vld [vmem:[#allocation54_spill] sm:$0xff] }
 0x325   : > { %6917 = vst [vmem:[#allocation46_spill] sm:$0xff] %v5796_v50  ;;  %v2154_v3 = vpop.xlane.xlu0 %2153  ;;  %v5800_v26 = vpop.eup %4369  ;;  %4389 = vpow2.f32 %v2327_v49  ;;  %v1747_v12 = vsub.f32 %v6919_v25, %v1671_v13  ;;  %v1748_v23 = vsub.f32 %v6920_v53, %v1671_v13  ;;  %2426 = vadd.xlane.f32.xlu1 %v2425_v46  ;;  %1943 = vadd.xlane.f32.xlu0 %v1942_v58 }
 0x326   : > { %6918 = vst [vmem:[#allocation47_spill] sm:$0xff] %v5800_v26  ;;  %v2229_v24 = vsub.f32 %v6921_v39, %v2154_v3  ;;  %v5805_v31 = vpop.eup %4371  ;;  %4391 = vpow2.f32 %v2329_v15  ;;  %v2230_v6 = vsub.f32 %v6923_v55, %v2154_v3  ;;  %v1945_v63 = vadd.f32 %v5796_v50, %v5794_v14  ;;  %v6927_v3 = vld [vmem:[#allocation55_spill] sm:$0xff]  ;;  %v6928_v55 = vld [vmem:[#allocation58_spill] sm:$0xff] }
 0x327   : > { %6922 = vst [vmem:[#allocation50_spill] sm:$0xff] %v5805_v31  ;;  %v5810_v30 = vpop.eup %4373  ;;  %4393 = vpow2.f32 %v1843_v29  ;;  %v1847_v49 = vmul.f32 1.442695, %v1747_v12  ;;  %v1849_v54 = vmul.f32 1.442695, %v1748_v23  ;;  %v2428_v15 = vadd.f32 %v5805_v31, %v5800_v26  ;;  %v6929_v29 = vld [vmem:[#allocation52_spill] sm:$0xff] }
 0x328   : > { %6924 = vst [vmem:[#allocation44_spill] sm:$0xff] %v5810_v30  ;;  %v2331_v25 = vmul.f32 1.442695, %v2229_v24  ;;  %v5812_v1 = vpop.eup %4375  ;;  %4395 = vpow2.f32 %v1845_v16  ;;  %v2333_v13 = vmul.f32 1.442695, %v2230_v6  ;;  %v2157_v46 = vpop.xlane.xlu1 %2156  ;;  %v6931_v16 = vld [vmem:[#allocation53_spill] sm:$0xff] }
 0x329   : > { %6925 = vst [vmem:[#allocation45_spill] sm:$0xff] %v5812_v1  ;;  %v1674_v58 = vpop.xlane.xlu0 %1673  ;;  %v5816_v53 = vpop.eup %4377  ;;  %4397 = vpow2.f32 %v1847_v49  ;;  %v2231_v39 = vsub.f32 %v6927_v3, %v2157_v46  ;;  %v2232_v14 = vsub.f32 %v6928_v55, %v2157_v46  ;;  %1946 = vadd.xlane.f32.xlu1 %v1945_v63  ;;  %2429 = vadd.xlane.f32.xlu0 %v2428_v15 }
 0x32a   : > { %6926 = vst [vmem:[#allocation48_spill] sm:$0xff] %v5816_v53  ;;  %v1749_v12 = vsub.f32 %v6929_v29, %v1674_v58  ;;  %v5821_v23 = vpop.eup %4379  ;;  %4399 = vpow2.f32 %v1849_v54  ;;  %v1750_v24 = vsub.f32 %v6931_v16, %v1674_v58  ;;  %v2431_v6 = vadd.f32 %v5812_v1, %v5810_v30  ;;  %v6935_v58 = vld [vmem:[#allocation56_spill] sm:$0xff]  ;;  %v6936_v16 = vld [vmem:[#allocation57_spill] sm:$0xff] }
 0x32b   : > { %6930 = vst [vmem:[#allocation49_spill] sm:$0xff] %v5821_v23  ;;  %v5826_v50 = vpop.eup %4381  ;;  %4401 = vpow2.f32 %v2331_v25  ;;  %v2335_v49 = vmul.f32 1.442695, %v2231_v39  ;;  %v2337_v26 = vmul.f32 1.442695, %v2232_v14  ;;  %v1948_v54 = vadd.f32 %v5821_v23, %v5816_v53  ;;  %v6937_v25 = vld [vmem:[#allocation59_spill] sm:$0xff] }
 0x32c   : > { %6932 = vst [vmem:[#allocation51_spill] sm:$0xff] %v5826_v50  ;;  %v1851_v3 = vmul.f32 1.442695, %v1749_v12  ;;  %v5828_v31 = vpop.eup %4383  ;;  %4403 = vpow2.f32 %v2333_v13  ;;  %v1853_v46 = vmul.f32 1.442695, %v1750_v24  ;;  %v1677_v63 = vpop.xlane.xlu1 %1676  ;;  %v6939_v13 = vld [vmem:[#allocation62_spill] sm:$0xff] }
 0x32d   : > { %6933 = vst [vmem:[#allocation54_spill] sm:$0xff] %v5828_v31  ;;  %v2160_v15 = vpop.xlane.xlu0 %2159  ;;  %v5832_v55 = vpop.eup %4385  ;;  %4405 = vpow2.f32 %v2335_v49  ;;  %v1751_v29 = vsub.f32 %v6935_v58, %v1677_v63  ;;  %v1752_v30 = vsub.f32 %v6936_v16, %v1677_v63  ;;  %2432 = vadd.xlane.f32.xlu1 %v2431_v6  ;;  %1949 = vadd.xlane.f32.xlu0 %v1948_v54 }
 0x32e   : > { %6934 = vst [vmem:[#allocation55_spill] sm:$0xff] %v5832_v55  ;;  %v2233_v39 = vsub.f32 %v6937_v25, %v2160_v15  ;;  %v5837_v14 = vpop.eup %4387  ;;  %4407 = vpow2.f32 %v2337_v26  ;;  %v2234_v12 = vsub.f32 %v6939_v13, %v2160_v15  ;;  %v1951_v24 = vadd.f32 %v5828_v31, %v5826_v50  ;;  %v6943_v15 = vld [vmem:[#allocation63_spill] sm:$0xff]  ;;  %v6944_v13 = vld [vmem:[#allocation66_spill] sm:$0xff] }
 0x32f   : > { %6938 = vst [vmem:[#allocation58_spill] sm:$0xff] %v5837_v14  ;;  %v5842_v1 = vpop.eup %4389  ;;  %4409 = vpow2.f32 %v1851_v3  ;;  %v1855_v49 = vmul.f32 1.442695, %v1751_v29  ;;  %v1857_v53 = vmul.f32 1.442695, %v1752_v30  ;;  %v2434_v26 = vadd.f32 %v5837_v14, %v5832_v55  ;;  %v6945_v3 = vld [vmem:[#allocation60_spill] sm:$0xff] }
 0x330   : > { %6940 = vst [vmem:[#allocation52_spill] sm:$0xff] %v5842_v1  ;;  %v2339_v58 = vmul.f32 1.442695, %v2233_v39  ;;  %v5844_v23 = vpop.eup %4391  ;;  %4411 = vpow2.f32 %v1853_v46  ;;  %v2341_v63 = vmul.f32 1.442695, %v2234_v12  ;;  %v2163_v6 = vpop.xlane.xlu1 %2162  ;;  %v6947_v46 = vld [vmem:[#allocation61_spill] sm:$0xff] }
 0x331   : > { %6941 = vst [vmem:[#allocation53_spill] sm:$0xff] %v5844_v23  ;;  %v1680_v54 = vpop.xlane.xlu0 %1679  ;;  %v5848_v16 = vpop.eup %4393  ;;  %4413 = vpow2.f32 %v1855_v49  ;;  %v2235_v25 = vsub.f32 %v6943_v15, %v2163_v6  ;;  %v2236_v50 = vsub.f32 %v6944_v13, %v2163_v6  ;;  %1952 = vadd.xlane.f32.xlu1 %v1951_v24  ;;  %2435 = vadd.xlane.f32.xlu0 %v2434_v26 }
 0x332   : > { %6942 = vst [vmem:[#allocation56_spill] sm:$0xff] %v5848_v16  ;;  %v1753_v29 = vsub.f32 %v6945_v3, %v1680_v54  ;;  %v5853_v30 = vpop.eup %4395  ;;  %4415 = vpow2.f32 %v1857_v53  ;;  %v1754_v39 = vsub.f32 %v6947_v46, %v1680_v54  ;;  %v2437_v12 = vadd.f32 %v5844_v23, %v5842_v1  ;;  %v6951_v54 = vld [vmem:[#allocation64_spill] sm:$0xff]  ;;  %v6952_v46 = vld [vmem:[#allocation65_spill] sm:$0xff] }
 0x333   : > { %6946 = vst [vmem:[#allocation57_spill] sm:$0xff] %v5853_v30  ;;  %v5858_v31 = vpop.eup %4397  ;;  %4417 = vpow2.f32 %v2339_v58  ;;  %v2343_v49 = vmul.f32 1.442695, %v2235_v25  ;;  %v2345_v55 = vmul.f32 1.442695, %v2236_v50  ;;  %v1954_v53 = vadd.f32 %v5853_v30, %v5848_v16  ;;  %v6953_v58 = vld [vmem:[#allocation67_spill] sm:$0xff] }
 0x334   : > { %6948 = vst [vmem:[#allocation59_spill] sm:$0xff] %v5858_v31  ;;  %v1859_v15 = vmul.f32 1.442695, %v1753_v29  ;;  %v5860_v14 = vpop.eup %4399  ;;  %4419 = vpow2.f32 %v2341_v63  ;;  %v1861_v6 = vmul.f32 1.442695, %v1754_v39  ;;  %v1683_v24 = vpop.xlane.xlu1 %1682  ;;  %v6955_v63 = vld [vmem:[#allocation70_spill] sm:$0xff] }
 0x335   : > { %6949 = vst [vmem:[#allocation62_spill] sm:$0xff] %v5860_v14  ;;  %v2166_v26 = vpop.xlane.xlu0 %2165  ;;  %v5864_v13 = vpop.eup %4401  ;;  %4421 = vpow2.f32 %v2343_v49  ;;  %v1755_v3 = vsub.f32 %v6951_v54, %v1683_v24  ;;  %v1756_v1 = vsub.f32 %v6952_v46, %v1683_v24  ;;  %2438 = vadd.xlane.f32.xlu1 %v2437_v12  ;;  %1955 = vadd.xlane.f32.xlu0 %v1954_v53 }
 0x336   : > { %6950 = vst [vmem:[#allocation63_spill] sm:$0xff] %v5864_v13  ;;  %v2237_v25 = vsub.f32 %v6953_v58, %v2166_v26  ;;  %v5869_v50 = vpop.eup %4403  ;;  %4423 = vpow2.f32 %v2345_v55  ;;  %v2238_v29 = vsub.f32 %v6955_v63, %v2166_v26  ;;  %v1957_v39 = vadd.f32 %v5860_v14, %v5858_v31  ;;  %v6959_v26 = vld [vmem:[#allocation71_spill] sm:$0xff]  ;;  %v6960_v63 = vld [vmem:[#allocation74_spill] sm:$0xff] }
 0x337   : > { %6954 = vst [vmem:[#allocation66_spill] sm:$0xff] %v5869_v50  ;;  %v5874_v23 = vpop.eup %4405  ;;  %4425 = vpow2.f32 %v1859_v15  ;;  %v1863_v49 = vmul.f32 1.442695, %v1755_v3  ;;  %v1865_v16 = vmul.f32 1.442695, %v1756_v1  ;;  %v2440_v55 = vadd.f32 %v5869_v50, %v5864_v13  ;;  %v6961_v15 = vld [vmem:[#allocation68_spill] sm:$0xff] }
 0x338   : > { %6956 = vst [vmem:[#allocation60_spill] sm:$0xff] %v5874_v23  ;;  %v2347_v54 = vmul.f32 1.442695, %v2237_v25  ;;  %v5876_v30 = vpop.eup %4407  ;;  %4427 = vpow2.f32 %v1861_v6  ;;  %v2349_v24 = vmul.f32 1.442695, %v2238_v29  ;;  %v2169_v12 = vpop.xlane.xlu1 %2168  ;;  %v6963_v6 = vld [vmem:[#allocation69_spill] sm:$0xff] }
 0x339   : > { %6957 = vst [vmem:[#allocation61_spill] sm:$0xff] %v5876_v30  ;;  %v1686_v53 = vpop.xlane.xlu0 %1685  ;;  %v5880_v46 = vpop.eup %4409  ;;  %4429 = vpow2.f32 %v1863_v49  ;;  %v2239_v58 = vsub.f32 %v6959_v26, %v2169_v12  ;;  %v2240_v31 = vsub.f32 %v6960_v63, %v2169_v12  ;;  %1958 = vadd.xlane.f32.xlu1 %v1957_v39  ;;  %2441 = vadd.xlane.f32.xlu0 %v2440_v55 }
 0x33a   : > { %6958 = vst [vmem:[#allocation64_spill] sm:$0xff] %v5880_v46  ;;  %v1757_v3 = vsub.f32 %v6961_v15, %v1686_v53  ;;  %v5885_v1 = vpop.eup %4411  ;;  %4431 = vpow2.f32 %v1865_v16  ;;  %v1758_v25 = vsub.f32 %v6963_v6, %v1686_v53  ;;  %v2443_v29 = vadd.f32 %v5876_v30, %v5874_v23  ;;  %v6967_v53 = vld [vmem:[#allocation72_spill] sm:$0xff]  ;;  %v6968_v6 = vld [vmem:[#allocation73_spill] sm:$0xff] }
 0x33b   : > { %6962 = vst [vmem:[#allocation65_spill] sm:$0xff] %v5885_v1  ;;  %v5890_v14 = vpop.eup %4413  ;;  %4433 = vpow2.f32 %v2347_v54  ;;  %v2351_v49 = vmul.f32 1.442695, %v2239_v58  ;;  %v2353_v13 = vmul.f32 1.442695, %v2240_v31  ;;  %v1960_v16 = vadd.f32 %v5885_v1, %v5880_v46  ;;  %v6969_v54 = vld [vmem:[#allocation75_spill] sm:$0xff] }
 0x33c   : > { %6964 = vst [vmem:[#allocation67_spill] sm:$0xff] %v5890_v14  ;;  %v1867_v26 = vmul.f32 1.442695, %v1757_v3  ;;  %v5892_v50 = vpop.eup %4415  ;;  %4435 = vpow2.f32 %v2349_v24  ;;  %v1869_v12 = vmul.f32 1.442695, %v1758_v25  ;;  %v1689_v39 = vpop.xlane.xlu1 %1688  ;;  %v6971_v24 = vld [vmem:[#allocation78_spill] sm:$0xff] }
 0x33d   : > { %6965 = vst [vmem:[#allocation70_spill] sm:$0xff] %v5892_v50  ;;  %v2172_v55 = vpop.xlane.xlu0 %2171  ;;  %v5896_v63 = vpop.eup %4417  ;;  %4437 = vpow2.f32 %v2351_v49  ;;  %v1759_v15 = vsub.f32 %v6967_v53, %v1689_v39  ;;  %v1760_v23 = vsub.f32 %v6968_v6, %v1689_v39  ;;  %2444 = vadd.xlane.f32.xlu1 %v2443_v29  ;;  %1961 = vadd.xlane.f32.xlu0 %v1960_v16 }
 0x33e   : > { %6966 = vst [vmem:[#allocation71_spill] sm:$0xff] %v5896_v63  ;;  %v2241_v58 = vsub.f32 %v6969_v54, %v2172_v55  ;;  %v5901_v31 = vpop.eup %4419  ;;  %4439 = vpow2.f32 %v2353_v13  ;;  %v2242_v3 = vsub.f32 %v6971_v24, %v2172_v55  ;;  %v1963_v25 = vadd.f32 %v5892_v50, %v5890_v14  ;;  %v6975_v55 = vld [vmem:[#allocation79_spill] sm:$0xff]  ;;  %v6976_v24 = vld [vmem:[#allocation82_spill] sm:$0xff] }
 0x33f   : > { %6970 = vst [vmem:[#allocation74_spill] sm:$0xff] %v5901_v31  ;;  %v5906_v30 = vpop.eup %4421  ;;  %4441 = vpow2.f32 %v1867_v26  ;;  %v1871_v49 = vmul.f32 1.442695, %v1759_v15  ;;  %v1873_v46 = vmul.f32 1.442695, %v1760_v23  ;;  %v2446_v13 = vadd.f32 %v5901_v31, %v5896_v63  ;;  %v6977_v26 = vld [vmem:[#allocation76_spill] sm:$0xff] }
 0x340   : > { %6972 = vst [vmem:[#allocation68_spill] sm:$0xff] %v5906_v30  ;;  %v2355_v53 = vmul.f32 1.442695, %v2241_v58  ;;  %v5908_v1 = vpop.eup %4423  ;;  %4443 = vpow2.f32 %v1869_v12  ;;  %v2357_v39 = vmul.f32 1.442695, %v2242_v3  ;;  %v2175_v29 = vpop.xlane.xlu1 %2174  ;;  %v6979_v12 = vld [vmem:[#allocation77_spill] sm:$0xff] }
 0x341   : > { %6973 = vst [vmem:[#allocation69_spill] sm:$0xff] %v5908_v1  ;;  %v1692_v16 = vpop.xlane.xlu0 %1691  ;;  %v5912_v6 = vpop.eup %4425  ;;  %4445 = vpow2.f32 %v1871_v49  ;;  %v2243_v54 = vsub.f32 %v6975_v55, %v2175_v29  ;;  %v2244_v14 = vsub.f32 %v6976_v24, %v2175_v29  ;;  %1964 = vadd.xlane.f32.xlu1 %v1963_v25  ;;  %2447 = vadd.xlane.f32.xlu0 %v2446_v13 }
 0x342   : > { %6974 = vst [vmem:[#allocation72_spill] sm:$0xff] %v5912_v6  ;;  %v1761_v15 = vsub.f32 %v6977_v26, %v1692_v16  ;;  %v5917_v23 = vpop.eup %4427  ;;  %4447 = vpow2.f32 %v1873_v46  ;;  %v1762_v58 = vsub.f32 %v6979_v12, %v1692_v16  ;;  %v2449_v3 = vadd.f32 %v5908_v1, %v5906_v30  ;;  %v6983_v16 = vld [vmem:[#allocation80_spill] sm:$0xff]  ;;  %v6984_v12 = vld [vmem:[#allocation81_spill] sm:$0xff] }
 0x343   : > { %6978 = vst [vmem:[#allocation73_spill] sm:$0xff] %v5917_v23  ;;  %v5922_v50 = vpop.eup %4429  ;;  %4449 = vpow2.f32 %v2355_v53  ;;  %v2359_v49 = vmul.f32 1.442695, %v2243_v54  ;;  %v2361_v63 = vmul.f32 1.442695, %v2244_v14  ;;  %v1966_v46 = vadd.f32 %v5917_v23, %v5912_v6  ;;  %v6985_v53 = vld [vmem:[#allocation83_spill] sm:$0xff] }
 0x344   : > { %6980 = vst [vmem:[#allocation75_spill] sm:$0xff] %v5922_v50  ;;  %v1875_v55 = vmul.f32 1.442695, %v1761_v15  ;;  %v5924_v31 = vpop.eup %4431  ;;  %4451 = vpow2.f32 %v2357_v39  ;;  %v1877_v29 = vmul.f32 1.442695, %v1762_v58  ;;  %v1695_v25 = vpop.xlane.xlu1 %1694 }
 0x345   : > { %6981 = vst [vmem:[#allocation78_spill] sm:$0xff] %v5924_v31  ;;  %v2178_v13 = vpop.xlane.xlu0 %2177  ;;  %v5928_v24 = vpop.eup %4433  ;;  %4453 = vpow2.f32 %v2359_v49  ;;  %v1763_v26 = vsub.f32 %v6983_v16, %v1695_v25  ;;  %v1764_v30 = vsub.f32 %v6984_v12, %v1695_v25  ;;  %2450 = vadd.xlane.f32.xlu1 %v2449_v3  ;;  %1967 = vadd.xlane.f32.xlu0 %v1966_v46  ;;  %v6988_v49 = vld [vmem:[#allocation86_spill] sm:$0xff] }
 0x346   : > { %6982 = vst [vmem:[#allocation79_spill] sm:$0xff] %v5928_v24  ;;  %v2245_v54 = vsub.f32 %v6985_v53, %v2178_v13  ;;  %v5933_v14 = vpop.eup %4435  ;;  %4455 = vpow2.f32 %v2361_v63  ;;  %v1969_v39 = vadd.f32 %v5924_v31, %v5922_v50  ;;  %v2246_v6 = vsub.f32 %v6988_v49, %v2178_v13  ;;  %v6991_v53 = vld [vmem:[#allocation87_spill] sm:$0xff]  ;;  %v6992_v31 = vld [vmem:[#allocation90_spill] sm:$0xff] }
 0x347   : > { %6986 = vst [vmem:[#allocation82_spill] sm:$0xff] %v5933_v14  ;;  %v5937_v15 = vpop.eup %4437  ;;  %4457 = vpow2.f32 %v1875_v55  ;;  %v1879_v58 = vmul.f32 1.442695, %v1763_v26  ;;  %v1881_v1 = vmul.f32 1.442695, %v1764_v30  ;;  %v2452_v12 = vadd.f32 %v5933_v14, %v5928_v24  ;;  %v6993_v26 = vld [vmem:[#allocation84_spill] sm:$0xff] }
 0x348   : > { %6987 = vst [vmem:[#allocation76_spill] sm:$0xff] %v5937_v15  ;;  %v5940_v16 = vpop.eup %4439  ;;  %4459 = vpow2.f32 %v1877_v29  ;;  %v2363_v25 = vmul.f32 1.442695, %v2245_v54  ;;  %v2181_v63 = vpop.xlane.xlu1 %2180  ;;  %v6995_v29 = vld [vmem:[#allocation85_spill] sm:$0xff]  ;;  %v2365_v24 = vmul.f32 1.442695, %v2246_v6 }
 0x349   : > { %6989 = vst [vmem:[#allocation77_spill] sm:$0xff] %v5940_v16  ;;  %v1698_v3 = vpop.xlane.xlu0 %1697  ;;  %v5944_v46 = vpop.eup %4441  ;;  %4461 = vpow2.f32 %v1879_v58  ;;  %v2247_v50 = vsub.f32 %v6991_v53, %v2181_v63  ;;  %v2248_v55 = vsub.f32 %v6992_v31, %v2181_v63  ;;  %1970 = vadd.xlane.f32.xlu1 %v1969_v39  ;;  %2453 = vadd.xlane.f32.xlu0 %v2452_v12 }
 0x34a   : > { %6990 = vst [vmem:[#allocation80_spill] sm:$0xff] %v5944_v46  ;;  %v1765_v30 = vsub.f32 %v6993_v26, %v1698_v3  ;;  %v5949_v23 = vpop.eup %4443  ;;  %4463 = vpow2.f32 %v1881_v1  ;;  %v1766_v13 = vsub.f32 %v6995_v29, %v1698_v3  ;;  %v2455_v54 = vadd.f32 %v5940_v16, %v5937_v15  ;;  %v6999_v3 = vld [vmem:[#allocation88_spill] sm:$0xff]  ;;  %v7000_v29 = vld [vmem:[#allocation91_spill] sm:$0xff] }
 0x34b   : > { %6994 = vst [vmem:[#allocation81_spill] sm:$0xff] %v5949_v23  ;;  %v5954_v49 = vpop.eup %4445  ;;  %v2367_v58 = vmul.f32 1.442695, %v2247_v50  ;;  %v2369_v14 = vmul.f32 1.442695, %v2248_v55  ;;  %4465 = vpow2.f32 %v2363_v25  ;;  %v1972_v31 = vadd.f32 %v5949_v23, %v5944_v46  ;;  %v7002_v46 = vld [vmem:[#allocation94_spill] sm:$0xff] }
 0x34c   : > { %6996 = vst [vmem:[#allocation83_spill] sm:$0xff] %v5954_v49  ;;  %v5956_v53 = vpop.eup %4447  ;;  %v1701_v63 = vpop.xlane.xlu1 %1700  ;;  %v1883_v12 = vmul.f32 1.442695, %v1765_v30  ;;  %v1885_v50 = vmul.f32 1.442695, %v1766_v13 }
 0x34d   : > { %6997 = vst [vmem:[#allocation86_spill] sm:$0xff] %v5956_v53  ;;  %v2184_v1 = vpop.xlane.xlu0 %2183  ;;  %v5960_v39 = vpop.eup %4449  ;;  %4467 = vpow2.f32 %v2367_v58  ;;  %v1767_v26 = vsub.f32 %v6999_v3, %v1701_v63  ;;  %2456 = vadd.xlane.f32.xlu1 %v2455_v54  ;;  %1973 = vadd.xlane.f32.xlu0 %v1972_v31  ;;  %v1975_v6 = vadd.f32 %v5956_v53, %v5954_v49  ;;  %v7004_v3 = vld [vmem:[#allocation89_spill] sm:$0xff]  ;;  %v7005_v49 = vld [vmem:[#allocation95_spill] sm:$0xff] }
 0x34e   : > { %6998 = vst [vmem:[#allocation87_spill] sm:$0xff] %v5960_v39  ;;  %v2249_v15 = vsub.f32 %v7000_v29, %v2184_v1  ;;  %v5964_v16 = vpop.eup %4451  ;;  %4469 = vpow2.f32 %v2369_v14  ;;  %v2250_v58 = vsub.f32 %v7002_v46, %v2184_v1  ;;  %v1768_v23 = vsub.f32 %v7004_v3, %v1701_v63 }
 0x34f   : > { %v5968_v25 = vpop.eup %4453  ;;  %4471 = vpow2.f32 %v2365_v24  ;;  %v1887_v55 = vmul.f32 1.442695, %v1767_v26  ;;  %v2458_v14 = vadd.f32 %v5964_v16, %v5960_v39  ;;  %v7006_v24 = vld [vmem:[#allocation98_spill] sm:$0xff] }
 0x350   : > { %7001 = vst [vmem:[#allocation90_spill] sm:$0xff] %v5968_v25  ;;  %v5971_v30 = vpop.eup %4455  ;;  %v2371_v29 = vmul.f32 1.442695, %v2249_v15  ;;  %v2187_v13 = vpop.xlane.xlu1 %2186  ;;  %4473 = vpow2.f32 %v1883_v12  ;;  %v2373_v63 = vmul.f32 1.442695, %v2250_v58 }
 0x351   : > { %7003 = vst [vmem:[#allocation84_spill] sm:$0xff] %v5971_v30  ;;  %v5976_v54 = vpop.xlane.xlu0 %1703  ;;  %v5978_v31 = vpop.eup %4457  ;;  %v2251_v53 = vsub.f32 %v7005_v49, %v2187_v13  ;;  %v2252_v26 = vsub.f32 %v7006_v24, %v2187_v13  ;;  %4475 = vpow2.f32 %v1885_v50  ;;  %1976 = vadd.xlane.f32.xlu1 %v1975_v6  ;;  %2459 = vadd.xlane.f32.xlu0 %v2458_v14  ;;  %v1889_v12 = vmul.f32 1.442695, %v1768_v23 }
 0x352   : > { %v5982_v52 = vpop.eup %4459  ;;  %v2461_v15 = vadd.f32 %v5971_v30, %v5968_v25  ;;  %4477 = vpow2.f32 %v1887_v55  ;;  %v7027_v30 = vld [vmem:[#allocation99_spill] sm:$0xff] }
 0x353   : > { %v5986_v46 = vpop.eup %4461  ;;  %v2375_v1 = vmul.f32 1.442695, %v2251_v53  ;;  %v2377_v3 = vmul.f32 1.442695, %v2252_v26  ;;  %4479 = vpow2.f32 %v2371_v29  ;;  %v1978_v49 = vadd.f32 %v5982_v52, %v5978_v31 }
 0x354   : > { %7007 = vst [vmem:[#allocation85_spill] sm:$0xff] %v5986_v46  ;;  %v5988_v39 = vpop.eup %4463 }
 0x355   : > { %7008 = vst [vmem:[#allocation88_spill] sm:$0xff] %v5988_v39  ;;  %v2190_v13 = vpop.xlane.xlu0 %2189  ;;  %4481 = vpow2.f32 %v2375_v1  ;;  %v5993_v6 = vpop.eup %4465  ;;  %2462 = vadd.xlane.f32.xlu1 %v2461_v15  ;;  %1979 = vadd.xlane.f32.xlu0 %v1978_v49  ;;  %v1981_v53 = vadd.f32 %v5988_v39, %v5986_v46 }
 0x356   : > { %v2253_v50 = vsub.f32 %v5536_v17, %v2190_v13  ;;  %7009 = vst [vmem:[#allocation91_spill] sm:$0xff] %v5993_v6  ;;  %4483 = vpow2.f32 %v2377_v3  ;;  %v2254_v55 = vsub.f32 %v5542_v51, %v2190_v13 }
 0x357   : > { %v5998_v58 = vpop.eup %4467  ;;  %4485 = vpow2.f32 %v2373_v63 }
 0x358   : > { %7010 = vst [vmem:[#allocation94_spill] sm:$0xff] %v5998_v58  ;;  %v2379_v23 = vmul.f32 1.442695, %v2253_v50  ;;  %v6000_v29 = vpop.eup %4469  ;;  %4487 = vpow2.f32 %v1889_v12  ;;  %v2381_v14 = vmul.f32 1.442695, %v2254_v55 }
 0x359   : > { %7011 = vst [vmem:[#allocation89_spill] sm:$0xff] %v6000_v29  ;;  %v6002_v24 = vpop.eup %4471  ;;  %v2467_v17 = vadd.f32 %v6000_v29, %v5998_v58  ;;  %1982 = vadd.xlane.f32.xlu0 %v1981_v53 }
 0x35a   : > { %7012 = vst [vmem:[#allocation95_spill] sm:$0xff] %v6002_v24  ;;  %v6006_v26 = vpop.eup %4473  ;;  %4489 = vpow2.f32 %v2379_v23  ;;  %v2464_v15 = vadd.f32 %v6002_v24, %v5993_v6 }
 0x35b   : > { %7013 = vst [vmem:[#allocation98_spill] sm:$0xff] %v6006_v26  ;;  %2468 = vadd.xlane.f32.xlu1 %v2467_v17  ;;  %v6008_v51 = vpop.eup %4475  ;;  %4491 = vpow2.f32 %v2381_v14 }
 0x35c   : > { %7014 = vst [vmem:[#allocation101_spill] sm:$0xff] %v6008_v51  ;;  %v6012_v63 = vpop.eup %4477  ;;  %v1984_v49 = vadd.f32 %v6008_v51, %v6006_v26 }
 0x35d   : > { %7015 = vst [vmem:[#allocation102_spill] sm:$0xff] %v6012_v63  ;;  %v6014_v1 = vpop.eup %4479  ;;  %2465 = vadd.xlane.f32.xlu0 %v2464_v15 }
 0x35e   : > { %7016 = vst [vmem:[#allocation103_spill] sm:$0xff] %v6014_v1 }
 0x35f   : > { %v6016_v3 = vpop.eup %4481 }
 0x360   : > { %7017 = vst [vmem:[#allocation104_spill] sm:$0xff] %v6016_v3  ;;  %v6018_v12 = vpop.eup %4483 }
 0x361   : > { %7018 = vst [vmem:[#allocation105_spill] sm:$0xff] %v6018_v12  ;;  %v6022_v13 = vpop.eup %4485  ;;  %v2473_v50 = vadd.f32 %v6018_v12, %v6016_v3  ;;  %1985 = vadd.xlane.f32.xlu0 %v1984_v49  ;;  %v762_v49 = vld [vmem:[%s6592_s5 + $0x30] sm:$0xff]  ;;  %v6041_v3 = vpop.xlane.xlu0 %1709 }
 0x362   : > { %7019 = vst [vmem:[#allocation106_spill] sm:$0xff] %v6022_v13  ;;  %v6026_v55 = vpop.eup %4487  ;;  %v2470_v53 = vadd.f32 %v6022_v13, %v6014_v1 }
 0x363   : > { %7020 = vst [vmem:[#allocation107_spill] sm:$0xff] %v6026_v55  ;;  %2474 = vadd.xlane.f32.xlu1 %v2473_v50  ;;  %v1987_v14 = vadd.f32 %v6026_v55, %v6012_v63  ;;  %v1707_v50 = vpop.xlane.xlu1 %1706  ;;  %v763_v63 = vld [vmem:[%s6592_s5 + $0x38] sm:$0xff] }
 0x364   : > { %v6030_v23 = vpop.eup %4489 }
 0x365   : > { %7021 = vst [vmem:[#allocation108_spill] sm:$0xff] %v6030_v23  ;;  %v6034_v17 = vpop.eup %4491  ;;  %2471 = vadd.xlane.f32.xlu0 %v2470_v53 }
 0x366   : > { %7022 = vst [vmem:[#allocation109_spill] sm:$0xff] %v6034_v17  ;;  %v2476_v15 = vadd.f32 %v6034_v17, %v6030_v23  ;;  %v7023_v17 = vld [vmem:[#allocation92_spill] sm:$0xff] }
 0x367   : > { %1988 = vadd.xlane.f32.xlu1 %v1987_v14  ;;  %v761_v14 = vld [vmem:[%s6592_s5 + $0x28] sm:$0xff]  ;;  %v1769_v12 = vsub.f32 %v7023_v17, %v5976_v54  ;;  %v3043_v17 = vld [vmem:[%s6595_s8] sm:$0xff] }
 0x369   : > { %2477 = vadd.xlane.f32.xlu0 %v2476_v15  ;;  %v511_v15 = vld [vmem:[%s6590_s3 + $0x48] sm:$0xff]  ;;  %v1891_v29 = vmul.f32 1.442695, %v1769_v12 }
 0x378   : > { %796 = vperm.xlu1 %4248, %v762_v49  }
 0x37a   : > { %v2385_v55 = vpop.xlane.xlu1 %2384 }
 0x37b   : > { %4493 = vrcp.f32 %v2385_v55  ;;  %v512_v55 = vld [vmem:[%s6590_s3 + $0x50] sm:$0xff] }
 0x37c   : > { %801 = vperm.xlu1 %4248, %v763_v63   ;;  %v2388_v53 = vpop.xlane.xlu0 %2387 }
 0x37d   : > { %4495 = vrcp.f32 %v2388_v53  ;;  %v513_v53 = vld [vmem:[%s6590_s3 + $0x58] sm:$0xff] }
 0x37e   : > { %v1905_v23 = vpop.xlane.xlu1 %1904 }
 0x37f   : > { %4497 = vrcp.f32 %v1905_v23  ;;  %791 = vperm.xlu0 %4247, %v761_v14   ;;  %v7024_v14 = vld [vmem:[#allocation93_spill] sm:$0xff] }
 0x380   : > { %561 = vperm.xlu1 %4248, %v511_v15   ;;  %v1908_v49 = vpop.xlane.xlu0 %1907  ;;  %v1770_v15 = vsub.f32 %v7024_v14, %v5976_v54  ;;  %v7026_v54 = vld [vmem:[#allocation97_spill] sm:$0xff] }
 0x381   : > { %4499 = vrcp.f32 %v1908_v49  ;;  %v7025_v49 = vld [vmem:[#allocation96_spill] sm:$0xff]  ;;  %v1772_v14 = vsub.f32 %v7026_v54, %v1707_v50 }
 0x382   : > { %v2391_v63 = vpop.xlane.xlu1 %2390  ;;  %v1771_v26 = vsub.f32 %v7025_v49, %v1707_v50  ;;  %v1893_v39 = vmul.f32 1.442695, %v1770_v15 }
 0x383   : > { %4501 = vrcp.f32 %v2391_v63 }
 0x384   : > { %566 = vperm.xlu1 %4248, %v512_v55   ;;  %v2394_v1 = vpop.xlane.xlu0 %2393  ;;  %v1895_v24 = vmul.f32 1.442695, %v1771_v26  ;;  %v1897_v26 = vmul.f32 1.442695, %v1772_v14 }
 0x385   : > { %v4494_v23 = vpop.eup %4493  ;;  %4503 = vrcp.f32 %v2394_v1 }
 0x386   : > { %v1911_v58 = vpop.xlane.xlu1 %1910  ;;  %v2512_v55 = vmul.f32 %v4494_v23, %v5571_v7  ;;  %v2511_v1 = vmul.f32 %v4494_v23, %v5566_v44  ;;  %v1773_v7 = vsub.f32 %v7027_v30, %v6041_v3  ;;  %v3044_v44 = vld [vmem:[%s6595_s8 + $0x8] sm:$0xff]  ;;  %v7028_v30 = vld [vmem:[#allocation100_spill] sm:$0xff] }
 0x387   : > { %v4496_v13 = vpop.eup %4495  ;;  %4505 = vrcp.f32 %v1911_v58 }
 0x388   : > { %571 = vperm.xlu1 %4248, %v513_v53   ;;  %v2514_v63 = vmul.f32 %v4496_v13, %v5578_v33  ;;  %v2513_v51 = vmul.f32 %v4496_v13, %v5574_v10  ;;  %4507 = vpow2.f32 %v1891_v29 }
 0x389   : > { %v4498_v46 = vpop.eup %4497 }
 0x38a   : > { %v2397_v12 = vpop.xlane.xlu1 %2396  ;;  %v1914_v49 = vpop.xlane.xlu0 %1913  ;;  %v4089_v53 = vpack.c.bf16 %v2514_v63, %v2512_v55  ;;  %v4091_v6 = vpack.c.bf16 %v2513_v51, %v2511_v1  ;;  %v2032_v33 = vmul.f32 %v4498_v46, %v5564_v19  ;;  %v2031_v58 = vmul.f32 %v4498_v46, %v5562_v2 }
 0x38b   : > { %v4500_v25 = vpop.eup %4499  ;;  %4509 = vrcp.f32 %v1914_v49  ;;  %v1774_v19 = vsub.f32 %v7028_v30, %v6041_v3  ;;  %v1899_v55 = vmul.f32 1.442695, %v1773_v7 }
 0x38c   : > { %3053 = vperm.xlu1 %4248, %v3043_v17   ;;  %4090 = vmatprep.subr.bf16.mxu0 %v4089_v53  ;;  %v2034_v10 = vmul.f32 %v4500_v25, %v5585_v62  ;;  %v2033_v51 = vmul.f32 %v4500_v25, %v5580_v18  ;;  %4511 = vrcp.f32 %v2397_v12  ;;  %v3046_v18 = vld [vmem:[%s6595_s8 + $0x18] sm:$0xff] }
 0x38d   : > { %v4502_v29 = vpop.eup %4501  ;;  %4092 = vmatpush1.bf16.msra.mxu0 %v4091_v6  ;;  %4513 = vpow2.f32 %v1893_v39  ;;  %v1901_v46 = vmul.f32 1.442695, %v1774_v19 }
 0x38e   : > { %v1917_v13 = vpop.xlane.xlu1 %1916  ;;  %v2400_v50 = vpop.xlane.xlu0 %2399  ;;  %v4025_v23 = vpack.c.bf16 %v2034_v10, %v2032_v33  ;;  %v4027_v15 = vpack.c.bf16 %v2033_v51, %v2031_v58  ;;  %4515 = vpow2.f32 %v1895_v24  ;;  %v2516_v2 = vmul.f32 %v4502_v29, %v5601_v41 }
 0x38f   : > { %v4504_v17 = vpop.eup %4503  ;;  %4517 = vrcp.f32 %v2400_v50  ;;  %v2515_v39 = vmul.f32 %v4502_v29, %v5596_v56 }
 0x390   : > { %3058 = vperm.xlu1 %4248, %v3044_v44   ;;  %4026 = vmatprep.subr.bf16.mxu1 %v4025_v23  ;;  %v2518_v62 = vmul.f32 %v4504_v17, %v5608_v11  ;;  %v2517_v25 = vmul.f32 %v4504_v17, %v5606_v9  ;;  %4519 = vrcp.f32 %v1917_v13  ;;  %v3048_v11 = vld [vmem:[%s6595_s8 + $0x28] sm:$0xff]  ;;  %v3050_v44 = vld [vmem:[%s6595_s8 + $0x38] sm:$0xff] }
 0x391   : > { %4028 = vmatpush1.bf16.msra.mxu1 %v4027_v15  ;;  %4521 = vpow2.f32 %v1897_v26  ;;  %v4506_v63 = vpop.eup %4505 }
 0x392   : > { %v2403_v6 = vpop.xlane.xlu1 %2402  ;;  %v1920_v24 = vpop.xlane.xlu0 %1919  ;;  %v4093_v3 = vpack.c.bf16 %v2518_v62, %v2516_v2  ;;  %v4095_v41 = vpack.c.bf16 %v2517_v25, %v2515_v39  ;;  %4523 = vpow2.f32 %v1899_v55  ;;  %v2036_v12 = vmul.f32 %v4506_v63, %v5594_v40 }
 0x393   : > { %4525 = vrcp.f32 %v1920_v24  ;;  %v6092_v56 = vpop.eup %4507  ;;  %v2035_v53 = vmul.f32 %v4506_v63, %v5592_v0 }
 0x394   : > { %3068 = vperm.xlu1 %4248, %v3046_v18   ;;  %4094 = vmatprep.subr.bf16.mxu0 %v4093_v3  ;;  %4527 = vrcp.f32 %v2403_v6 }
 0x395   : > { %4096 = vmatpush1.bf16.msra.mxu0 %v4095_v41  ;;  %v4510_v9 = vpop.eup %4509  ;;  %4529 = vpow2.f32 %v1901_v46 }
 0x396   : > { %v1923_v1 = vpop.xlane.xlu1 %1922  ;;  %v2406_v54 = vpop.xlane.xlu0 %2405  ;;  %v2038_v49 = vmul.f32 %v4510_v9, %v5629_v22  ;;  %v2037_v7 = vmul.f32 %v4510_v9, %v5624_v21 }
 0x397   : > { %v4512_v14 = vpop.eup %4511  ;;  %4531 = vrcp.f32 %v2406_v54  ;;  %v3479_v54 = vld [vmem:[%s6598_s11 + $0x8] sm:$0xff] }
 0x398   : > { %3078 = vperm.xlu1 %4248, %v3048_v11   ;;  %v6098_v33 = vpop.eup %4513  ;;  %4533 = vrcp.f32 %v1923_v1  ;;  %v4029_v58 = vpack.c.bf16 %v2038_v49, %v2036_v12  ;;  %v4031_v51 = vpack.c.bf16 %v2037_v7, %v2035_v53  ;;  %v2520_v22 = vmul.f32 %v4512_v14, %v5620_v38  ;;  %v3487_v38 = vld [vmem:[%s6598_s11 + $0x48] sm:$0xff] }
 0x399   : > { %v6103_v10 = vpop.eup %4515  ;;  %v2519_v30 = vmul.f32 %v4512_v14, %v5618_v20  ;;  %v1990_v50 = vadd.f32 %v6098_v33, %v6092_v56 }
 0x39a   : > { %v4518_v29 = vpop.eup %4517  ;;  %v2409_v40 = vpop.xlane.xlu1 %2408  ;;  %4030 = vmatprep.subr.bf16.mxu1 %v4029_v58  ;;  %v3481_v58 = vld [vmem:[%s6598_s11 + $0x18] sm:$0xff] }
 0x39b   : > { %v1926_v26 = vpop.xlane.xlu0 %1925  ;;  %v4520_v0 = vpop.eup %4519  ;;  %v2522_v21 = vmul.f32 %v4518_v29, %v5645_v37  ;;  %v2521_v19 = vmul.f32 %v4518_v29, %v5640_v60  ;;  %4032 = vmatpush1.bf16.msra.mxu1 %v4031_v51 }
 0x39c   : > { %3088 = vperm.xlu1 %4248, %v3050_v44   ;;  %v6109_v13 = vpop.eup %4521  ;;  %4535 = vrcp.f32 %v1926_v26  ;;  %v2040_v55 = vmul.f32 %v4520_v0, %v5636_v32  ;;  %v2039_v62 = vmul.f32 %v4520_v0, %v5634_v48  ;;  %v3489_v32 = vld [vmem:[%s6598_s11 + $0x58] sm:$0xff] }
 0x39d   : > { %v6116_v23 = vpop.eup %4523  ;;  %4537 = vrcp.f32 %v2409_v40  ;;  %v4097_v15 = vpack.c.bf16 %v2522_v21, %v2520_v22  ;;  %v4099_v37 = vpack.c.bf16 %v2521_v19, %v2519_v30  ;;  %v1993_v46 = vadd.f32 %v6109_v13, %v6103_v10  ;;  %v3483_v21 = vld [vmem:[%s6598_s11 + $0x28] sm:$0xff] }
 0x39e   : > { %v4526_v17 = vpop.eup %4525  ;;  %v1929_v20 = vpop.xlane.xlu1 %1928  ;;  %1991 = vadd.xlane.f32.xlu0 %v1990_v50 }
 0x39f   : > { %v2412_v60 = vpop.xlane.xlu0 %2411  ;;  %v4528_v2 = vpop.eup %4527  ;;  %4098 = vmatprep.subr.bf16.mxu0 %v4097_v15  ;;  %v2042_v18 = vmul.f32 %v4526_v17, %v5661_v35  ;;  %v2041_v39 = vmul.f32 %v4526_v17, %v5656_v59 }
 0x3a0   : > { %3537 = vperm.xlu1 %4248, %v3487_v38   ;;  %v6122_v25 = vpop.eup %4529  ;;  %4539 = vrcp.f32 %v2412_v60  ;;  %4100 = vmatpush1.bf16.msra.mxu0 %v4099_v37  ;;  %v2524_v59 = vmul.f32 %v4528_v2, %v5652_v45  ;;  %v2523_v11 = vmul.f32 %v4528_v2, %v5650_v43 }
 0x3a1   : > { %4541 = vrcp.f32 %v1929_v20  ;;  %v4033_v6 = vpack.c.bf16 %v2042_v18, %v2040_v55  ;;  %v4035_v24 = vpack.c.bf16 %v2041_v39, %v2039_v62  ;;  %v4532_v3 = vpop.eup %4531  ;;  %v1996_v1 = vadd.f32 %v6122_v25, %v6116_v23  ;;  %v7031_v20 = vld [vmem:[#allocation24_spill] sm:$0xff]  ;;  %v3485_v55 = vld [vmem:[%s6598_s11 + $0x38] sm:$0xff] }
 0x3a2   : > { %v2415_v35 = vpop.xlane.xlu1 %2414  ;;  %1994 = vadd.xlane.f32.xlu0 %v1993_v46  ;;  %v4534_v41 = vpop.eup %4533  ;;  %v2526_v63 = vmul.f32 %v4532_v3, %v5677_v4  ;;  %v2525_v9 = vmul.f32 %v4532_v3, %v5672_v47  ;;  %v7032_v46 = vld [vmem:[#allocation23_spill] sm:$0xff]  ;;  %v7034_v3 = vld [vmem:[#allocation22_spill] sm:$0xff] }
 0x3a3   : > { %v1932_v48 = vpop.xlane.xlu0 %1931  ;;  %4034 = vmatprep.subr.bf16.mxu1 %v4033_v6  ;;  %v2044_v43 = vmul.f32 %v4534_v41, %v5668_v28  ;;  %v2043_v7 = vmul.f32 %v4534_v41, %v5666_v36  ;;  %v7033_v6 = vld [vmem:[#allocation34_spill] sm:$0xff] }
 0x3a4   : > { %3547 = vperm.xlu1 %4248, %v3489_v32   ;;  %4543 = vrcp.f32 %v1932_v48  ;;  %4036 = vmatpush1.bf16.msra.mxu1 %v4035_v24  ;;  %v4101_v45 = vpack.c.bf16 %v2526_v63, %v2524_v59  ;;  %v4103_v14 = vpack.c.bf16 %v2525_v9, %v2523_v11  ;;  %v7035_v48 = vld [vmem:[#allocation32_spill] sm:$0xff] }
 0x3a5   : > { %4545 = vrcp.f32 %v2415_v35 }
 0x3a6   : > { %v4536_v12 = vpop.eup %4535  ;;  %v1935_v49 = vpop.xlane.xlu1 %1934  ;;  %1997 = vadd.xlane.f32.xlu0 %v1996_v1  ;;  %4102 = vmatprep.subr.bf16.mxu0 %v4101_v45  ;;  %v7036_v45 = vld [vmem:[#allocation30_spill] sm:$0xff] }
 0x3a7   : > { %v2418_v4 = vpop.xlane.xlu0 %2417  ;;  %v4538_v53 = vpop.eup %4537  ;;  %v2046_v47 = vmul.f32 %v4536_v12, %v5693_v61  ;;  %v2045_v44 = vmul.f32 %v4536_v12, %v5688_v34  ;;  %4104 = vmatpush1.bf16.msra.mxu0 %v4103_v14  ;;  %v7037_v12 = vld [vmem:[#allocation33_spill] sm:$0xff] }
 0x3a8   : > { %3497 = vperm.xlu1 %4248, %v3479_v54   ;;  %4547 = vrcp.f32 %v2418_v4  ;;  %v2528_v22 = vmul.f32 %v4538_v53, %v5684_v27  ;;  %v2527_v34 = vmul.f32 %v4538_v53, %v5682_v5  ;;  %v7029_v5 = vld [vmem:[#allocation25_spill] sm:$0xff]  ;;  %v7038_v4 = vld [vmem:[#allocation28_spill] sm:$0xff]  ;;  %v7039_v53 = vld [vmem:[#allocation31_spill] sm:$0xff] }
 0x3a9   : > { %v4037_v51 = vpack.c.bf16 %v2046_v47, %v2044_v43  ;;  %v4039_v29 = vpack.c.bf16 %v2045_v44, %v2043_v7  ;;  %4549 = vrcp.f32 %v1935_v49 }
 0x3aa   : > { %v4540_v40 = vpop.eup %4539  ;;  %v2421_v28 = vpop.xlane.xlu1 %2420 }
 0x3ab   : > { %v1938_v26 = vpop.xlane.xlu0 %1937  ;;  %v4542_v0 = vpop.eup %4541  ;;  %4038 = vmatprep.subr.bf16.mxu1 %v4037_v51  ;;  %v2530_v36 = vmul.f32 %v4540_v40, %v5709_v57  ;;  %v2529_v61 = vmul.f32 %v4540_v40, %v5704_v8  ;;  %v7030_v8 = vld [vmem:[#allocation26_spill] sm:$0xff] }
 0x3ac   : > { %3507 = vperm.xlu1 %4248, %v3481_v58   ;;  %4551 = vrcp.f32 %v1938_v26  ;;  %4040 = vmatpush1.bf16.msra.mxu1 %v4039_v29  ;;  %v2048_v15 = vmul.f32 %v4542_v0, %v5700_v42  ;;  %v2047_v17 = vmul.f32 %v4542_v0, %v7030_v8  ;;  %v510_v51 = vld [vmem:[%s6590_s3 + $0x40] sm:$0xff]  ;;  %v7040_v26 = vld [vmem:[#allocation29_spill] sm:$0xff] }
 0x3ad   : > { %v4105_v30 = vpack.c.bf16 %v2530_v36, %v2528_v22  ;;  %v4107_v19 = vpack.c.bf16 %v2529_v61, %v2527_v34  ;;  %4553 = vrcp.f32 %v2421_v28  ;;  %v7041_v0 = vld [vmem:[#allocation42_spill] sm:$0xff]  ;;  %v7042_v34 = vld [vmem:[#allocation27_spill] sm:$0xff] }
 0x3ae   : > { %v4544_v50 = vpop.eup %4543  ;;  %v1941_v27 = vpop.xlane.xlu1 %1940 }
 0x3af   : > { %v2424_v38 = vpop.xlane.xlu0 %2423  ;;  %v4546_v37 = vpop.eup %4545  ;;  %4106 = vmatprep.subr.bf16.mxu0 %v4105_v30  ;;  %v2050_v57 = vmul.f32 %v4544_v50, %v7029_v5  ;;  %v2049_v60 = vmul.f32 %v4544_v50, %v7031_v20 }
 0x3b0   : > { %3517 = vperm.xlu1 %4248, %v3483_v21   ;;  %4555 = vrcp.f32 %v2424_v38  ;;  %4108 = vmatpush1.bf16.msra.mxu0 %v4107_v19  ;;  %v2532_v32 = vmul.f32 %v4546_v37, %v7032_v46  ;;  %v2531_v35 = vmul.f32 %v4546_v37, %v7034_v3  ;;  %v7043_v21 = vld [vmem:[#allocation40_spill] sm:$0xff]  ;;  %v3047_v46 = vld [vmem:[%s6595_s8 + $0x20] sm:$0xff]  ;;  %v7048_v3 = vld [vmem:[#allocation37_spill] sm:$0xff] }
 0x3b1   : > { %v4041_v2 = vpack.c.bf16 %v2050_v57, %v2048_v15  ;;  %v4043_v18 = vpack.c.bf16 %v2049_v60, %v2047_v17  ;;  %4557 = vrcp.f32 %v1941_v27  ;;  %v3045_v38 = vld [vmem:[%s6595_s8 + $0x10] sm:$0xff]  ;;  %v7044_v57 = vld [vmem:[#allocation38_spill] sm:$0xff]  ;;  %v7045_v17 = vld [vmem:[#allocation41_spill] sm:$0xff] }
 0x3b2   : > { %v4548_v62 = vpop.eup %4547  ;;  %v2427_v42 = vpop.xlane.xlu1 %2426  ;;  %v7046_v60 = vld [vmem:[#allocation36_spill] sm:$0xff] }
 0x3b3   : > { %v1944_v39 = vpop.xlane.xlu0 %1943  ;;  %4042 = vmatprep.subr.bf16.mxu1 %v4041_v2  ;;  %v2534_v24 = vmul.f32 %v4548_v62, %v7033_v6  ;;  %v2533_v59 = vmul.f32 %v4548_v62, %v7035_v48  ;;  %v4550_v41 = vpop.eup %4549  ;;  %v7047_v2 = vld [vmem:[#allocation39_spill] sm:$0xff]  ;;  %v7049_v48 = vld [vmem:[#allocation50_spill] sm:$0xff] }
 0x3b4   : > { %3527 = vperm.xlu1 %4248, %v3485_v55   ;;  %4559 = vrcp.f32 %v1944_v39  ;;  %4044 = vmatpush1.bf16.msra.mxu1 %v4043_v18  ;;  %v2052_v14 = vmul.f32 %v4550_v41, %v7036_v45  ;;  %v2051_v43 = vmul.f32 %v4550_v41, %v7038_v4  ;;  %v7050_v41 = vld [vmem:[#allocation35_spill] sm:$0xff] }
 0x3b5   : > { %v4109_v63 = vpack.c.bf16 %v2534_v24, %v2532_v32  ;;  %v4111_v11 = vpack.c.bf16 %v2533_v59, %v2531_v35  ;;  %4561 = vrcp.f32 %v2427_v42 }
 0x3b6   : > { %v4552_v9 = vpop.eup %4551  ;;  %v1947_v1 = vpop.xlane.xlu1 %1946 }
 0x3b7   : > { %v2430_v54 = vpop.xlane.xlu0 %2429  ;;  %4110 = vmatprep.subr.bf16.mxu0 %v4109_v63  ;;  %v2054_v49 = vmul.f32 %v4552_v9, %v7037_v12  ;;  %v2053_v47 = vmul.f32 %v4552_v9, %v7039_v53  ;;  %v4554_v7 = vpop.eup %4553 }
 0x3b8   : > { %4563 = vrcp.f32 %v2430_v54  ;;  %4112 = vmatpush1.bf16.msra.mxu0 %v4111_v11  ;;  %v2536_v22 = vmul.f32 %v4554_v7, %v7040_v26  ;;  %v2535_v61 = vmul.f32 %v4554_v7, %v7042_v34  ;;  %v7051_v11 = vld [vmem:[#allocation47_spill] sm:$0xff] }
 0x3b9   : > { %v4045_v44 = vpack.c.bf16 %v2054_v49, %v2052_v14  ;;  %v4047_v58 = vpack.c.bf16 %v2053_v47, %v2051_v43  ;;  %4565 = vrcp.f32 %v1947_v1  ;;  %v3049_v14 = vld [vmem:[%s6595_s8 + $0x30] sm:$0xff]  ;;  %v7052_v43 = vld [vmem:[#allocation46_spill] sm:$0xff]  ;;  %v7053_v47 = vld [vmem:[#allocation49_spill] sm:$0xff] }
 0x3ba   : > { %v4556_v29 = vpop.eup %4555  ;;  %v2433_v40 = vpop.xlane.xlu1 %2432 }
 0x3bb   : > { %v1950_v28 = vpop.xlane.xlu0 %1949  ;;  %4046 = vmatprep.subr.bf16.mxu1 %v4045_v44  ;;  %v2538_v36 = vmul.f32 %v4556_v29, %v7041_v0  ;;  %v2537_v30 = vmul.f32 %v4556_v29, %v7043_v21  ;;  %v4558_v19 = vpop.eup %4557  ;;  %v7054_v44 = vld [vmem:[#allocation43_spill] sm:$0xff] }
 0x3bc   : > { %4567 = vrcp.f32 %v1950_v28  ;;  %4048 = vmatpush1.bf16.msra.mxu1 %v4047_v58  ;;  %556 = vperm.xlu0 %4247, %v510_v51   ;;  %v2056_v8 = vmul.f32 %v4558_v19, %v7044_v57  ;;  %v2055_v55 = vmul.f32 %v4558_v19, %v7046_v60  ;;  %v7055_v51 = vld [vmem:[#allocation48_spill] sm:$0xff] }
 0x3bd   : > { %v4113_v50 = vpack.c.bf16 %v2538_v36, %v2536_v22  ;;  %v4115_v27 = vpack.c.bf16 %v2537_v30, %v2535_v61  ;;  %4569 = vrcp.f32 %v2433_v40  ;;  %v3486_v22 = vld [vmem:[%s6598_s11 + $0x40] sm:$0xff]  ;;  %v7056_v61 = vld [vmem:[#allocation45_spill] sm:$0xff] }
 0x3be   : > { %v4560_v15 = vpop.eup %4559  ;;  %v1953_v37 = vpop.xlane.xlu1 %1952  ;;  %v7057_v30 = vld [vmem:[#allocation58_spill] sm:$0xff] }
 0x3bf   : > { %v2436_v5 = vpop.xlane.xlu0 %2435  ;;  %4114 = vmatprep.subr.bf16.mxu0 %v4113_v50  ;;  %v2058_v20 = vmul.f32 %v4560_v15, %v7045_v17  ;;  %v2057_v18 = vmul.f32 %v4560_v15, %v7047_v2  ;;  %v4562_v62 = vpop.eup %4561  ;;  %v7058_v50 = vld [vmem:[#allocation44_spill] sm:$0xff] }
 0x3c0   : > { %4571 = vrcp.f32 %v2436_v5  ;;  %4116 = vmatpush1.bf16.msra.mxu0 %v4115_v27  ;;  %3063 = vperm.xlu0 %4247, %v3045_v38   ;;  %v2540_v35 = vmul.f32 %v4562_v62, %v7048_v3  ;;  %v2539_v63 = vmul.f32 %v4562_v62, %v7050_v41  ;;  %v7059_v38 = vld [vmem:[#allocation55_spill] sm:$0xff] }
 0x3c1   : > { %v4049_v42 = vpack.c.bf16 %v2058_v20, %v2056_v8  ;;  %v4051_v39 = vpack.c.bf16 %v2057_v18, %v2055_v55  ;;  %4573 = vrcp.f32 %v1953_v37  ;;  %v3488_v8 = vld [vmem:[%s6598_s11 + $0x50] sm:$0xff]  ;;  %v7060_v55 = vld [vmem:[#allocation54_spill] sm:$0xff]  ;;  %v7061_v18 = vld [vmem:[#allocation57_spill] sm:$0xff] }
 0x3c2   : > { %v4564_v32 = vpop.eup %4563  ;;  %v2439_v6 = vpop.xlane.xlu1 %2438 }
 0x3c3   : > { %v1956_v24 = vpop.xlane.xlu0 %1955  ;;  %4050 = vmatprep.subr.bf16.mxu1 %v4049_v42  ;;  %v2542_v59 = vmul.f32 %v4564_v32, %v7049_v48  ;;  %v2541_v9 = vmul.f32 %v4564_v32, %v7051_v11  ;;  %v4566_v1 = vpop.eup %4565  ;;  %v7062_v42 = vld [vmem:[#allocation51_spill] sm:$0xff] }
 0x3c4   : > { %4575 = vrcp.f32 %v1956_v24  ;;  %4052 = vmatpush1.bf16.msra.mxu1 %v4051_v39  ;;  %3073 = vperm.xlu0 %4247, %v3047_v46   ;;  %v2060_v53 = vmul.f32 %v4566_v1, %v7052_v43  ;;  %v2059_v58 = vmul.f32 %v4566_v1, %v7054_v44  ;;  %v7063_v46 = vld [vmem:[#allocation56_spill] sm:$0xff] }
 0x3c5   : > { %v4117_v54 = vpack.c.bf16 %v2542_v59, %v2540_v35  ;;  %v4119_v45 = vpack.c.bf16 %v2541_v9, %v2539_v63  ;;  %4577 = vrcp.f32 %v2439_v6  ;;  %v3478_v35 = vld [vmem:[%s6598_s11] sm:$0xff]  ;;  %v7064_v63 = vld [vmem:[#allocation53_spill] sm:$0xff] }
 0x3c6   : > { %v4568_v12 = vpop.eup %4567  ;;  %v1959_v49 = vpop.xlane.xlu1 %1958  ;;  %v7065_v9 = vld [vmem:[#allocation66_spill] sm:$0xff] }
 0x3c7   : > { %v2442_v4 = vpop.xlane.xlu0 %2441  ;;  %4118 = vmatprep.subr.bf16.mxu0 %v4117_v54  ;;  %v2062_v7 = vmul.f32 %v4568_v12, %v7053_v47  ;;  %v2061_v29 = vmul.f32 %v4568_v12, %v7055_v51  ;;  %v4570_v40 = vpop.eup %4569  ;;  %v7066_v54 = vld [vmem:[#allocation52_spill] sm:$0xff] }
 0x3c8   : > { %4579 = vrcp.f32 %v2442_v4  ;;  %4120 = vmatpush1.bf16.msra.mxu0 %v4119_v45  ;;  %3083 = vperm.xlu0 %4247, %v3049_v14   ;;  %v2544_v21 = vmul.f32 %v4570_v40, %v7056_v61  ;;  %v2543_v27 = vmul.f32 %v4570_v40, %v7058_v50  ;;  %v7067_v14 = vld [vmem:[#allocation63_spill] sm:$0xff] }
 0x3c9   : > { %v4053_v28 = vpack.c.bf16 %v2062_v7, %v2060_v53  ;;  %v4055_v26 = vpack.c.bf16 %v2061_v29, %v2059_v58  ;;  %4581 = vrcp.f32 %v1959_v49  ;;  %v3480_v53 = vld [vmem:[%s6598_s11 + $0x10] sm:$0xff]  ;;  %v7068_v58 = vld [vmem:[#allocation62_spill] sm:$0xff]  ;;  %v7069_v29 = vld [vmem:[#allocation65_spill] sm:$0xff] }
 0x3ca   : > { %v4572_v0 = vpop.eup %4571  ;;  %v2445_v36 = vpop.xlane.xlu1 %2444 }
 0x3cb   : > { %v1962_v34 = vpop.xlane.xlu0 %1961  ;;  %4054 = vmatprep.subr.bf16.mxu1 %v4053_v28  ;;  %v2546_v19 = vmul.f32 %v4572_v0, %v7057_v30  ;;  %v2545_v15 = vmul.f32 %v4572_v0, %v7059_v38  ;;  %v4574_v37 = vpop.eup %4573  ;;  %v7070_v28 = vld [vmem:[#allocation59_spill] sm:$0xff] }
 0x3cc   : > { %4583 = vrcp.f32 %v1962_v34  ;;  %4056 = vmatpush1.bf16.msra.mxu1 %v4055_v26  ;;  %3532 = vperm.xlu0 %4247, %v3486_v22   ;;  %v2064_v2 = vmul.f32 %v4574_v37, %v7060_v55  ;;  %v2063_v39 = vmul.f32 %v4574_v37, %v7062_v42  ;;  %v7071_v22 = vld [vmem:[#allocation64_spill] sm:$0xff] }
 0x3cd   : > { %v4121_v5 = vpack.c.bf16 %v2546_v19, %v2544_v21  ;;  %v4123_v57 = vpack.c.bf16 %v2545_v15, %v2543_v27  ;;  %4585 = vrcp.f32 %v2445_v36  ;;  %v3482_v21 = vld [vmem:[%s6598_s11 + $0x20] sm:$0xff]  ;;  %v7072_v27 = vld [vmem:[#allocation61_spill] sm:$0xff] }
 0x3ce   : > { %v4576_v17 = vpop.eup %4575  ;;  %v1965_v20 = vpop.xlane.xlu1 %1964  ;;  %v7073_v15 = vld [vmem:[#allocation74_spill] sm:$0xff] }
 0x3cf   : > { %v2448_v60 = vpop.xlane.xlu0 %2447  ;;  %4122 = vmatprep.subr.bf16.mxu0 %v4121_v5  ;;  %v2066_v62 = vmul.f32 %v4576_v17, %v7061_v18  ;;  %v2065_v32 = vmul.f32 %v4576_v17, %v7063_v46  ;;  %v4578_v6 = vpop.eup %4577  ;;  %v7074_v5 = vld [vmem:[#allocation60_spill] sm:$0xff] }
 0x3d0   : > { %4587 = vrcp.f32 %v2448_v60  ;;  %4124 = vmatpush1.bf16.msra.mxu0 %v4123_v57  ;;  %3542 = vperm.xlu0 %4247, %v3488_v8   ;;  %v2548_v11 = vmul.f32 %v4578_v6, %v7064_v63  ;;  %v2547_v45 = vmul.f32 %v4578_v6, %v7066_v54  ;;  %v7075_v8 = vld [vmem:[#allocation71_spill] sm:$0xff] }
 0x3d1   : > { %v4057_v24 = vpack.c.bf16 %v2066_v62, %v2064_v2  ;;  %v4059_v3 = vpack.c.bf16 %v2065_v32, %v2063_v39  ;;  %4589 = vrcp.f32 %v1965_v20  ;;  %v3484_v2 = vld [vmem:[%s6598_s11 + $0x30] sm:$0xff]  ;;  %v7076_v39 = vld [vmem:[#allocation70_spill] sm:$0xff]  ;;  %v7077_v32 = vld [vmem:[#allocation73_spill] sm:$0xff] }
 0x3d2   : > { %v4580_v48 = vpop.eup %4579  ;;  %v2451_v59 = vpop.xlane.xlu1 %2450 }
 0x3d3   : > { %v1968_v41 = vpop.xlane.xlu0 %1967  ;;  %4058 = vmatprep.subr.bf16.mxu1 %v4057_v24  ;;  %v2550_v1 = vmul.f32 %v4580_v48, %v7065_v9  ;;  %v2549_v12 = vmul.f32 %v4580_v48, %v7067_v14  ;;  %v4582_v49 = vpop.eup %4581  ;;  %v7078_v24 = vld [vmem:[#allocation67_spill] sm:$0xff] }
 0x3d4   : > { %4591 = vrcp.f32 %v1968_v41  ;;  %4060 = vmatpush1.bf16.msra.mxu1 %v4059_v3  ;;  %3492 = vperm.xlu0 %4247, %v3478_v35   ;;  %v2068_v51 = vmul.f32 %v4582_v49, %v7068_v58  ;;  %v2067_v26 = vmul.f32 %v4582_v49, %v7070_v28  ;;  %v7079_v35 = vld [vmem:[#allocation72_spill] sm:$0xff] }
 0x3d5   : > { %v4125_v4 = vpack.c.bf16 %v2550_v1, %v2548_v11  ;;  %v4127_v43 = vpack.c.bf16 %v2549_v12, %v2547_v45  ;;  %4593 = vrcp.f32 %v2451_v59  ;;  %v7080_v1 = vld [vmem:[#allocation69_spill] sm:$0xff]  ;;  %v7081_v45 = vld [vmem:[#allocation82_spill] sm:$0xff]  ;;  %v7082_v12 = vld [vmem:[#allocation68_spill] sm:$0xff] }
 0x3d6   : > { %v4584_v47 = vpop.eup %4583  ;;  %v1971_v7 = vpop.xlane.xlu1 %1970 }
 0x3d7   : > { %v2454_v44 = vpop.xlane.xlu0 %2453  ;;  %4126 = vmatprep.subr.bf16.mxu0 %v4125_v4  ;;  %v2070_v40 = vmul.f32 %v4584_v47, %v7069_v29  ;;  %v2069_v0 = vmul.f32 %v4584_v47, %v7071_v22  ;;  %v4586_v36 = vpop.eup %4585  ;;  %v7083_v4 = vld [vmem:[#allocation79_spill] sm:$0xff] }
 0x3d8   : > { %4595 = vrcp.f32 %v2454_v44  ;;  %4128 = vmatpush1.bf16.msra.mxu0 %v4127_v43  ;;  %3502 = vperm.xlu0 %4247, %v3480_v53   ;;  %v2552_v38 = vmul.f32 %v4586_v36, %v7072_v27  ;;  %v2551_v57 = vmul.f32 %v4586_v36, %v7074_v5  ;;  %v7088_v27 = vld [vmem:[#allocation77_spill] sm:$0xff]  ;;  %v7089_v5 = vld [vmem:[#allocation76_spill] sm:$0xff] }
 0x3d9   : > { %v4061_v34 = vpack.c.bf16 %v2070_v40, %v2068_v51  ;;  %v4063_v61 = vpack.c.bf16 %v2069_v0, %v2067_v26  ;;  %4597 = vrcp.f32 %v1971_v7  ;;  %v7084_v40 = vld [vmem:[#allocation78_spill] sm:$0xff]  ;;  %v7085_v26 = vld [vmem:[#allocation81_spill] sm:$0xff]  ;;  %v7086_v0 = vld [vmem:[#allocation75_spill] sm:$0xff] }
 0x3da   : > { %v4588_v30 = vpop.eup %4587  ;;  %v2457_v19 = vpop.xlane.xlu1 %2456 }
 0x3db   : > { %v1974_v50 = vpop.xlane.xlu0 %1973  ;;  %4062 = vmatprep.subr.bf16.mxu1 %v4061_v34  ;;  %v2554_v37 = vmul.f32 %v4588_v30, %v7073_v15  ;;  %v2553_v17 = vmul.f32 %v4588_v30, %v7075_v8  ;;  %v4590_v20 = vpop.eup %4589  ;;  %v7087_v34 = vld [vmem:[#allocation80_spill] sm:$0xff]  ;;  %v7090_v8 = vld [vmem:[#allocation87_spill] sm:$0xff] }
 0x3dc   : > { %4599 = vrcp.f32 %v1974_v50  ;;  %4064 = vmatpush1.bf16.msra.mxu1 %v4063_v61  ;;  %3512 = vperm.xlu0 %4247, %v3482_v21   ;;  %v2072_v46 = vmul.f32 %v4590_v20, %v7076_v39  ;;  %v2071_v3 = vmul.f32 %v4590_v20, %v7078_v24 }
 0x3dd   : > { %4601 = vrcp.f32 %v2457_v19  ;;  %v4129_v60 = vpack.c.bf16 %v2554_v37, %v2552_v38  ;;  %v4131_v55 = vpack.c.bf16 %v2553_v17, %v2551_v57 }
 0x3de   : > { %v4592_v18 = vpop.eup %4591  ;;  %v1977_v62 = vpop.xlane.xlu1 %1976 }
 0x3df   : > { %v2460_v42 = vpop.xlane.xlu0 %2459  ;;  %4130 = vmatprep.subr.bf16.mxu0 %v4129_v60  ;;  %v2074_v6 = vmul.f32 %v4592_v18, %v7077_v32  ;;  %v2073_v48 = vmul.f32 %v4592_v18, %v7079_v35  ;;  %v4594_v59 = vpop.eup %4593 }
 0x3e0   : > { %4603 = vrcp.f32 %v2460_v42  ;;  %4132 = vmatpush1.bf16.msra.mxu0 %v4131_v55  ;;  %3522 = vperm.xlu0 %4247, %v3484_v2   ;;  %v2556_v54 = vmul.f32 %v4594_v59, %v7080_v1  ;;  %v2555_v49 = vmul.f32 %v4594_v59, %v7082_v12  ;;  %v7095_v1 = vld [vmem:[#allocation90_spill] sm:$0xff] }
 0x3e1   : > { %4605 = vrcp.f32 %v1977_v62  ;;  %v4065_v41 = vpack.c.bf16 %v2074_v6, %v2072_v46  ;;  %v4067_v63 = vpack.c.bf16 %v2073_v48, %v2071_v3  ;;  %v7091_v62 = vld [vmem:[#allocation86_spill] sm:$0xff]  ;;  %v7092_v46 = vld [vmem:[#allocation83_spill] sm:$0xff] }
 0x3e2   : > { %v4596_v11 = vpop.eup %4595  ;;  %v2463_v58 = vpop.xlane.xlu1 %2462 }
 0x3e3   : > { %v1980_v9 = vpop.xlane.xlu0 %1979  ;;  %4066 = vmatprep.subr.bf16.mxu1 %v4065_v41  ;;  %v2558_v14 = vmul.f32 %v4596_v11, %v7081_v45  ;;  %v2557_v43 = vmul.f32 %v4596_v11, %v7083_v4  ;;  %v4598_v53 = vpop.eup %4597 }
 0x3e4   : > { %4607 = vrcp.f32 %v1980_v9  ;;  %4068 = vmatpush1.bf16.msra.mxu1 %v4067_v63  ;;  %v2076_v28 = vmul.f32 %v4598_v53, %v7084_v40  ;;  %v2075_v36 = vmul.f32 %v4598_v53, %v7086_v0  ;;  %v7093_v63 = vld [vmem:[#allocation84_spill] sm:$0xff]  ;;  %v7101_v0 = vld [vmem:[#allocation89_spill] sm:$0xff] }
 0x3e5   : > { %v4133_v47 = vpack.c.bf16 %v2558_v14, %v2556_v54  ;;  %v4135_v7 = vpack.c.bf16 %v2557_v43, %v2555_v49  ;;  %4609 = vrcp.f32 %v2463_v58  ;;  %v7097_v43 = vld [vmem:[#allocation88_spill] sm:$0xff] }
 0x3e6   : > { %v4600_v44 = vpop.eup %4599 }
 0x3e7   : > { %v1983_v51 = vpop.xlane.xlu0 %1982  ;;  %v4602_v29 = vpop.eup %4601  ;;  %4134 = vmatprep.subr.bf16.mxu0 %v4133_v47  ;;  %v2078_v22 = vmul.f32 %v4600_v44, %v7085_v26  ;;  %v2077_v61 = vmul.f32 %v4600_v44, %v7087_v34  ;;  %v7098_v47 = vld [vmem:[#allocation101_spill] sm:$0xff]  ;;  %v7102_v34 = vld [vmem:[#allocation106_spill] sm:$0xff] }
 0x3e8   : > { %4136 = vmatpush1.bf16.msra.mxu0 %v4135_v7  ;;  %v2560_v38 = vmul.f32 %v4602_v29, %v7088_v27  ;;  %v2559_v57 = vmul.f32 %v4602_v29, %v7089_v5  ;;  %v2469_v2 = vpop.xlane.xlu1 %2468  ;;  %v7099_v44 = vld [vmem:[#allocation85_spill] sm:$0xff] }
 0x3e9   : > { %v4069_v21 = vpack.c.bf16 %v2078_v22, %v2076_v28  ;;  %v4071_v30 = vpack.c.bf16 %v2077_v61, %v2075_v36 }
 0x3ea   : > { %v4604_v19 = vpop.eup %4603 }
 0x3eb   : > { %v2466_v50 = vpop.xlane.xlu0 %2465  ;;  %v4606_v15 = vpop.eup %4605  ;;  %4070 = vmatprep.subr.bf16.mxu1 %v4069_v21  ;;  %v2562_v37 = vmul.f32 %v4604_v19, %v5964_v16  ;;  %v2561_v17 = vmul.f32 %v4604_v19, %v7090_v8  ;;  %v7103_v21 = vld [vmem:[#allocation94_spill] sm:$0xff]  ;;  %v7104_v19 = vld [vmem:[#allocation103_spill] sm:$0xff] }
 0x3ec   : > { %4611 = vrcp.f32 %v2466_v50  ;;  %4072 = vmatpush1.bf16.msra.mxu1 %v4071_v30  ;;  %v2080_v42 = vmul.f32 %v4606_v15, %v7091_v62  ;;  %v2079_v32 = vmul.f32 %v4606_v15, %v7092_v46  ;;  %v7109_v46 = vld [vmem:[#allocation21_spill] sm:$0xff] }
 0x3ed   : > { %4613 = vrcp.f32 %v1983_v51  ;;  %v4137_v20 = vpack.c.bf16 %v2562_v37, %v2560_v38  ;;  %v4139_v60 = vpack.c.bf16 %v2561_v17, %v2559_v57  ;;  %v7100_v51 = vld [vmem:[#allocation98_spill] sm:$0xff]  ;;  %v7105_v57 = vld [vmem:[#allocation105_spill] sm:$0xff] }
 0x3ee   : > { %v4608_v55 = vpop.eup %4607  ;;  %v7106_v17 = vld [vmem:[#allocation109_spill] sm:$0xff] }
 0x3ef   : > { %v1986_v18 = vpop.xlane.xlu0 %1985  ;;  %4138 = vmatprep.subr.bf16.mxu0 %v4137_v20  ;;  %v2082_v39 = vmul.f32 %v4608_v55, %v5982_v52  ;;  %v2081_v16 = vmul.f32 %v4608_v55, %v5978_v31  ;;  %v4610_v48 = vpop.eup %4609  ;;  %v7094_v52 = vld [vmem:[#allocation95_spill] sm:$0xff] }
 0x3f0   : > { %4615 = vrcp.f32 %v1986_v18  ;;  %4140 = vmatpush1.bf16.msra.mxu0 %v4139_v60  ;;  %v2475_v3 = vpop.xlane.xlu1 %2474  ;;  %v2564_v11 = vmul.f32 %v4610_v48, %v7093_v63  ;;  %v2563_v54 = vmul.f32 %v4610_v48, %v7095_v1  ;;  %v7096_v31 = vld [vmem:[#allocation91_spill] sm:$0xff]  ;;  %v7107_v60 = vld [vmem:[#allocation104_spill] sm:$0xff]  ;;  %v7117_v1 = vld [vmem:[#allocation5_spill] sm:$0xff] }
 0x3f1   : > { %4617 = vrcp.f32 %v2469_v2  ;;  %v4073_v6 = vpack.c.bf16 %v2082_v39, %v2080_v42  ;;  %v4075_v24 = vpack.c.bf16 %v2081_v16, %v2079_v32  ;;  %v7108_v2 = vld [vmem:[#allocation108_spill] sm:$0xff]  ;;  %v7110_v32 = vld [vmem:[#allocation14_spill] sm:$0xff]  ;;  %v7113_v48 = vld [vmem:[#allocation3_spill] sm:$0xff] }
 0x3f2   : > { %v919_v16 = vadd.f32 %v7110_v32, %v7109_v46  ;;  %v7115_v63 = vld [vmem:[#allocation4_spill] sm:$0xff]  ;;  %v3120_v46 = vld [vmem:[%s6597_s10 + $0x8] sm:$0xff] }
 0x3f3   : > { %v2472_v35 = vpop.xlane.xlu0 %2471  ;;  %4074 = vmatprep.subr.bf16.mxu1 %v4073_v6  ;;  %v3121_v32 = vld [vmem:[%s6597_s10 + $0x10] sm:$0xff] }
 0x3f4   : > { %4619 = vrcp.f32 %v2472_v35  ;;  %4076 = vmatpush1.bf16.msra.mxu1 %v4075_v24  ;;  %v1989_v5 = vpop.xlane.xlu1 %1988  ;;  %v7111_v24 = vld [vmem:[#allocation2_spill] sm:$0xff] }
 0x3f5   : > { %4621 = vrcp.f32 %v2475_v3  ;;  %v7112_v3 = vld [vmem:[#allocation16_spill] sm:$0xff] }
 0x3f6   : > { %v4612_v59 = vpop.eup %4611 }
 0x3f7   : > { %v2478_v41 = vpop.xlane.xlu0 %2477  ;;  %v2566_v9 = vmul.f32 %v4612_v59, %v7094_v52  ;;  %v2565_v45 = vmul.f32 %v4612_v59, %v7096_v31  ;;  %v4614_v14 = vpop.eup %4613  ;;  %v7114_v59 = vld [vmem:[#allocation15_spill] sm:$0xff] }
 0x3f8   : > { %4623 = vrcp.f32 %v2478_v41  ;;  %v2084_v53 = vmul.f32 %v4614_v14, %v7097_v43  ;;  %v2083_v58 = vmul.f32 %v4614_v14, %v7099_v44  ;;  %v797_v6 = vpop.permute.xlu1 %796 }
 0x3f9   : > { %v4141_v12 = vpack.c.bf16 %v2566_v9, %v2564_v11  ;;  %v4143_v49 = vpack.c.bf16 %v2565_v45, %v2563_v54  ;;  %v7116_v11 = vld [vmem:[#allocation18_spill] sm:$0xff]  ;;  %v7118_v54 = vld [vmem:[#allocation17_spill] sm:$0xff]  ;;  %v7119_v45 = vld [vmem:[#allocation20_spill] sm:$0xff]  ;;  %4625 = vrcp.f32 %v1989_v5 }
 0x3fa   : > { %v4616_v4 = vpop.eup %4615  ;;  %v933_v52 = vadd.f32 %v7116_v11, %v797_v6  ;;  %v931_v31 = vadd.f32 %v7118_v54, %v797_v6  ;;  %v7125_v5 = vld [vmem:[#allocation6_spill] sm:$0xff]  ;;  %v2762_v54 = vld [vmem:[%s6594_s7 + $0x8] sm:$0xff] }
 0x3fb   : > { %4142 = vmatprep.subr.bf16.mxu0 %v4141_v12  ;;  %v2086_v7 = vmul.f32 %v4616_v4, %v7098_v47  ;;  %v2085_v29 = vmul.f32 %v4616_v4, %v7100_v51  ;;  %v4618_v40 = vpop.eup %4617  ;;  %v7120_v12 = vld [vmem:[#allocation19_spill] sm:$0xff]  ;;  %v7121_v4 = vmov 0.0  }
 0x3fc   : > { %4144 = vmatpush1.bf16.msra.mxu0 %v4143_v49  ;;  %v2568_v36 = vmul.f32 %v4618_v40, %v7101_v0  ;;  %v2567_v30 = vmul.f32 %v4618_v40, %v7103_v21  ;;  %v802_v9 = vpop.permute.xlu1 %801  ;;  %v7123_v40 = vld [vmem:[#allocation102_spill] sm:$0xff] }
 0x3fd   : > { %v4077_v28 = vpack.c.bf16 %v2086_v7, %v2084_v53  ;;  %v4079_v26 = vpack.c.bf16 %v2085_v29, %v2083_v58  ;;  %v939_v14 = vadd.f32 %v7119_v45, %v802_v9  ;;  %v937_v49 = vadd.f32 %v7120_v12, %v802_v9  ;;  %v7122_v58 = vld [vmem:[#allocation107_spill] sm:$0xff]  ;;  %v2764_v45 = vld [vmem:[%s6594_s7 + $0x18] sm:$0xff] }
 0x3fe   : > { %v4620_v22 = vpop.eup %4619  ;;  %v792_v39 = vpop.permute.xlu0 %791  ;;  %v2766_v12 = vld [vmem:[%s6594_s7 + $0x28] sm:$0xff] }
 0x3ff   : > { %4078 = vmatprep.subr.bf16.mxu1 %v4077_v28  ;;  %v2570_v61 = vmul.f32 %v4620_v22, %v7102_v34  ;;  %v2569_v50 = vmul.f32 %v4620_v22, %v7104_v19  ;;  %v4622_v27 = vpop.eup %4621  ;;  %v927_v35 = vadd.f32 %v7112_v3, %v792_v39  ;;  %v925_v41 = vadd.f32 %v7114_v59, %v792_v39  ;;  %v3119_v39 = vld [vmem:[%s6597_s10] sm:$0xff] }
 0x400   : > { %4080 = vmatpush1.bf16.msra.mxu1 %v4079_v26  ;;  %v2572_v8 = vmul.f32 %v4622_v27, %v7105_v57  ;;  %v2571_v55 = vmul.f32 %v4622_v27, %v7107_v60  ;;  %v562_v19 = vpop.permute.xlu1 %561 }
 0x401   : > { %v4145_v38 = vpack.c.bf16 %v2570_v61, %v2568_v36  ;;  %v4147_v15 = vpack.c.bf16 %v2569_v50, %v2567_v30  ;;  %v7124_v61 = vld [vmem:[#allocation7_spill] sm:$0xff] }
 0x402   : > { %v4624_v37 = vpop.eup %4623 }
 0x403   : > { %4146 = vmatprep.subr.bf16.mxu0 %v4145_v38  ;;  %v2574_v20 = vmul.f32 %v4624_v37, %v7106_v17  ;;  %v2573_v18 = vmul.f32 %v4624_v37, %v7108_v2  ;;  %v4626_v7 = vpop.eup %4625  ;;  %v7130_v2 = vld [vmem:[#allocation13_spill] sm:$0xff] }
 0x404   : > { %4148 = vmatpush1.bf16.msra.mxu0 %v4147_v15  ;;  %v2088_v51 = vmul.f32 %v4626_v7, %v7122_v58  ;;  %v2087_v28 = vmul.f32 %v4626_v7, %v7123_v40  ;;  %v567_v37 = vpop.permute.xlu1 %566 }
 0x405   : > { %v4149_v62 = vpack.c.bf16 %v2574_v20, %v2572_v8  ;;  %v4151_v42 = vpack.c.bf16 %v2573_v18, %v2571_v55  ;;  %v7126_v8 = vld [vmem:[#allocation9_spill] sm:$0xff]  ;;  %v7127_v20 = vld [vmem:[#allocation8_spill] sm:$0xff] }
 0x406   : > { %v734_v17 = vadd.f32 %v7126_v8, %v562_v19  ;;  %v732_v60 = vadd.f32 %v7127_v20, %v562_v19  ;;  %v2758_v19 = vld [vmem:[%s6593_s6 + $0x28] sm:$0xff]  ;;  %v3129_v8 = vld [vmem:[%s6597_s10 + $0x50] sm:$0xff] }
 0x407   : > { %4150 = vmatprep.subr.bf16.mxu0 %v4149_v62  ;;  %v7131_v62 = vld [vmem:[#allocation12_spill] sm:$0xff] }
 0x408   : > { %4152 = vmatpush1.bf16.msra.mxu0 %v4151_v42 }
 0x409   : > { %4170 = vmatprep.subr.bf16.mxu0 %v7111_v24 }
 0x40b   : > { %2729 = vmatmul.mubr.f32.vlgmr.msra.gmra.mrb[76].mxu0 %v919_v16 }
 0x40c   : > { %2734 = vmatprep.mubr.f32.mxu0 %v927_v35  ;;  %4172 = vmatpush1.bf16.msra.mxu0 %v7113_v48 }
 0x40d   : > { %4174 = vmatprep.subr.bf16.mxu0 %v7115_v63 }
 0x40f   : > { %2735 = vmatmul.mubr.f32.gmra.mrb[78].mxu0 %v925_v41 }
 0x410   : > { %2740 = vmatprep.mubr.f32.mxu0 %v933_v52  ;;  %4176 = vmatpush1.bf16.msra.mxu0 %v7117_v1  ;;  %v2761_v1 = vld [vmem:[%s6594_s7] sm:$0xff] }
 0x413   : > { %2741 = vmatmul.mubr.f32.gmra.mrb[80].mxu0 %v931_v31  ;;  %v2763_v31 = vld [vmem:[%s6594_s7 + $0x10] sm:$0xff] }
 0x414   : > { %2746 = vmatprep.mubr.f32.mxu0 %v939_v14  ;;  %v2765_v14 = vld [vmem:[%s6594_s7 + $0x20] sm:$0xff] }
 0x417   : > { %2747 = vmatmul.mubr.f32.gmra.mrb[82].mxu0 %v937_v49  ;;  %v2767_v49 = vld [vmem:[%s6594_s7 + $0x30] sm:$0xff] }
 0x418   : > { %3231 = vmatprep.mubr.f32.mxu0 %v7121_v4 }
 0x41b   : > { %3947 = vmatmul.mubr.msk.f32.vlgmr.msra.gmra.mrb[84].mxu0 %vm574_vm0, %v3119_v39 }
 0x41c   : > { %3237 = vmatprep.mubr.f32.mxu0 %v7121_v4 }
 0x41f   : > { %3948 = vmatmul.mubr.msk.f32.gmra.mrb[86].mxu0 %vm574_vm0, %v3120_v46 }
 0x420   : > { %3243 = vmatprep.mubr.f32.mxu0 %v7121_v4 }
 0x423   : > { %3949 = vmatmul.mubr.msk.f32.gmra.mrb[88].mxu0 %vm574_vm0, %v3121_v32 }
 0x424   : > { %3249 = vmatprep.mubr.f32.mxu0 %v7121_v4 }
 0x42b   : > { %v1992_v43 = vpop.xlane.xlu0 %1991 }
 0x42c   : > { %4627 = vrcp.f32 %v1992_v43  ;;  %v2768_v43 = vld [vmem:[%s6594_s7 + $0x38] sm:$0xff] }
 0x42f   : > { %v1995_v53 = vpop.xlane.xlu0 %1994 }
 0x430   : > { %4629 = vrcp.f32 %v1995_v53 }
 0x433   : > { %v1998_v47 = vpop.xlane.xlu0 %1997 }
 0x434   : > { %4631 = vrcp.f32 %v1998_v47 }
 0x436   : > { %v4628_v44 = vpop.eup %4627 }
 0x437   : > { %v2090_v29 = vmul.f32 %v4628_v44, %v6098_v33  ;;  %v2089_v26 = vmul.f32 %v4628_v44, %v6092_v56 }
 0x439   : > { %v4081_v22 = vpack.c.bf16 %v2090_v29, %v2088_v51  ;;  %v4083_v0 = vpack.c.bf16 %v2089_v26, %v2087_v28 }
 0x43a   : > { %v4630_v34 = vpop.eup %4629 }
 0x43b   : > { %4082 = vmatprep.subr.bf16.mxu1 %v4081_v22  ;;  %v557_v36 = vpop.permute.xlu0 %556  ;;  %v2092_v50 = vmul.f32 %v4630_v34, %v6109_v13  ;;  %v2091_v33 = vmul.f32 %v4630_v34, %v6103_v10  ;;  %v7128_v13 = vld [vmem:[#allocation11_spill] sm:$0xff]  ;;  %v7129_v10 = vld [vmem:[#allocation10_spill] sm:$0xff] }
 0x43c   : > { %v728_v21 = vadd.f32 %v7124_v61, %v557_v36  ;;  %4084 = vmatpush1.bf16.msra.mxu1 %v4083_v0  ;;  %v726_v57 = vadd.f32 %v7125_v5, %v557_v36  ;;  %v740_v55 = vadd.f32 %v7128_v13, %v567_v37  ;;  %v2753_v36 = vld [vmem:[%s6593_s6] sm:$0xff]  ;;  %v2754_v34 = vld [vmem:[%s6593_s6 + $0x8] sm:$0xff]  ;;  %v2755_v61 = vld [vmem:[%s6593_s6 + $0x10] sm:$0xff] }
 0x43d   : > { %v3127_v5 = vld [vmem:[%s6597_s10 + $0x40] sm:$0xff] }
 0x43e   : > { %v4632_v30 = vpop.eup %4631  ;;  %2639 = vmatprep.mubr.f32.mxu1 %v728_v21  ;;  %v2756_v21 = vld [vmem:[%s6593_s6 + $0x18] sm:$0xff] }
 0x43f   : > { %v2094_v27 = vmul.f32 %v4632_v30, %v6122_v25  ;;  %v2093_v38 = vmul.f32 %v4632_v30, %v6116_v23  ;;  %v572_v25 = vpop.permute.xlu1 %571  ;;  %v738_v23 = vadd.f32 %v7129_v10, %v567_v37  ;;  %v2757_v30 = vld [vmem:[%s6593_s6 + $0x20] sm:$0xff]  ;;  %v3126_v37 = vld [vmem:[%s6597_s10 + $0x38] sm:$0xff] }
 0x440   : > { %v746_v18 = vadd.f32 %v7130_v2, %v572_v25  ;;  %v744_v42 = vadd.f32 %v7131_v62, %v572_v25 }
 0x441   : > { %v4085_v56 = vpack.c.bf16 %v2094_v27, %v2092_v50  ;;  %v4087_v15 = vpack.c.bf16 %v2093_v38, %v2091_v33  ;;  %v2759_v50 = vld [vmem:[%s6593_s6 + $0x30] sm:$0xff]  ;;  %v2760_v27 = vld [vmem:[%s6593_s6 + $0x38] sm:$0xff]  ;;  %v3123_v38 = vld [vmem:[%s6597_s10 + $0x20] sm:$0xff] }
 0x442   : > { %v3122_v33 = vld [vmem:[%s6597_s10 + $0x18] sm:$0xff] }
 0x443   : > { %4086 = vmatprep.subr.bf16.mxu1 %v4085_v56  ;;  %3950 = vmatmul.mubr.msk.f32.gmra.mrb[90].mxu0 %vm574_vm0, %v3122_v33  ;;  %v3124_v56 = vld [vmem:[%s6597_s10 + $0x28] sm:$0xff]  ;;  %v3054_v20 = vpop.permute.xlu1 %3053  ;;  %v3113_v33 = vld [vmem:[%s6596_s9 + $0x30] sm:$0xff] }
 0x444   : > { %4088 = vmatpush1.bf16.msra.mxu1 %v4087_v15  ;;  %3255 = vmatprep.mubr.f32.mxu0 %v7121_v4  ;;  %v3125_v15 = vld [vmem:[%s6597_s10 + $0x30] sm:$0xff] }
 0x447   : > { %2640 = vmatmul.mubr.f32.vlgmr.msra.gmra.mrb[92].mxu1 %v726_v57  ;;  %3951 = vmatmul.mubr.msk.f32.gmra.mrb[92].mxu0 %vm574_vm0, %v3123_v38  ;;  %v3128_v57 = vld [vmem:[%s6597_s10 + $0x48] sm:$0xff]  ;;  %v3114_v38 = vld [vmem:[%s6596_s9 + $0x38] sm:$0xff] }
 0x448   : > { %2645 = vmatprep.mubr.f32.mxu1 %v734_v17  ;;  %3261 = vmatprep.mubr.f32.mxu0 %v7121_v4  ;;  %v3130_v17 = vld [vmem:[%s6597_s10 + $0x58] sm:$0xff] }
 0x44b   : > { %2646 = vmatmul.mubr.f32.gmra.mrb[94].mxu1 %v732_v60  ;;  %3952 = vmatmul.mubr.msk.f32.gmra.mrb[94].mxu0 %vm574_vm0, %v3124_v56  ;;  %v3115_v56 = vld [vmem:[%s6596_s9 + $0x40] sm:$0xff] }
 0x44c   : > { %2651 = vmatprep.mubr.f32.mxu1 %v740_v55  ;;  %3267 = vmatprep.mubr.f32.mxu0 %v7121_v4  ;;  %v3059_v55 = vpop.permute.xlu1 %3058 }
 0x44f   : > { %2652 = vmatmul.mubr.f32.gmra.mrb[96].mxu1 %v738_v23  ;;  %3953 = vmatmul.mubr.msk.f32.gmra.mrb[96].mxu0 %vm574_vm0, %v3125_v15  ;;  %v3116_v15 = vld [vmem:[%s6596_s9 + $0x48] sm:$0xff] }
 0x450   : > { %2657 = vmatprep.mubr.f32.mxu1 %v746_v18  ;;  %3273 = vmatprep.mubr.f32.mxu0 %v7121_v4 }
 0x453   : > { %2658 = vmatmul.mubr.f32.gmra.mrb[98].mxu1 %v744_v42  ;;  %3954 = vmatmul.mubr.msk.f32.gmra.mrb[98].mxu0 %vm574_vm0, %v3126_v37  ;;  %v3117_v37 = vld [vmem:[%s6596_s9 + $0x50] sm:$0xff] }
 0x454   : > { %2857 = vmatprep.mubr.f32.mxu1 %v7121_v4  ;;  %3279 = vmatprep.mubr.f32.mxu0 %v7121_v4 }
 0x457   : > { %3955 = vmatmul.mubr.msk.f32.gmra.mrb[100].mxu0 %vm574_vm0, %v3127_v5  ;;  %v3118_v5 = vld [vmem:[%s6596_s9 + $0x58] sm:$0xff] }
 0x458   : > { %3285 = vmatprep.mubr.f32.mxu0 %v7121_v4 }
 0x45b   : > { %3956 = vmatmul.mubr.msk.f32.gmra.mrb[102].mxu0 %vm574_vm0, %v3128_v57 }
 0x45c   : > { %3291 = vmatprep.mubr.f32.mxu0 %v7121_v4 }
 0x45f   : > { %3957 = vmatmul.mubr.msk.f32.gmra.mrb[104].mxu0 %vm574_vm0, %v3129_v8 }
 0x460   : > { %3297 = vmatprep.mubr.f32.mxu0 %v7121_v4 }
 0x463   : > { %3958 = vmatmul.mubr.msk.f32.gmra.mrb[106].mxu0 %vm574_vm0, %v3130_v17 }
 0x464   : > { %3405 = vmatprep.mubr.f32.mxu0 %v7121_v4 }
 0x4de   : > { %v2730_v16 = vpop.f32.mrb[76].mxu0 }
 0x4df   : > { %v2732_v6 = vpop.f32.mrb[77].mxu0 }
 0x4e2   : > { %v2736_v24 = vpop.f32.mrb[78].mxu0 }
 0x4e3   : > { %v4155_v3 = vpack.c.bf16 %v2736_v24, %v2730_v16  ;;  %v2738_v35 = vpop.f32.mrb[79].mxu0  ;;  %v3069_v16 = vpop.permute.xlu1 %3068 }
 0x4e4   : > { %v4153_v48 = vpack.c.bf16 %v2738_v35, %v2732_v6  ;;  %v3064_v6 = vpop.permute.xlu0 %3063 }
 0x4e6   : > { %v2742_v59 = vpop.f32.mrb[80].mxu0  ;;  %4154 = vmatprep.subr.bf16.mxu1 %v4153_v48 }
 0x4e7   : > { %v2744_v41 = vpop.f32.mrb[81].mxu0  ;;  %4156 = vmatpush1.bf16.msra.mxu1 %v4155_v3 }
 0x4ea   : > { %v2748_v63 = vpop.f32.mrb[82].mxu0 }
 0x4eb   : > { %v4159_v11 = vpack.c.bf16 %v2748_v63, %v2742_v59  ;;  %v2750_v52 = vpop.f32.mrb[83].mxu0 }
 0x4ec   : > { %v4157_v9 = vpack.c.bf16 %v2750_v52, %v2744_v41 }
 0x4ee   : > { %4158 = vmatprep.subr.bf16.mxu1 %v4157_v9 }
 0x4ef   : > { %4160 = vmatpush1.bf16.msra.mxu1 %v4159_v11 }
 0x4f2   : > { %3931 = vmatmul.mubr.msk.f32.vlgmr.msra.gmra.mrb[100].mxu1 %vm574_vm0, %v2761_v1  ;;  %v3079_v1 = vpop.permute.xlu1 %3078 }
 0x4f3   : > { %2863 = vmatprep.mubr.f32.mxu1 %v7121_v4 }
 0x4f6   : > { %3932 = vmatmul.mubr.msk.f32.gmra.mrb[102].mxu1 %vm574_vm0, %v2762_v54  ;;  %v3074_v54 = vpop.permute.xlu0 %3073 }
 0x4f7   : > { %2869 = vmatprep.mubr.f32.mxu1 %v7121_v4 }
 0x4fa   : > { %3933 = vmatmul.mubr.msk.f32.gmra.mrb[104].mxu1 %vm574_vm0, %v2763_v31 }
 0x4fb   : > { %2875 = vmatprep.mubr.f32.mxu1 %v7121_v4 }
 0x4fe   : > { %3934 = vmatmul.mubr.msk.f32.gmra.mrb[106].mxu1 %vm574_vm0, %v2764_v45 }
 0x4ff   : > { %2881 = vmatprep.mubr.f32.mxu1 %v7121_v4 }
 0x502   : > { %3935 = vmatmul.mubr.msk.f32.gmra.mrb[108].mxu1 %vm574_vm0, %v2765_v14 }
 0x503   : > { %2887 = vmatprep.mubr.f32.mxu1 %v7121_v4 }
 0x506   : > { %3936 = vmatmul.mubr.msk.f32.gmra.mrb[110].mxu1 %vm574_vm0, %v2766_v12 }
 0x507   : > { %2893 = vmatprep.mubr.f32.mxu1 %v7121_v4 }
 0x50a   : > { %3937 = vmatmul.mubr.msk.f32.gmra.mrb[112].mxu1 %vm574_vm0, %v2767_v49 }
 0x50b   : > { %2899 = vmatprep.mubr.f32.mxu1 %v7121_v4 }
 0x50e   : > { %3938 = vmatmul.mubr.msk.f32.gmra.mrb[114].mxu1 %vm574_vm0, %v2768_v43 }
 0x50f   : > { %2994 = vmatprep.mubr.f32.mxu1 %v7121_v4 }
 0x51a   : > { %v2641_v53 = vpop.f32.mrb[92].mxu1 }
 0x51b   : > { %v2643_v47 = vpop.f32.mrb[93].mxu1 }
 0x51e   : > { %v2647_v7 = vpop.f32.mrb[94].mxu1 }
 0x51f   : > { %v4163_v44 = vpack.c.bf16 %v2647_v7, %v2641_v53  ;;  %v2649_v58 = vpop.f32.mrb[95].mxu1 }
 0x520   : > { %v4161_v51 = vpack.c.bf16 %v2649_v58, %v2643_v47  ;;  %v3089_v58 = vpop.permute.xlu1 %3088 }
 0x522   : > { %v2653_v29 = vpop.f32.mrb[96].mxu1  ;;  %4162 = vmatprep.subr.bf16.mxu1 %v4161_v51  ;;  %v3084_v51 = vpop.permute.xlu0 %3083 }
 0x523   : > { %v2655_v40 = vpop.f32.mrb[97].mxu1  ;;  %4164 = vmatpush1.bf16.msra.mxu1 %v4163_v44 }
 0x526   : > { %v2659_v28 = vpop.f32.mrb[98].mxu1  ;;  %v3533_v57 = vpop.permute.xlu0 %3532 }
 0x527   : > { %v4167_v26 = vpack.c.bf16 %v2659_v28, %v2653_v29  ;;  %v2661_v22 = vpop.f32.mrb[99].mxu1 }
 0x528   : > { %v4165_v0 = vpack.c.bf16 %v2661_v22, %v2655_v40 }
 0x52a   : > { %4166 = vmatprep.subr.bf16.mxu1 %v4165_v0 }
 0x52b   : > { %4168 = vmatpush1.bf16.msra.mxu1 %v4167_v26 }
 0x52e   : > { %3939 = vmatmul.mubr.msk.f32.vlgmr.msra.gmra.mrb[100].mxu1 %vm574_vm0, %v2753_v36 }
 0x52f   : > { %3000 = vmatprep.mubr.f32.mxu1 %v7121_v4 }
 0x532   : > { %3940 = vmatmul.mubr.msk.f32.gmra.mrb[102].mxu1 %vm574_vm0, %v2754_v34 }
 0x533   : > { %3006 = vmatprep.mubr.f32.mxu1 %v7121_v4 }
 0x536   : > { %3941 = vmatmul.mubr.msk.f32.gmra.mrb[104].mxu1 %vm574_vm0, %v2755_v61  ;;  %v3107_v61 = vld [vmem:[%s6596_s9] sm:$0xff] }
 0x537   : > { %3012 = vmatprep.mubr.f32.mxu1 %v7121_v4 }
 0x53a   : > { %3942 = vmatmul.mubr.msk.f32.gmra.mrb[106].mxu1 %vm574_vm0, %v2756_v21  ;;  %v3108_v21 = vld [vmem:[%s6596_s9 + $0x8] sm:$0xff] }
 0x53b   : > { %3018 = vmatprep.mubr.f32.mxu1 %v7121_v4 }
 0x53e   : > { %3943 = vmatmul.mubr.msk.f32.gmra.mrb[108].mxu1 %vm574_vm0, %v2757_v30  ;;  %v3109_v30 = vld [vmem:[%s6596_s9 + $0x10] sm:$0xff] }
 0x53f   : > { %3024 = vmatprep.mubr.f32.mxu1 %v7121_v4 }
 0x542   : > { %3944 = vmatmul.mubr.msk.f32.gmra.mrb[110].mxu1 %vm574_vm0, %v2758_v19  ;;  %v3110_v19 = vld [vmem:[%s6596_s9 + $0x18] sm:$0xff] }
 0x543   : > { %3030 = vmatprep.mubr.f32.mxu1 %v7121_v4 }
 0x546   : > { %3945 = vmatmul.mubr.msk.f32.gmra.mrb[112].mxu1 %vm574_vm0, %v2759_v50  ;;  %v3111_v50 = vld [vmem:[%s6596_s9 + $0x20] sm:$0xff] }
 0x547   : > { %3036 = vmatprep.mubr.f32.mxu1 %v7121_v4 }
 0x54a   : > { %3946 = vmatmul.mubr.msk.f32.gmra.mrb[114].mxu1 %vm574_vm0, %v2760_v27  ;;  %v3112_v27 = vld [vmem:[%s6596_s9 + $0x28] sm:$0xff] }
 0x601   : > { %v2996_v60 = vpop.f32.mrb[100].mxu1 }
 0x602   : > { %v2998_v13 = vpop.f32.mrb[101].mxu1  ;;  %v3091_v10 = vadd.f32 %v3054_v20, %v2996_v60 }
 0x603   : > { %v3092_v18 = vadd.f32 %v3054_v20, %v2998_v13  ;;  %v6497_v20 = vpop.permute.xlu0 %3542  ;;  %v6499_v13 = vpop.permute.xlu1 %3537 }
 0x605   : > { %v3002_v25 = vpop.f32.mrb[102].mxu1 }
 0x606   : > { %v3093_v23 = vadd.f32 %v3059_v55, %v3002_v25  ;;  %v3004_v2 = vpop.f32.mrb[103].mxu1 }
 0x607   : > { %v3094_v62 = vadd.f32 %v3059_v55, %v3004_v2 }
 0x608   : > { %v4179_v42 = vpack.c.bf16 %v3093_v23, %v3091_v10  ;;  %v3493_v10 = vpop.permute.xlu0 %3492 }
 0x609   : > { %v4177_v39 = vpack.c.bf16 %v3094_v62, %v3092_v18  ;;  %v3008_v46 = vpop.f32.mrb[104].mxu1 }
 0x60a   : > { %v3010_v32 = vpop.f32.mrb[105].mxu1  ;;  %v3095_v3 = vadd.f32 %v3064_v6, %v3008_v46 }
 0x60b   : > { %4178 = vmatprep.subr.bf16.mxu0 %v4177_v39  ;;  %v3096_v59 = vadd.f32 %v3064_v6, %v3010_v32 }
 0x60c   : > { %4180 = vmatpush1.bf16.msra.mxu0 %v4179_v42 }
 0x60d   : > { %v3014_v24 = vpop.f32.mrb[106].mxu1 }
 0x60e   : > { %v3097_v35 = vadd.f32 %v3069_v16, %v3014_v24  ;;  %v3016_v48 = vpop.f32.mrb[107].mxu1 }
 0x60f   : > { %v3098_v41 = vadd.f32 %v3069_v16, %v3016_v48 }
 0x610   : > { %v4183_v63 = vpack.c.bf16 %v3097_v35, %v3095_v3 }
 0x611   : > { %v4181_v11 = vpack.c.bf16 %v3098_v41, %v3096_v59  ;;  %v3020_v52 = vpop.f32.mrb[108].mxu1  ;;  %v3503_v41 = vpop.permute.xlu0 %3502 }
 0x612   : > { %v3022_v9 = vpop.f32.mrb[109].mxu1  ;;  %v3099_v45 = vadd.f32 %v3074_v54, %v3020_v52 }
 0x613   : > { %4182 = vmatprep.subr.bf16.mxu0 %v4181_v11  ;;  %v3100_v49 = vadd.f32 %v3074_v54, %v3022_v9 }
 0x614   : > { %4184 = vmatpush1.bf16.msra.mxu0 %v4183_v63 }
 0x615   : > { %v3026_v31 = vpop.f32.mrb[110].mxu1 }
 0x616   : > { %v3101_v14 = vadd.f32 %v3079_v1, %v3026_v31  ;;  %v3028_v12 = vpop.f32.mrb[111].mxu1 }
 0x617   : > { %v3102_v43 = vadd.f32 %v3079_v1, %v3028_v12 }
 0x618   : > { %v4187_v53 = vpack.c.bf16 %v3101_v14, %v3099_v45 }
 0x619   : > { %v4185_v47 = vpack.c.bf16 %v3102_v43, %v3100_v49  ;;  %v3032_v7 = vpop.f32.mrb[112].mxu1 }
 0x61a   : > { %v3034_v44 = vpop.f32.mrb[113].mxu1  ;;  %v3103_v40 = vadd.f32 %v3084_v51, %v3032_v7 }
 0x61b   : > { %4186 = vmatprep.subr.bf16.mxu0 %v4185_v47  ;;  %v3104_v22 = vadd.f32 %v3084_v51, %v3034_v44 }
 0x61c   : > { %4188 = vmatpush1.bf16.msra.mxu0 %v4187_v53 }
 0x61d   : > { %v3038_v29 = vpop.f32.mrb[114].mxu1 }
 0x61e   : > { %v3105_v28 = vadd.f32 %v3089_v58, %v3038_v29  ;;  %v3040_v26 = vpop.f32.mrb[115].mxu1 }
 0x61f   : > { %v3106_v0 = vadd.f32 %v3089_v58, %v3040_v26  ;;  %v3513_v26 = vpop.permute.xlu0 %3512 }
 0x620   : > { %v4191_v36 = vpack.c.bf16 %v3105_v28, %v3103_v40 }
 0x621   : > { %v4189_v34 = vpack.c.bf16 %v3106_v0, %v3104_v22 }
 0x623   : > { %4190 = vmatprep.subr.bf16.mxu0 %v4189_v34 }
 0x624   : > { %4192 = vmatpush1.bf16.msra.mxu0 %v4191_v36 }
 0x627   : > { %3959 = vmatmul.mubr.msk.f32.vlgmr.msra.gmra.mrb[84].mxu0 %vm3304_vm1, %v3107_v61 }
 0x628   : > { %3411 = vmatprep.mubr.f32.mxu0 %v7121_v4 }
 0x62b   : > { %3960 = vmatmul.mubr.msk.f32.gmra.mrb[86].mxu0 %vm3304_vm1, %v3108_v21 }
 0x62c   : > { %3417 = vmatprep.mubr.f32.mxu0 %v7121_v4 }
 0x62f   : > { %3961 = vmatmul.mubr.msk.f32.gmra.mrb[88].mxu0 %vm3304_vm1, %v3109_v30 }
 0x630   : > { %3423 = vmatprep.mubr.f32.mxu0 %v7121_v4 }
 0x633   : > { %3962 = vmatmul.mubr.msk.f32.gmra.mrb[90].mxu0 %vm3304_vm1, %v3110_v19 }
 0x634   : > { %3429 = vmatprep.mubr.f32.mxu0 %v7121_v4 }
 0x637   : > { %3963 = vmatmul.mubr.msk.f32.gmra.mrb[92].mxu0 %vm3304_vm1, %v3111_v50 }
 0x638   : > { %3435 = vmatprep.mubr.f32.mxu0 %v7121_v4 }
 0x63b   : > { %3964 = vmatmul.mubr.msk.f32.gmra.mrb[94].mxu0 %vm3304_vm1, %v3112_v27 }
 0x63c   : > { %3441 = vmatprep.mubr.f32.mxu0 %v7121_v4 }
 0x63f   : > { %3965 = vmatmul.mubr.msk.f32.gmra.mrb[96].mxu0 %vm3304_vm1, %v3113_v33 }
 0x640   : > { %3447 = vmatprep.mubr.f32.mxu0 %v7121_v4 }
 0x643   : > { %3966 = vmatmul.mubr.msk.f32.gmra.mrb[98].mxu0 %vm3304_vm1, %v3114_v38 }
 0x644   : > { %3453 = vmatprep.mubr.f32.mxu0 %v7121_v4 }
 0x647   : > { %3967 = vmatmul.mubr.msk.f32.gmra.mrb[100].mxu0 %vm3304_vm1, %v3115_v56 }
 0x648   : > { %3459 = vmatprep.mubr.f32.mxu0 %v7121_v4 }
 0x64b   : > { %3968 = vmatmul.mubr.msk.f32.gmra.mrb[102].mxu0 %vm3304_vm1, %v3116_v15 }
 0x64c   : > { %3465 = vmatprep.mubr.f32.mxu0 %v7121_v4 }
 0x64f   : > { %3969 = vmatmul.mubr.msk.f32.gmra.mrb[104].mxu0 %vm3304_vm1, %v3117_v37 }
 0x650   : > { %3471 = vmatprep.mubr.f32.mxu0 %v7121_v4  ;;  %v6501_v4 = vpop.permute.xlu1 %3547 }
 0x653   : > { %3970 = vmatmul.mubr.msk.f32.gmra.mrb[106].mxu0 %vm3304_vm1, %v3118_v5 }
 0x654   : > { %v3498_v16 = vpop.permute.xlu1 %3497 }
 0x658   : > { %v3508_v9 = vpop.permute.xlu1 %3507 }
 0x6fa   : > { %v3407_v8 = vpop.f32.mrb[84].mxu0 }
 0x6fb   : > { %v3409_v17 = vpop.f32.mrb[85].mxu0  ;;  %v3550_v2 = vadd.f32 %v3493_v10, %v3407_v8 }
 0x6fc   : > { %v3551_v18 = vadd.f32 %v3493_v10, %v3409_v17 }
 0x6fd   : > { %v3979_v39 = vmul.f32 -1.442695, %v3550_v2 }
 0x6fe   : > { %v3413_v60 = vpop.f32.mrb[86].mxu0  ;;  %v3980_v46 = vmul.f32 -1.442695, %v3551_v18 }
 0x6ff   : > { %v3415_v55 = vpop.f32.mrb[87].mxu0  ;;  %4633 = vpow2.f32 %v3979_v39  ;;  %v3552_v24 = vadd.f32 %v3498_v16, %v3413_v60 }
 0x700   : > { %4635 = vpow2.f32 %v3980_v46  ;;  %v3553_v3 = vadd.f32 %v3498_v16, %v3415_v55  ;;  %v3518_v55 = vpop.permute.xlu1 %3517 }
 0x701   : > { %v3981_v59 = vmul.f32 -1.442695, %v3552_v24 }
 0x702   : > { %v3419_v25 = vpop.f32.mrb[88].mxu0  ;;  %v3982_v63 = vmul.f32 -1.442695, %v3553_v3 }
 0x703   : > { %v3421_v23 = vpop.f32.mrb[89].mxu0  ;;  %v3554_v11 = vadd.f32 %v3503_v41, %v3419_v25  ;;  %4637 = vpow2.f32 %v3981_v59 }
 0x704   : > { %v3555_v1 = vadd.f32 %v3503_v41, %v3421_v23  ;;  %4639 = vpow2.f32 %v3982_v63 }
 0x705   : > { %v3983_v14 = vmul.f32 -1.442695, %v3554_v11 }
 0x706   : > { %v3425_v62 = vpop.f32.mrb[90].mxu0  ;;  %v3984_v43 = vmul.f32 -1.442695, %v3555_v1 }
 0x707   : > { %v3427_v42 = vpop.f32.mrb[91].mxu0  ;;  %v3556_v31 = vadd.f32 %v3508_v9, %v3425_v62  ;;  %4641 = vpow2.f32 %v3983_v14 }
 0x708   : > { %v3557_v44 = vadd.f32 %v3508_v9, %v3427_v42  ;;  %4643 = vpow2.f32 %v3984_v43  ;;  %v3523_v9 = vpop.permute.xlu0 %3522 }
 0x709   : > { %v4634_v45 = vpop.eup %4633  ;;  %v3985_v47 = vmul.f32 -1.442695, %v3556_v31 }
 0x70a   : > { %v3431_v32 = vpop.f32.mrb[92].mxu0  ;;  %v4636_v49 = vpop.eup %4635  ;;  %v3686_v7 = vadd.f32 1.0, %v4634_v45  ;;  %v3986_v22 = vmul.f32 -1.442695, %v3557_v44 }
 0x70b   : > { %v6503_v6 = vpop.f32.mrb[93].mxu0  ;;  %v3687_v58 = vadd.f32 1.0, %v4636_v49  ;;  %4645 = vpow2.f32 %v3985_v47  ;;  %v3558_v34 = vadd.f32 %v3513_v26, %v3431_v32 }
 0x70c   : > { %4647 = vrcp.f32 %v3686_v7  ;;  %v3528_v7 = vpop.permute.xlu1 %3527 }
 0x70d   : > { %v4638_v36 = vpop.eup %4637  ;;  %4649 = vrcp.f32 %v3687_v58 }
 0x70e   : > { %v6505_v35 = vpop.f32.mrb[94].mxu0  ;;  %v4640_v30 = vpop.eup %4639  ;;  %v3688_v33 = vadd.f32 1.0, %v4638_v36 }
 0x70f   : > { %v6507_v48 = vpop.f32.mrb[95].mxu0  ;;  %v3689_v56 = vadd.f32 1.0, %v4640_v30  ;;  %v3560_v23 = vadd.f32 %v3518_v55, %v6505_v35 }
 0x710   : > { %v3561_v59 = vadd.f32 %v3518_v55, %v6507_v48 }
 0x711   : > { %v4642_v8 = vpop.eup %4641 }
 0x712   : > { %v6509_v52 = vpop.f32.mrb[96].mxu0  ;;  %v4644_v60 = vpop.eup %4643  ;;  %v3690_v44 = vadd.f32 1.0, %v4642_v8 }
 0x713   : > { %v6511_v54 = vpop.f32.mrb[97].mxu0 }
 0x714   : > { %v3563_v14 = vadd.f32 %v3523_v9, %v6511_v54  ;;  %v3691_v54 = vadd.f32 1.0, %v4644_v60 }
 0x715   : > { %v6522_v10 = vpop.eup %4645 }
 0x716   : > { %v6513_v12 = vpop.f32.mrb[98].mxu0  ;;  %v6525_v62 = vpop.eup %4647 }
 0x717   : > { %v6515_v53 = vpop.f32.mrb[99].mxu0 }
 0x71a   : > { %v3455_v51 = vpop.f32.mrb[100].mxu0 }
 0x71b   : > { %v3566_v29 = vadd.f32 %v3533_v57, %v3455_v51  ;;  %v3457_v40 = vpop.f32.mrb[101].mxu0 }
 0x71c   : > { %v3567_v28 = vadd.f32 %v3533_v57, %v3457_v40 }
 0x71d   : > { %v3971_v0 = vmul.f32 -1.442695, %v3566_v29 }
 0x71e   : > { %v3972_v61 = vmul.f32 -1.442695, %v3567_v28  ;;  %v3461_v21 = vpop.f32.mrb[102].mxu0 }
 0x71f   : > { %4651 = vpow2.f32 %v3971_v0  ;;  %v3568_v19 = vadd.f32 %v6499_v13, %v3461_v21  ;;  %v3463_v50 = vpop.f32.mrb[103].mxu0 }
 0x720   : > { %4653 = vpow2.f32 %v3972_v61  ;;  %v3569_v27 = vadd.f32 %v6499_v13, %v3463_v50  ;;  %v3559_v13 = vadd.f32 %v3513_v26, %v6503_v6  ;;  %v4713_v50 = vld [vmem:[%s4827_s20] sm:$0xff] }
 0x721   : > { %4655 = vpow2.f32 %v3986_v22  ;;  %v3973_v38 = vmul.f32 -1.442695, %v3568_v19  ;;  %v3565_v22 = vadd.f32 %v3528_v7, %v6515_v53  ;;  %v3692_v53 = vadd.f32 1.0, %v6522_v10 }
 0x722   : > { %4657 = vtanh.f32 %v3558_v34  ;;  %v3974_v15 = vmul.f32 -1.442695, %v3569_v27  ;;  %v3467_v37 = vpop.f32.mrb[104].mxu0 }
 0x723   : > { %4659 = vpow2.f32 %v3973_v38  ;;  %v3570_v5 = vadd.f32 %v6497_v20, %v3467_v37  ;;  %v3469_v57 = vpop.f32.mrb[105].mxu0 }
 0x724   : > { %4661 = vpow2.f32 %v3974_v15  ;;  %v3571_v17 = vadd.f32 %v6497_v20, %v3469_v57  ;;  %v6528_v20 = vpop.eup %4649 }
 0x725   : > { %4663 = vrcp.f32 %v3688_v33  ;;  %v3975_v25 = vmul.f32 -1.442695, %v3570_v5 }
 0x726   : > { %4665 = vrcp.f32 %v3689_v56  ;;  %v3976_v2 = vmul.f32 -1.442695, %v3571_v17  ;;  %v3473_v18 = vpop.f32.mrb[106].mxu0  ;;  %v4714_v56 = vld [vmem:[%s4827_s20 + $0x8] sm:$0xff] }
 0x727   : > { %4667 = vpow2.f32 %v3975_v25  ;;  %v3572_v42 = vadd.f32 %v6501_v4, %v3473_v18  ;;  %v3475_v39 = vpop.f32.mrb[107].mxu0 }
 0x728   : > { %4669 = vpow2.f32 %v3976_v2  ;;  %v3573_v46 = vadd.f32 %v6501_v4, %v3475_v39  ;;  %v3562_v4 = vadd.f32 %v3523_v9, %v6509_v52  ;;  %v3564_v52 = vadd.f32 %v3528_v7, %v6513_v12  ;;  %v4715_v2 = vld [vmem:[%s4827_s20 + $0x10] sm:$0xff] }
 0x729   : > { %v4652_v32 = vpop.eup %4651  ;;  %4671 = vtanh.f32 %v3559_v13  ;;  %v3977_v16 = vmul.f32 -1.442695, %v3572_v42 }
 0x72a   : > { %v4654_v6 = vpop.eup %4653  ;;  %4673 = vtanh.f32 %v3560_v23  ;;  %v3598_v24 = vadd.f32 1.0, %v4652_v32  ;;  %v3978_v3 = vmul.f32 -1.442695, %v3573_v46  ;;  %v4716_v46 = vld [vmem:[%s4827_s20 + $0x18] sm:$0xff] }
 0x72b   : > { %v6531_v35 = vpop.eup %4655  ;;  %v3599_v41 = vadd.f32 1.0, %v4654_v6  ;;  %4675 = vpow2.f32 %v3977_v16 }
 0x72c   : > { %v4658_v63 = vpop.eup %4657  ;;  %4677 = vrcp.f32 %v3598_v24  ;;  %v3693_v10 = vadd.f32 1.0, %v6531_v35 }
 0x72d   : > { %v4660_v11 = vpop.eup %4659  ;;  %4679 = vrcp.f32 %v3599_v41 }
 0x72e   : > { %v4662_v1 = vpop.eup %4661  ;;  %v3600_v31 = vadd.f32 1.0, %v4660_v11  ;;  %4681 = vpow2.f32 %v3978_v3  ;;  %v4717_v11 = vld [vmem:[%s4827_s20 + $0x20] sm:$0xff] }
 0x72f   : > { %v6535_v45 = vpop.eup %4663  ;;  %4683 = vtanh.f32 %v3561_v59  ;;  %v3601_v49 = vadd.f32 1.0, %v4662_v1 }
 0x730   : > { %v6538_v43 = vpop.eup %4665  ;;  %4685 = vrcp.f32 %v3600_v31  ;;  %v4718_v31 = vld [vmem:[%s4827_s20 + $0x28] sm:$0xff] }
 0x731   : > { %v4668_v48 = vpop.eup %4667  ;;  %4687 = vrcp.f32 %v3601_v49 }
 0x732   : > { %v4670_v47 = vpop.eup %4669  ;;  %4689 = vtanh.f32 %v3562_v4  ;;  %v3602_v58 = vadd.f32 1.0, %v4668_v48 }
 0x733   : > { %v4672_v51 = vpop.eup %4671  ;;  %4691 = vtanh.f32 %v3563_v14  ;;  %v3603_v29 = vadd.f32 1.0, %v4670_v47 }
 0x734   : > { %v4674_v40 = vpop.eup %4673  ;;  %4693 = vrcp.f32 %v3602_v58 }
 0x735   : > { %v4676_v28 = vpop.eup %4675  ;;  %4695 = vrcp.f32 %v3603_v29 }
 0x736   : > { %v4678_v26 = vpop.eup %4677  ;;  %4697 = vrcp.f32 %v3690_v44  ;;  %v3604_v0 = vadd.f32 1.0, %v4676_v28 }
 0x737   : > { %v4680_v36 = vpop.eup %4679  ;;  %4699 = vtanh.f32 %v3564_v52  ;;  %v3630_v34 = vmul.f32 %v4678_v26, %v4658_v63  ;;  %v3638_v61 = vsub.f32 1.0, %v4678_v26 }
 0x738   : > { %v4682_v21 = vpop.eup %4681  ;;  %v3631_v12 = vmul.f32 %v4680_v36, %v4672_v51  ;;  %v3639_v30 = vsub.f32 1.0, %v4680_v36  ;;  %4701 = vrcp.f32 %v3604_v0 }
 0x739   : > { %v4684_v19 = vpop.eup %4683  ;;  %4703 = vrcp.f32 %v3691_v54  ;;  %v3646_v27 = vmul.f32 %v4713_v50, %v3638_v61  ;;  %v3605_v33 = vadd.f32 1.0, %v4682_v21 }
 0x73a   : > { %v4686_v38 = vpop.eup %4685  ;;  %4705 = vtanh.f32 %v3565_v22  ;;  %v3647_v15 = vmul.f32 %v4714_v56, %v3639_v30  ;;  %v4720_v22 = vld [vmem:[%s4827_s20 + $0x38] sm:$0xff] }
 0x73b   : > { %v4688_v37 = vpop.eup %4687  ;;  %v3654_v5 = vadd.f32 %v3646_v27, %v3630_v34  ;;  %v3632_v57 = vmul.f32 %v4686_v38, %v4674_v40  ;;  %v3640_v8 = vsub.f32 1.0, %v4686_v38  ;;  %4707 = vrcp.f32 %v3605_v33 }
 0x73c   : > { %v4690_v17 = vpop.eup %4689  ;;  %v3655_v60 = vadd.f32 %v3647_v15, %v3631_v12  ;;  %v3633_v55 = vmul.f32 %v4688_v37, %v4684_v19  ;;  %v3641_v13 = vsub.f32 1.0, %v4688_v37  ;;  %4709 = vrcp.f32 %v3692_v53 }
 0x73d   : > { %v4692_v25 = vpop.eup %4691  ;;  %v3710_v23 = vmul.f32 %v6525_v62, %v3654_v5  ;;  %3726 = vst [vmem:[%s6547_s23] sm:$0xff] %v3654_v5  ;;  %v3648_v18 = vmul.f32 %v4715_v2, %v3640_v8  ;;  %4711 = vrcp.f32 %v3693_v10 }
 0x73e   : > { %v4694_v42 = vpop.eup %4693  ;;  %v3711_v39 = vmul.f32 %v6528_v20, %v3655_v60  ;;  %3727 = vst [vmem:[%s6547_s23 + $0x8] sm:$0xff] %v3655_v60  ;;  %v3649_v32 = vmul.f32 %v4716_v46, %v3641_v13 }
 0x73f   : > { %v4696_v16 = vpop.eup %4695  ;;  %3718 = vst [vmem:[%s6555_s28] sm:$0xff] %v3710_v23  ;;  %v3656_v6 = vadd.f32 %v3648_v18, %v3632_v57  ;;  %v3634_v24 = vmul.f32 %v4694_v42, %v4690_v17  ;;  %v3642_v62 = vsub.f32 1.0, %v4694_v42 }
 0x740   : > { %v4698_v3 = vpop.eup %4697  ;;  %3719 = vst [vmem:[%s6555_s28 + $0x8] sm:$0xff] %v3711_v39  ;;  %v3657_v35 = vadd.f32 %v3649_v32, %v3633_v55  ;;  %v3635_v59 = vmul.f32 %v4696_v16, %v4692_v25  ;;  %v3643_v41 = vsub.f32 1.0, %v4696_v16 }
 0x741   : > { %v4700_v63 = vpop.eup %4699  ;;  %v3712_v20 = vmul.f32 %v6535_v45, %v3656_v6  ;;  %3728 = vst [vmem:[%s6547_s23 + $0x10] sm:$0xff] %v3656_v6  ;;  %v3650_v9 = vmul.f32 %v4717_v11, %v3642_v62 }
 0x742   : > { %v4702_v1 = vpop.eup %4701  ;;  %v3713_v4 = vmul.f32 %v6538_v43, %v3657_v35  ;;  %3729 = vst [vmem:[%s6547_s23 + $0x18] sm:$0xff] %v3657_v35  ;;  %v3651_v14 = vmul.f32 %v4718_v31, %v3643_v41  ;;  %v4719_v43 = vld [vmem:[%s4827_s20 + $0x30] sm:$0xff] }
 0x743   : > { %v4704_v49 = vpop.eup %4703  ;;  %3720 = vst [vmem:[%s6555_s28 + $0x10] sm:$0xff] %v3712_v20  ;;  %v3658_v48 = vadd.f32 %v3650_v9, %v3634_v24  ;;  %v3636_v47 = vmul.f32 %v4702_v1, %v4700_v63  ;;  %v3644_v7 = vsub.f32 1.0, %v4702_v1 }
 0x744   : > { %v4706_v45 = vpop.eup %4705  ;;  %3721 = vst [vmem:[%s6555_s28 + $0x18] sm:$0xff] %v3713_v4  ;;  %v3659_v44 = vadd.f32 %v3651_v14, %v3635_v59 }
 0x745   : > { %v4708_v58 = vpop.eup %4707  ;;  %v3714_v51 = vmul.f32 %v4698_v3, %v3658_v48  ;;  %3730 = vst [vmem:[%s6547_s23 + $0x20] sm:$0xff] %v3658_v48  ;;  %v3652_v52 = vmul.f32 %v4719_v43, %v3644_v7 }
 0x746   : > { %v3715_v29 = vmul.f32 %v4704_v49, %v3659_v44  ;;  %3731 = vst [vmem:[%s6547_s23 + $0x28] sm:$0xff] %v3659_v44  ;;  %v3637_v40 = vmul.f32 %v4708_v58, %v4706_v45  ;;  %v3645_v28 = vsub.f32 1.0, %v4708_v58  ;;  %v4710_v26 = vpop.eup %4709 }
 0x747   : > { %3722 = vst [vmem:[%s6555_s28 + $0x20] sm:$0xff] %v3714_v51  ;;  %v3660_v54 = vadd.f32 %v3652_v52, %v3636_v47  ;;  %v4712_v61 = vpop.eup %4711 }
 0x748   : > { %3723 = vst [vmem:[%s6555_s28 + $0x28] sm:$0xff] %v3715_v29  ;;  %v3653_v0 = vmul.f32 %v4720_v22, %v3645_v28 }
 0x749   : > { %v3716_v36 = vmul.f32 %v4710_v26, %v3660_v54  ;;  %3732 = vst [vmem:[%s6547_s23 + $0x30] sm:$0xff] %v3660_v54 }
 0x74a   : > { %v3661_v34 = vadd.f32 %v3653_v0, %v3637_v40 }
 0x74b   : > { %3724 = vst [vmem:[%s6555_s28 + $0x30] sm:$0xff] %v3716_v36 }
 0x74c   : > { %v3717_v21 = vmul.f32 %v4712_v61, %v3661_v34  ;;  %3733 = vst [vmem:[%s6547_s23 + $0x38] sm:$0xff] %v3661_v34 }
 0x74e   : > { %3725 = vst [vmem:[%s6555_s28 + $0x38] sm:$0xff] %v3717_v21 }
 0x74f PF: > { %s24_s25 = sadd.s32 1, %s4727_s25  }
 0x750   : > { %p21_p4 = scmp.ge.s32.totalorder %s24_s25, 4  }
 0x752   :  { %23 = sbr.rel (!%p21_p4) target bundleno = 1 (0x1), region = 113 }

</bundles_post_ra>
